<compile_context>
chip_gen: v7x
topology: tpu7x:2x2x1
jax: 0.10.0
libtpu: 0.0.40
codegen_flags: <defaults>
</compile_context>

<pallas_src>
import jax
import jax.numpy as jnp
from jax import lax
from jax.experimental import pallas as pl
from jax.experimental.pallas import tpu as pltpu

_VMEM_LIMIT = 48 * 1024 * 1024


def _round_up(x, m):
    return ((x + m - 1) // m) * m


# ----------------------------------------------------------------------------
# Hoisted input->gate projection: gx = x_flat @ W_ih + b_ih  (fused gates, bf16 output)
# ----------------------------------------------------------------------------
def _gate_proj_kernel(x_ref, w_ref, b_ref, o_ref):
    o_ref[...] = (jnp.dot(x_ref[...], w_ref[...],
                          preferred_element_type=jnp.float32)
                  + b_ref[...]).astype(o_ref.dtype)


def gate_projection(x_flat, w, b, *, row_tile=256):
    """x_flat (N, E) bf16, w (E, 3H) bf16, b (1, 3H) f32 -> (N, 3H) bf16."""
    N, E = x_flat.shape
    G = w.shape[1]
    tn = min(row_tile, _round_up(N, 8))
    Np = _round_up(N, tn)
    if Np != N:
        x_flat = jnp.pad(x_flat, ((0, Np - N), (0, 0)))
    out = pl.pallas_call(
        _gate_proj_kernel,
        out_shape=jax.ShapeDtypeStruct((Np, G), jnp.bfloat16),
        grid=(Np // tn,),
        in_specs=[
            pl.BlockSpec((tn, E), lambda n: (n, 0)),
            pl.BlockSpec((E, G), lambda n: (0, 0)),
            pl.BlockSpec((1, G), lambda n: (0, 0)),
        ],
        out_specs=pl.BlockSpec((tn, G), lambda n: (n, 0)),
        compiler_params=pltpu.CompilerParams(
            dimension_semantics=("parallel",),
            vmem_limit_bytes=_VMEM_LIMIT),
    )(x_flat, w, b)
    return out[:N] if Np != N else out


# ----------------------------------------------------------------------------
# GRU recurrence: grid=(batch_blocks, T/T_CHUNK), unrolled chunk, h in VMEM scratch.
# Only the fused h @ W_hh matmul stays inside the recurrence. Output written
# batch-major (Bp, T, H) bf16 so no XLA transpose is needed downstream.
# ----------------------------------------------------------------------------
def _gru_chunk_kernel(gx_ref, len_ref, h0_ref, whh_ref, bhh_ref,
                      out_ref, hfin_ref, h_scr):
    tc = pl.program_id(1)
    t_chunk, _, G = gx_ref.shape
    H = G // 3

    @pl.when(tc == 0)
    def _():
        h_scr[...] = h0_ref[...]

    lens = len_ref[...]                          # (BB, 1) i32
    whh = whh_ref[...]                           # (H, 3H) bf16
    bhh = bhh_ref[...]                           # (1, 3H) f32
    h = h_scr[...]                               # (BB, H)  f32

    outs = []
    for t in range(t_chunk):                     # statically unrolled chunk
        gh = jnp.dot(h.astype(jnp.bfloat16), whh,
                     preferred_element_type=jnp.float32) + bhh        # (BB, 3H)
        gx = gx_ref[t].astype(jnp.float32)                            # (BB, 3H)
        # PyTorch nn.GRU gate order [r, z, n]; gx already contains b_ih.
        r = jax.nn.sigmoid(gx[:, 0:H] + gh[:, 0:H])
        z = jax.nn.sigmoid(gx[:, H:2 * H] + gh[:, H:2 * H])
        n = jnp.tanh(gx[:, 2 * H:] + r * gh[:, 2 * H:])
        h_new = n + z * (h - n)
        valid = (tc * t_chunk + t) < lens                             # (BB, 1) bool
        outs.append(jnp.where(valid, h_new, 0.0))                     # packed-seq semantics
        h = jnp.where(valid, h_new, h)

    h_scr[...] = h
    out_ref[...] = jnp.stack(outs, axis=1).astype(out_ref.dtype)      # (BB, T_CHUNK, H)

    @pl.when(tc == pl.num_programs(1) - 1)
    def _():
        hfin_ref[...] = h_scr[...]


def gru_forward(gx, lengths, h0, w_hh, b_hh, *, block_b, t_chunk):
    """gx (Tp, Bp, 3H) bf16, lengths (Bp,1) i32, h0 (Bp,H) f32,
    w_hh (H,3H) bf16, b_hh (1,3H) f32 -> out (Bp,Tp,H) bf16, h_final (Bp,H) f32."""
    Tp, Bp, G = gx.shape
    H = G // 3
    nb = Bp // block_b
    n_tc = Tp // t_chunk
    out, hfin = pl.pallas_call(
        _gru_chunk_kernel,
        out_shape=(jax.ShapeDtypeStruct((Bp, Tp, H), jnp.bfloat16),
                   jax.ShapeDtypeStruct((Bp, H), jnp.float32)),
        grid=(nb, n_tc),
        in_specs=[
            pl.BlockSpec((t_chunk, block_b, G), lambda b, tc: (tc, b, 0)),
            pl.BlockSpec((block_b, 1), lambda b, tc: (b, 0)),
            pl.BlockSpec((block_b, H), lambda b, tc: (b, 0)),
            pl.BlockSpec((H, G), lambda b, tc: (0, 0)),
            pl.BlockSpec((1, G), lambda b, tc: (0, 0)),
        ],
        out_specs=(pl.BlockSpec((block_b, t_chunk, H), lambda b, tc: (b, tc, 0)),
                   pl.BlockSpec((block_b, H), lambda b, tc: (b, 0))),
        scratch_shapes=[pltpu.VMEM((block_b, H), jnp.float32)],
        compiler_params=pltpu.CompilerParams(
            dimension_semantics=("parallel", "arbitrary"),
            vmem_limit_bytes=_VMEM_LIMIT),
    )(gx, lengths, h0, w_hh, b_hh)
    return out, hfin


# ----------------------------------------------------------------------------
# Attention core: grid=(batch_blocks, Ty_blocks); ctx@W_in cached in VMEM scratch,
# masks from (B,1) lengths via jnp.where fill, approx-reciprocal softmax.
# ----------------------------------------------------------------------------
def _attention_core_kernel(dec_ref, ctx_ref, en_len_ref, cn_len_ref,
                           w_in_ref, w_out_c_ref, w_out_d_ref, att_ref, ctxin_scr):
    BB, TyB, H = dec_ref.shape
    Tx = ctx_ref.shape[1]
    f32, bf16 = jnp.float32, jnp.bfloat16
    ty = pl.program_id(1)

    @pl.when(ty == 0)
    def _():
        ctx_in = jnp.dot(ctx_ref[...].reshape(BB * Tx, H), w_in_ref[...],
                         preferred_element_type=f32)
        ctxin_scr[...] = ctx_in.reshape(BB, Tx, H).astype(bf16)

    dec = dec_ref[...]                                               # (BB, TyB, H) bf16
    dec_proj = jnp.dot(dec.reshape(BB * TyB, H), w_out_d_ref[...],
                       preferred_element_type=f32)                   # (BB*TyB, H)

    scores = jnp.einsum('bth,bsh->bts', dec, ctxin_scr[...],
                        preferred_element_type=f32)                  # (BB, TyB, Tx)

    t_ids = ty * TyB + lax.broadcasted_iota(jnp.int32, (TyB, Tx), 0)
    s_ids = lax.broadcasted_iota(jnp.int32, (TyB, Tx), 1)
    cn = cn_len_ref[...][:, :, None]                                 # (BB, 1, 1)
    en = en_len_ref[...][:, :, None]
    valid = (t_ids[None, :, :] < cn) & (s_ids[None, :, :] < en)
    scores = jnp.where(valid, scores, -1e6)

    m = jnp.max(scores, axis=-1, keepdims=True)
    e = jnp.exp(scores - m)
    attn = e * pl.reciprocal(jnp.sum(e, axis=-1, keepdims=True), approx=True)

    wctx = jnp.einsum('bts,bsh->bth', attn.astype(bf16), ctx_ref[...],
                      preferred_element_type=f32)                    # (BB, TyB, H)
    att = jnp.tanh(jnp.dot(wctx.reshape(BB * TyB, H).astype(bf16), w_out_c_ref[...],
                           preferred_element_type=f32) + dec_proj)
    att_ref[...] = att.reshape(BB, TyB, H).astype(att_ref.dtype)


def attention_core(dec, ctx, en_len, cn_len, w_in, w_out_c, w_out_d,
                   *, block_b, ty_block):
    Bp, Typ, H = dec.shape
    Tx = ctx.shape[1]
    nb = Bp // block_b
    n_ty = Typ // ty_block
    return pl.pallas_call(
        _attention_core_kernel,
        out_shape=jax.ShapeDtypeStruct((Bp, Typ, H), jnp.bfloat16),
        grid=(nb, n_ty),
        in_specs=[
            pl.BlockSpec((block_b, ty_block, H), lambda b, t: (b, t, 0)),
            pl.BlockSpec((block_b, Tx, H), lambda b, t: (b, 0, 0)),
            pl.BlockSpec((block_b, 1), lambda b, t: (b, 0)),
            pl.BlockSpec((block_b, 1), lambda b, t: (b, 0)),
            pl.BlockSpec((H, H), lambda b, t: (0, 0)),
            pl.BlockSpec((H, H), lambda b, t: (0, 0)),
            pl.BlockSpec((H, H), lambda b, t: (0, 0)),
        ],
        out_specs=pl.BlockSpec((block_b, ty_block, H), lambda b, t: (b, t, 0)),
        scratch_shapes=[pltpu.VMEM((block_b, Tx, H), jnp.bfloat16)],
        compiler_params=pltpu.CompilerParams(
            dimension_semantics=("parallel", "arbitrary"),
            vmem_limit_bytes=_VMEM_LIMIT),
    )(dec, ctx, en_len, cn_len, w_in, w_out_c, w_out_d)


# ----------------------------------------------------------------------------
# Vocab projection + log_softmax: pass 1 running-LSE, pass 2 recomputes the
# logits tile (flash-style) so the f32 logits never round-trip HBM.
# ----------------------------------------------------------------------------
def _vocab_lse_kernel(a_ref, w_ref, b_ref, lse_ref, m_scr, l_scr):
    v = pl.program_id(1)

    @pl.when(v == 0)
    def _():
        m_scr[...] = jnp.full(m_scr.shape, -jnp.inf, m_scr.dtype)
        l_scr[...] = jnp.zeros(l_scr.shape, l_scr.dtype)

    logits = jnp.dot(a_ref[...], w_ref[...],
                     preferred_element_type=jnp.float32) + b_ref[...]
    m_new = jnp.maximum(m_scr[...], jnp.max(logits, axis=-1, keepdims=True))
    l_scr[...] = (l_scr[...] * jnp.exp(m_scr[...] - m_new)
                  + jnp.sum(jnp.exp(logits - m_new), axis=-1, keepdims=True))
    m_scr[...] = m_new

    @pl.when(v == pl.num_programs(1) - 1)
    def _():
        lse_ref[...] = m_scr[...] + jnp.log(l_scr[...])


def _vocab_logp_kernel(a_ref, w_ref, b_ref, lse_ref, o_ref):
    logits = jnp.dot(a_ref[...], w_ref[...],
                     preferred_element_type=jnp.float32) + b_ref[...]
    o_ref[...] = logits - lse_ref[...]


def vocab_log_softmax(att_flat, w_voc, b_voc, *, row_tile=512, v_tile=1024):
    """att_flat (R, H) bf16, w_voc (H, V) bf16, b_voc (1, V) f32 -> (R, V) f32 log-probs."""
    R, H = att_flat.shape
    V = w_voc.shape[1]

    tv = min(v_tile, _round_up(V, 128))
    Vp = _round_up(V, tv)
    tr = min(row_tile, _round_up(R, 8))
    Rp = _round_up(R, tr)

    att_p = jnp.pad(att_flat, ((0, Rp - R), (0, 0)))
    w_p = jnp.pad(w_voc, ((0, 0), (0, Vp - V)))
    b_p = jnp.pad(b_voc, ((0, 0), (0, Vp - V)), constant_values=-1e30)

    grid = (Rp // tr, Vp // tv)
    in_specs = [
        pl.BlockSpec((tr, H), lambda r, v: (r, 0)),
        pl.BlockSpec((H, tv), lambda r, v: (0, v)),
        pl.BlockSpec((1, tv), lambda r, v: (0, v)),
    ]

    lse = pl.pallas_call(
        _vocab_lse_kernel,
        out_shape=jax.ShapeDtypeStruct((Rp, 1), jnp.float32),
        grid=grid,
        in_specs=in_specs,
        out_specs=pl.BlockSpec((tr, 1), lambda r, v: (r, 0)),
        scratch_shapes=[pltpu.VMEM((tr, 1), jnp.float32),
                        pltpu.VMEM((tr, 1), jnp.float32)],
        compiler_params=pltpu.CompilerParams(
            dimension_semantics=("parallel", "arbitrary"),
            vmem_limit_bytes=_VMEM_LIMIT),
    )(att_p, w_p, b_p)

    logp = pl.pallas_call(
        _vocab_logp_kernel,
        out_shape=jax.ShapeDtypeStruct((Rp, Vp), jnp.float32),
        grid=grid,
        in_specs=in_specs + [pl.BlockSpec((tr, 1), lambda r, v: (r, 0))],
        out_specs=pl.BlockSpec((tr, tv), lambda r, v: (r, v)),
        compiler_params=pltpu.CompilerParams(
            dimension_semantics=("parallel", "parallel"),
            vmem_limit_bytes=_VMEM_LIMIT),
    )(att_p, w_p, b_p, lse)
    return logp[:R, :V]


# ----------------------------------------------------------------------------
# Parameters + full forward
# ----------------------------------------------------------------------------
def init_params(key, en_vocab, cn_vocab, E, H):
    ks = jax.random.split(key, 15)
    w = lambda k, s: 0.1 * jax.random.normal(k, s, jnp.float32)
    return dict(
        emb_en=w(ks[0], (en_vocab, E)),
        emb_cn=w(ks[1], (cn_vocab, E)),
        # fused GRU gate weights; columns ordered [r | z | n] (PyTorch nn.GRU order)
        enc_w_ih=w(ks[2], (E, 3 * H)), enc_w_hh=w(ks[3], (H, 3 * H)),
        enc_b_ih=w(ks[4], (1, 3 * H)), enc_b_hh=w(ks[5], (1, 3 * H)),
        dec_w_ih=w(ks[6], (E, 3 * H)), dec_w_hh=w(ks[7], (H, 3 * H)),
        dec_b_ih=w(ks[8], (1, 3 * H)), dec_b_hh=w(ks[9], (1, 3 * H)),
        attn_w_in=w(ks[10], (H, H)),
        attn_w_out_c=w(ks[11], (H, H)),
        attn_w_out_d=w(ks[12], (H, H)),
        out_w=w(ks[13], (H, cn_vocab)),
        out_b=w(ks[14], (1, cn_vocab)),
    )


def attention_gru_forward(params, enData, enLength, cnData, cnLength):
    bf16, f32 = jnp.bfloat16, jnp.float32
    B, Tx = enData.shape
    _, Ty = cnData.shape
    E = params['emb_en'].shape[1]
    H = params['attn_w_in'].shape[0]
    V = params['out_w'].shape[1]

    T_CHUNK = 8
    block_b = min(128, _round_up(B, 8))
    Bp = _round_up(B, block_b)
    Txp = _round_up(Tx, T_CHUNK)
    Typ = _round_up(Ty, T_CHUNK)

    # bf16 views of matmul weights (f32 accumulation in the kernels)
    enc_w_ih = params['enc_w_ih'].astype(bf16)
    enc_w_hh = params['enc_w_hh'].astype(bf16)
    dec_w_ih = params['dec_w_ih'].astype(bf16)
    dec_w_hh = params['dec_w_hh'].astype(bf16)
    w_in = params['attn_w_in'].astype(bf16)
    w_out_c = params['attn_w_out_c'].astype(bf16)
    w_out_d = params['attn_w_out_d'].astype(bf16)
    w_voc = params['out_w'].astype(bf16)

    # time-major embedding gather: transpose the small int32 index matrices, not the (B,T,E) tensor.
    # TODO(synk): the nn.Embedding lookups stay as XLA jnp.take gathers (no Pallas gather kernel).
    en_ids = jnp.pad(enData, ((0, Bp - B), (0, Txp - Tx))).T          # (Txp, Bp)
    cn_ids = jnp.pad(cnData, ((0, Bp - B), (0, Typ - Ty))).T          # (Typ, Bp)
    x_tm = jnp.take(params['emb_en'], en_ids, axis=0).astype(bf16)    # (Txp, Bp, E)
    y_tm = jnp.take(params['emb_cn'], cn_ids, axis=0).astype(bf16)    # (Typ, Bp, E)

    en_len = jnp.pad(enLength.astype(jnp.int32), (0, Bp - B))[:, None]   # (Bp, 1)
    cn_len = jnp.pad(cnLength.astype(jnp.int32), (0, Bp - B))[:, None]

    # hoisted input->gate projections (one big fused-gate MXU matmul each), stored bf16
    gx_enc = gate_projection(x_tm.reshape(Txp * Bp, E), enc_w_ih,
                             params['enc_b_ih']).reshape(Txp, Bp, 3 * H)
    gx_dec = gate_projection(y_tm.reshape(Typ * Bp, E), dec_w_ih,
                             params['dec_b_ih']).reshape(Typ, Bp, 3 * H)

    # GRU recurrences (time-chunked, batch-major bf16 outputs, f32 hidden carry)
    h0 = jnp.zeros((Bp, H), f32)
    ctx, enc_h = gru_forward(gx_enc, en_len, h0, enc_w_hh, params['enc_b_hh'],
                             block_b=block_b, t_chunk=T_CHUNK)        # (Bp, Txp, H) bf16
    dec, _ = gru_forward(gx_dec, cn_len, enc_h, dec_w_hh, params['dec_b_hh'],
                         block_b=block_b, t_chunk=T_CHUNK)            # (Bp, Typ, H) bf16

    # attention core (decoder-time tiled, ctx@W_in cached in scratch)
    ty_blk = min(Typ, 128)
    Typ2 = _round_up(Typ, ty_blk)
    if Typ2 != Typ:
        dec = jnp.pad(dec, ((0, 0), (0, Typ2 - Typ), (0, 0)))
    att = attention_core(dec, ctx, en_len, cn_len, w_in, w_out_c, w_out_d,
                         block_b=block_b, ty_block=ty_blk)            # (Bp, Typ2, H) bf16

    # vocab projection + log_softmax (vocab-tiled, weights streamed once per row pass, no logits round-trip)
    att_rows = att[:B, :Ty, :].reshape(B * Ty, H)
    logp = vocab_log_softmax(att_rows, w_voc, params['out_b'])
    return logp.reshape(B, Ty, V)


# ----------------------------------------------------------------------------
# Pure-JAX reference (mirrors the kernels' bf16 matmul / bf16-gx precision)
# ----------------------------------------------------------------------------
def _ref_forward(params, enData, enLength, cnData, cnLength):
    bf16, f32 = jnp.bfloat16, jnp.float32
    B, Tx = enData.shape
    _, Ty = cnData.shape
    H = params['attn_w_in'].shape[0]

    def mm(a, b):
        return jnp.dot(a.astype(bf16), b.astype(bf16), preferred_element_type=f32)

    def run_gru(x, lengths, h0, wih, whh, bih, bhh):
        T = x.shape[1]
        mask = jnp.arange(T)[None, :] < lengths[:, None]

        def step(h, inp):
            x_t, m_t = inp
            gx = (mm(x_t, wih) + bih).astype(bf16).astype(f32)   # mirror bf16 gx storage
            gh = mm(h, whh) + bhh
            r = jax.nn.sigmoid(gx[:, :H] + gh[:, :H])
            z = jax.nn.sigmoid(gx[:, H:2 * H] + gh[:, H:2 * H])
            n = jnp.tanh(gx[:, 2 * H:] + r * gh[:, 2 * H:])
            h_new = n + z * (h - n)
            h_next = jnp.where(m_t, h_new, h)
            return h_next, jnp.where(m_t, h_new, 0.0)

        hT, outs = lax.scan(step, h0, (jnp.transpose(x, (1, 0, 2)), mask.T[:, :, None]))
        return jnp.transpose(outs, (1, 0, 2)), hT

    x = jnp.take(params['emb_en'], enData, axis=0)
    y = jnp.take(params['emb_cn'], cnData, axis=0)
    h0 = jnp.zeros((B, H), f32)
    ctx, enc_h = run_gru(x, enLength, h0, params['enc_w_ih'], params['enc_w_hh'],
                         params['enc_b_ih'], params['enc_b_hh'])
    dec, _ = run_gru(y, cnLength, enc_h, params['dec_w_ih'], params['dec_w_hh'],
                     params['dec_b_ih'], params['dec_b_hh'])

    en_mask = jnp.arange(Tx)[None, :] < enLength[:, None]
    cn_mask = jnp.arange(Ty)[None, :] < cnLength[:, None]
    valid = cn_mask[:, :, None] & en_mask[:, None, :]

    ctx_in = mm(ctx.reshape(B * Tx, H), params['attn_w_in']).reshape(B, Tx, H)
    scores = jnp.einsum('bth,bsh->bts', dec.astype(bf16), ctx_in.astype(bf16),
                        preferred_element_type=f32)
    scores = jnp.where(valid, scores, -1e6)
    attn = jax.nn.softmax(scores, axis=-1)
    wctx = jnp.einsum('bts,bsh->bth', attn.astype(bf16), ctx.astype(bf16),
                      preferred_element_type=f32)
    att = jnp.tanh(mm(wctx.reshape(B * Ty, H), params['attn_w_out_c'])
                   + mm(dec.reshape(B * Ty, H), params['attn_w_out_d']))
    logits = mm(att, params['out_w']) + params['out_b']
    return jax.nn.log_softmax(logits, axis=-1).reshape(B, Ty, -1)


if __name__ == "__main__":
    B, Tx, Ty = 2, 8, 8
    E, H = 32, 32
    EN_VOCAB, CN_VOCAB = 64, 64

    key = jax.random.PRNGKey(0)
    kp, kd1, kd2 = jax.random.split(key, 3)
    params = init_params(kp, EN_VOCAB, CN_VOCAB, E, H)

    enData = jax.random.randint(kd1, (B, Tx), 0, EN_VOCAB, dtype=jnp.int32)
    cnData = jax.random.randint(kd2, (B, Ty), 0, CN_VOCAB, dtype=jnp.int32)
    enLength = jnp.array([Tx, 5], dtype=jnp.int32)   # sorted descending, like pack_padded
    cnLength = jnp.array([Ty, 6], dtype=jnp.int32)

    fwd = jax.jit(attention_gru_forward)
    out = jax.block_until_ready(fwd(params, enData, enLength, cnData, cnLength))
    assert out.shape == (B, Ty, CN_VOCAB)

    ref = _ref_forward(params, enData, enLength, cnData, cnLength)
    assert jnp.allclose(out, ref, rtol=2e-2, atol=2e-2), "mismatch vs pure-JAX reference"

    print("KERNEL_OK")
</pallas_src>

<mosaic_0001>
module attributes {stable_mosaic.version = 11 : i64} {
  func.func @_gate_proj_kernel(%arg0: i32, %arg1: memref<64x32xbf16, #tpu.memory_space<vmem>>, %arg2: memref<32x96xbf16, #tpu.memory_space<vmem>>, %arg3: memref<1x96xf32, #tpu.memory_space<vmem>>, %arg4: memref<64x96xbf16, #tpu.memory_space<vmem>>) attributes {dimension_semantics = [#tpu.dimension_semantics<parallel>], iteration_bounds = array<i64: 1>, scalar_prefetch = 0 : i64, scratch_operands = 0 : i64, tpu.core_type = #tpu.core_type<tc>, window_params = [{transform_indices = @transform_0, window_bounds = array<i64: 64, 32>}, {pipeline_mode = #tpu.pipeline_mode<synchronous>, transform_indices = @transform_1, window_bounds = array<i64: 32, 96>}, {pipeline_mode = #tpu.pipeline_mode<synchronous>, transform_indices = @transform_2, window_bounds = array<i64: 1, 96>}, {transform_indices = @transform_3, window_bounds = array<i64: 64, 96>}]} {
    %c0 = arith.constant 0 : index
    %c0_0 = arith.constant 0 : index
    %0 = vector.load %arg1[%c0, %c0_0] : memref<64x32xbf16, #tpu.memory_space<vmem>>, vector<64x32xbf16>
    %c0_1 = arith.constant 0 : index
    %c0_2 = arith.constant 0 : index
    %1 = vector.load %arg2[%c0_1, %c0_2] : memref<32x96xbf16, #tpu.memory_space<vmem>>, vector<32x96xbf16>
    %cst = arith.constant dense<0.000000e+00> : vector<64x96xf32>
    %2 = tpu.matmul %0, %1, %cst {dimension_numbers = #tpu.dot_dimension_numbers<[1], [0], [0], [1], [0, 0, 1, 1], [], []>} : vector<64x32xbf16>, vector<32x96xbf16>, vector<64x96xf32> -> vector<64x96xf32>
    %c0_3 = arith.constant 0 : index
    %c0_4 = arith.constant 0 : index
    %3 = vector.load %arg3[%c0_3, %c0_4] : memref<1x96xf32, #tpu.memory_space<vmem>>, vector<1x96xf32>
    %4 = vector.broadcast %3 : vector<1x96xf32> to vector<64x96xf32>
    %5 = arith.addf %2, %4 : vector<64x96xf32>
    %6 = arith.truncf %5 : vector<64x96xf32> to vector<64x96xbf16>
    %c0_5 = arith.constant 0 : index
    %c0_6 = arith.constant 0 : index
    %7 = vector.load %arg4[%c0_5, %c0_6] : memref<64x96xbf16, #tpu.memory_space<vmem>>, vector<64x96xbf16>
    tpu.vector_store %arg4[%c0_5, %c0_6], %6 {strides = array<i32>} : memref<64x96xbf16, #tpu.memory_space<vmem>>, vector<64x96xbf16>,
    return
  }
  func.func @transform_0(%arg0: i32) -> (i32, i32) {
    %c0_i32 = arith.constant 0 : i32
    %c0_i32_0 = arith.constant 0 : i32
    return %arg0, %c0_i32 : i32, i32
  }
  func.func @transform_1(%arg0: i32) -> (i32, i32) {
    %c0_i32 = arith.constant 0 : i32
    %c0_i32_0 = arith.constant 0 : i32
    %c0_i32_1 = arith.constant 0 : i32
    return %c0_i32, %c0_i32_0 : i32, i32
  }
  func.func @transform_2(%arg0: i32) -> (i32, i32) {
    %c0_i32 = arith.constant 0 : i32
    %c0_i32_0 = arith.constant 0 : i32
    %c0_i32_1 = arith.constant 0 : i32
    return %c0_i32, %c0_i32_0 : i32, i32
  }
  func.func @transform_3(%arg0: i32) -> (i32, i32) {
    %c0_i32 = arith.constant 0 : i32
    %c0_i32_0 = arith.constant 0 : i32
    return %arg0, %c0_i32 : i32, i32
  }
}

module attributes {stable_mosaic.version = 11 : i64} {
  func.func @_gru_chunk_kernel(%arg0: i32, %arg1: i32, %arg2: memref<8x8x96xbf16, #tpu.memory_space<vmem>>, %arg3: memref<8x1xi32, #tpu.memory_space<vmem>>, %arg4: memref<8x32xf32, #tpu.memory_space<vmem>>, %arg5: memref<32x96xbf16, #tpu.memory_space<vmem>>, %arg6: memref<1x96xf32, #tpu.memory_space<vmem>>, %arg7: memref<8x8x32xbf16, #tpu.memory_space<vmem>>, %arg8: memref<8x32xf32, #tpu.memory_space<vmem>>, %arg9: memref<8x32xf32, #tpu.memory_space<vmem>>) attributes {dimension_semantics = [#tpu.dimension_semantics<parallel>, #tpu.dimension_semantics<arbitrary>], iteration_bounds = array<i64: 1, 1>, scalar_prefetch = 0 : i64, scratch_operands = 1 : i64, tpu.core_type = #tpu.core_type<tc>, window_params = [{transform_indices = @transform_0, window_bounds = array<i64: 8, 8, 96>}, {transform_indices = @transform_1, window_bounds = array<i64: 8, 1>}, {transform_indices = @transform_2, window_bounds = array<i64: 8, 32>}, {pipeline_mode = #tpu.pipeline_mode<synchronous>, transform_indices = @transform_3, window_bounds = array<i64: 32, 96>}, {pipeline_mode = #tpu.pipeline_mode<synchronous>, transform_indices = @transform_4, window_bounds = array<i64: 1, 96>}, {transform_indices = @transform_5, window_bounds = array<i64: 8, 8, 32>}, {transform_indices = @transform_6, window_bounds = array<i64: 8, 32>}]} {
    %c0_i32 = arith.constant 0 : i32
    %0 = arith.cmpi eq, %arg1, %c0_i32 : i32
    %1 = arith.extui %0 : i1 to i32
    %c0_i32_0 = arith.constant 0 : i32
    %2 = arith.cmpi ne, %1, %c0_i32_0 : i32
    scf.if %2 {
      %c0_71 = arith.constant 0 : index
      %c0_72 = arith.constant 0 : index
      %358 = vector.load %arg4[%c0_71, %c0_72] : memref<8x32xf32, #tpu.memory_space<vmem>>, vector<8x32xf32>
      %c0_73 = arith.constant 0 : index
      %c0_74 = arith.constant 0 : index
      %359 = vector.load %arg9[%c0_73, %c0_74] : memref<8x32xf32, #tpu.memory_space<vmem>>, vector<8x32xf32>
      tpu.vector_store %arg9[%c0_73, %c0_74], %358 {strides = array<i32>} : memref<8x32xf32, #tpu.memory_space<vmem>>, vector<8x32xf32>,
    } else {
    }
    %c0 = arith.constant 0 : index
    %c0_1 = arith.constant 0 : index
    %3 = vector.load %arg3[%c0, %c0_1] : memref<8x1xi32, #tpu.memory_space<vmem>>, vector<8x1xi32>
    %c0_2 = arith.constant 0 : index
    %c0_3 = arith.constant 0 : index
    %4 = vector.load %arg5[%c0_2, %c0_3] : memref<32x96xbf16, #tpu.memory_space<vmem>>, vector<32x96xbf16>
    %c0_4 = arith.constant 0 : index
    %c0_5 = arith.constant 0 : index
    %5 = vector.load %arg6[%c0_4, %c0_5] : memref<1x96xf32, #tpu.memory_space<vmem>>, vector<1x96xf32>
    %c0_6 = arith.constant 0 : index
    %c0_7 = arith.constant 0 : index
    %6 = vector.load %arg9[%c0_6, %c0_7] : memref<8x32xf32, #tpu.memory_space<vmem>>, vector<8x32xf32>
    %7 = arith.truncf %6 : vector<8x32xf32> to vector<8x32xbf16>
    %cst = arith.constant dense<0.000000e+00> : vector<8x96xf32>
    %8 = tpu.matmul %7, %4, %cst {dimension_numbers = #tpu.dot_dimension_numbers<[1], [0], [0], [1], [0, 0, 1, 1], [], []>} : vector<8x32xbf16>, vector<32x96xbf16>, vector<8x96xf32> -> vector<8x96xf32>
    %9 = vector.broadcast %5 : vector<1x96xf32> to vector<8x96xf32>
    %10 = arith.addf %8, %9 : vector<8x96xf32>
    %c0_8 = arith.constant 0 : index
    %c0_9 = arith.constant 0 : index
    %c0_10 = arith.constant 0 : index
    %11 = vector.load %arg2[%c0_8, %c0_9, %c0_10] : memref<8x8x96xbf16, #tpu.memory_space<vmem>>, vector<1x8x96xbf16>
    %12 = vector.shape_cast %11 : vector<1x8x96xbf16> to vector<8x96xbf16>
    %13 = arith.extf %12 : vector<8x96xbf16> to vector<8x96xf32>
    %14 = vector.extract_strided_slice %13 {offsets = [0, 0], sizes = [8, 32], strides = [1, 1]} : vector<8x96xf32> to vector<8x32xf32>
    %15 = vector.extract_strided_slice %10 {offsets = [0, 0], sizes = [8, 32], strides = [1, 1]} : vector<8x96xf32> to vector<8x32xf32>
    %16 = arith.addf %14, %15 : vector<8x32xf32>
    %17 = arith.negf %16 : vector<8x32xf32>
    %18 = math.exp %17 : vector<8x32xf32>
    %cst_11 = arith.constant 1.000000e+00 : f32
    %19 = vector.broadcast %cst_11 : f32 to vector<8x32xf32>
    %20 = arith.addf %19, %18 : vector<8x32xf32>
    %21 = arith.divf %19, %20 : vector<8x32xf32>
    %22 = vector.extract_strided_slice %13 {offsets = [0, 32], sizes = [8, 32], strides = [1, 1]} : vector<8x96xf32> to vector<8x32xf32>
    %23 = vector.extract_strided_slice %10 {offsets = [0, 32], sizes = [8, 32], strides = [1, 1]} : vector<8x96xf32> to vector<8x32xf32>
    %24 = arith.addf %22, %23 : vector<8x32xf32>
    %25 = arith.negf %24 : vector<8x32xf32>
    %26 = math.exp %25 : vector<8x32xf32>
    %cst_12 = arith.constant 1.000000e+00 : f32
    %27 = vector.broadcast %cst_12 : f32 to vector<8x32xf32>
    %28 = arith.addf %27, %26 : vector<8x32xf32>
    %29 = arith.divf %27, %28 : vector<8x32xf32>
    %30 = vector.extract_strided_slice %13 {offsets = [0, 64], sizes = [8, 32], strides = [1, 1]} : vector<8x96xf32> to vector<8x32xf32>
    %31 = vector.extract_strided_slice %10 {offsets = [0, 64], sizes = [8, 32], strides = [1, 1]} : vector<8x96xf32> to vector<8x32xf32>
    %32 = arith.mulf %21, %31 : vector<8x32xf32>
    %33 = arith.addf %30, %32 : vector<8x32xf32>
    %34 = math.tanh %33 : vector<8x32xf32>
    %35 = arith.subf %6, %34 : vector<8x32xf32>
    %36 = arith.mulf %29, %35 : vector<8x32xf32>
    %37 = arith.addf %34, %36 : vector<8x32xf32>
    %c8_i32 = arith.constant 8 : i32
    %38 = arith.muli %arg1, %c8_i32 : i32
    %c0_i32_13 = arith.constant 0 : i32
    %39 = arith.addi %38, %c0_i32_13 : i32
    %40 = vector.broadcast %39 : i32 to vector<8x1xi32>
    %41 = arith.cmpi slt, %40, %3 : vector<8x1xi32>
    %cst_14 = arith.constant 0.000000e+00 : f32
    %42 = vector.shape_cast %41 : vector<8x1xi1> to vector<8x1xi1>
    %43 = vector.broadcast %42 : vector<8x1xi1> to vector<8x32xi1>
    %44 = vector.broadcast %cst_14 : f32 to vector<8x32xf32>
    %45 = arith.select %43, %37, %44 : vector<8x32xi1>, vector<8x32xf32>
    %46 = vector.shape_cast %41 : vector<8x1xi1> to vector<8x1xi1>
    %47 = vector.broadcast %46 : vector<8x1xi1> to vector<8x32xi1>
    %48 = arith.select %47, %37, %6 : vector<8x32xi1>, vector<8x32xf32>
    %49 = arith.truncf %48 : vector<8x32xf32> to vector<8x32xbf16>
    %cst_15 = arith.constant dense<0.000000e+00> : vector<8x96xf32>
    %50 = tpu.matmul %49, %4, %cst_15 {dimension_numbers = #tpu.dot_dimension_numbers<[1], [0], [0], [1], [0, 0, 1, 1], [], []>} : vector<8x32xbf16>, vector<32x96xbf16>, vector<8x96xf32> -> vector<8x96xf32>
    %51 = vector.broadcast %5 : vector<1x96xf32> to vector<8x96xf32>
    %52 = arith.addf %50, %51 : vector<8x96xf32>
    %c1 = arith.constant 1 : index
    %c0_16 = arith.constant 0 : index
    %c0_17 = arith.constant 0 : index
    %53 = vector.load %arg2[%c1, %c0_16, %c0_17] : memref<8x8x96xbf16, #tpu.memory_space<vmem>>, vector<1x8x96xbf16>
    %54 = vector.shape_cast %53 : vector<1x8x96xbf16> to vector<8x96xbf16>
    %55 = arith.extf %54 : vector<8x96xbf16> to vector<8x96xf32>
    %56 = vector.extract_strided_slice %55 {offsets = [0, 0], sizes = [8, 32], strides = [1, 1]} : vector<8x96xf32> to vector<8x32xf32>
    %57 = vector.extract_strided_slice %52 {offsets = [0, 0], sizes = [8, 32], strides = [1, 1]} : vector<8x96xf32> to vector<8x32xf32>
    %58 = arith.addf %56, %57 : vector<8x32xf32>
    %59 = arith.negf %58 : vector<8x32xf32>
    %60 = math.exp %59 : vector<8x32xf32>
    %cst_18 = arith.constant 1.000000e+00 : f32
    %61 = vector.broadcast %cst_18 : f32 to vector<8x32xf32>
    %62 = arith.addf %61, %60 : vector<8x32xf32>
    %63 = arith.divf %61, %62 : vector<8x32xf32>
    %64 = vector.extract_strided_slice %55 {offsets = [0, 32], sizes = [8, 32], strides = [1, 1]} : vector<8x96xf32> to vector<8x32xf32>
    %65 = vector.extract_strided_slice %52 {offsets = [0, 32], sizes = [8, 32], strides = [1, 1]} : vector<8x96xf32> to vector<8x32xf32>
    %66 = arith.addf %64, %65 : vector<8x32xf32>
    %67 = arith.negf %66 : vector<8x32xf32>
    %68 = math.exp %67 : vector<8x32xf32>
    %cst_19 = arith.constant 1.000000e+00 : f32
    %69 = vector.broadcast %cst_19 : f32 to vector<8x32xf32>
    %70 = arith.addf %69, %68 : vector<8x32xf32>
    %71 = arith.divf %69, %70 : vector<8x32xf32>
    %72 = vector.extract_strided_slice %55 {offsets = [0, 64], sizes = [8, 32], strides = [1, 1]} : vector<8x96xf32> to vector<8x32xf32>
    %73 = vector.extract_strided_slice %52 {offsets = [0, 64], sizes = [8, 32], strides = [1, 1]} : vector<8x96xf32> to vector<8x32xf32>
    %74 = arith.mulf %63, %73 : vector<8x32xf32>
    %75 = arith.addf %72, %74 : vector<8x32xf32>
    %76 = math.tanh %75 : vector<8x32xf32>
    %77 = arith.subf %48, %76 : vector<8x32xf32>
    %78 = arith.mulf %71, %77 : vector<8x32xf32>
    %79 = arith.addf %76, %78 : vector<8x32xf32>
    %c8_i32_20 = arith.constant 8 : i32
    %80 = arith.muli %arg1, %c8_i32_20 : i32
    %c1_i32 = arith.constant 1 : i32
    %81 = arith.addi %80, %c1_i32 : i32
    %82 = vector.broadcast %81 : i32 to vector<8x1xi32>
    %83 = arith.cmpi slt, %82, %3 : vector<8x1xi32>
    %cst_21 = arith.constant 0.000000e+00 : f32
    %84 = vector.shape_cast %83 : vector<8x1xi1> to vector<8x1xi1>
    %85 = vector.broadcast %84 : vector<8x1xi1> to vector<8x32xi1>
    %86 = vector.broadcast %cst_21 : f32 to vector<8x32xf32>
    %87 = arith.select %85, %79, %86 : vector<8x32xi1>, vector<8x32xf32>
    %88 = vector.shape_cast %83 : vector<8x1xi1> to vector<8x1xi1>
    %89 = vector.broadcast %88 : vector<8x1xi1> to vector<8x32xi1>
    %90 = arith.select %89, %79, %48 : vector<8x32xi1>, vector<8x32xf32>
    %91 = arith.truncf %90 : vector<8x32xf32> to vector<8x32xbf16>
    %cst_22 = arith.constant dense<0.000000e+00> : vector<8x96xf32>
    %92 = tpu.matmul %91, %4, %cst_22 {dimension_numbers = #tpu.dot_dimension_numbers<[1], [0], [0], [1], [0, 0, 1, 1], [], []>} : vector<8x32xbf16>, vector<32x96xbf16>, vector<8x96xf32> -> vector<8x96xf32>
    %93 = vector.broadcast %5 : vector<1x96xf32> to vector<8x96xf32>
    %94 = arith.addf %92, %93 : vector<8x96xf32>
    %c2 = arith.constant 2 : index
    %c0_23 = arith.constant 0 : index
    %c0_24 = arith.constant 0 : index
    %95 = vector.load %arg2[%c2, %c0_23, %c0_24] : memref<8x8x96xbf16, #tpu.memory_space<vmem>>, vector<1x8x96xbf16>
    %96 = vector.shape_cast %95 : vector<1x8x96xbf16> to vector<8x96xbf16>
    %97 = arith.extf %96 : vector<8x96xbf16> to vector<8x96xf32>
    %98 = vector.extract_strided_slice %97 {offsets = [0, 0], sizes = [8, 32], strides = [1, 1]} : vector<8x96xf32> to vector<8x32xf32>
    %99 = vector.extract_strided_slice %94 {offsets = [0, 0], sizes = [8, 32], strides = [1, 1]} : vector<8x96xf32> to vector<8x32xf32>
    %100 = arith.addf %98, %99 : vector<8x32xf32>
    %101 = arith.negf %100 : vector<8x32xf32>
    %102 = math.exp %101 : vector<8x32xf32>
    %cst_25 = arith.constant 1.000000e+00 : f32
    %103 = vector.broadcast %cst_25 : f32 to vector<8x32xf32>
    %104 = arith.addf %103, %102 : vector<8x32xf32>
    %105 = arith.divf %103, %104 : vector<8x32xf32>
    %106 = vector.extract_strided_slice %97 {offsets = [0, 32], sizes = [8, 32], strides = [1, 1]} : vector<8x96xf32> to vector<8x32xf32>
    %107 = vector.extract_strided_slice %94 {offsets = [0, 32], sizes = [8, 32], strides = [1, 1]} : vector<8x96xf32> to vector<8x32xf32>
    %108 = arith.addf %106, %107 : vector<8x32xf32>
    %109 = arith.negf %108 : vector<8x32xf32>
    %110 = math.exp %109 : vector<8x32xf32>
    %cst_26 = arith.constant 1.000000e+00 : f32
    %111 = vector.broadcast %cst_26 : f32 to vector<8x32xf32>
    %112 = arith.addf %111, %110 : vector<8x32xf32>
    %113 = arith.divf %111, %112 : vector<8x32xf32>
    %114 = vector.extract_strided_slice %97 {offsets = [0, 64], sizes = [8, 32], strides = [1, 1]} : vector<8x96xf32> to vector<8x32xf32>
    %115 = vector.extract_strided_slice %94 {offsets = [0, 64], sizes = [8, 32], strides = [1, 1]} : vector<8x96xf32> to vector<8x32xf32>
    %116 = arith.mulf %105, %115 : vector<8x32xf32>
    %117 = arith.addf %114, %116 : vector<8x32xf32>
    %118 = math.tanh %117 : vector<8x32xf32>
    %119 = arith.subf %90, %118 : vector<8x32xf32>
    %120 = arith.mulf %113, %119 : vector<8x32xf32>
    %121 = arith.addf %118, %120 : vector<8x32xf32>
    %c8_i32_27 = arith.constant 8 : i32
    %122 = arith.muli %arg1, %c8_i32_27 : i32
    %c2_i32 = arith.constant 2 : i32
    %123 = arith.addi %122, %c2_i32 : i32
    %124 = vector.broadcast %123 : i32 to vector<8x1xi32>
    %125 = arith.cmpi slt, %124, %3 : vector<8x1xi32>
    %cst_28 = arith.constant 0.000000e+00 : f32
    %126 = vector.shape_cast %125 : vector<8x1xi1> to vector<8x1xi1>
    %127 = vector.broadcast %126 : vector<8x1xi1> to vector<8x32xi1>
    %128 = vector.broadcast %cst_28 : f32 to vector<8x32xf32>
    %129 = arith.select %127, %121, %128 : vector<8x32xi1>, vector<8x32xf32>
    %130 = vector.shape_cast %125 : vector<8x1xi1> to vector<8x1xi1>
    %131 = vector.broadcast %130 : vector<8x1xi1> to vector<8x32xi1>
    %132 = arith.select %131, %121, %90 : vector<8x32xi1>, vector<8x32xf32>
    %133 = arith.truncf %132 : vector<8x32xf32> to vector<8x32xbf16>
    %cst_29 = arith.constant dense<0.000000e+00> : vector<8x96xf32>
    %134 = tpu.matmul %133, %4, %cst_29 {dimension_numbers = #tpu.dot_dimension_numbers<[1], [0], [0], [1], [0, 0, 1, 1], [], []>} : vector<8x32xbf16>, vector<32x96xbf16>, vector<8x96xf32> -> vector<8x96xf32>
    %135 = vector.broadcast %5 : vector<1x96xf32> to vector<8x96xf32>
    %136 = arith.addf %134, %135 : vector<8x96xf32>
    %c3 = arith.constant 3 : index
    %c0_30 = arith.constant 0 : index
    %c0_31 = arith.constant 0 : index
    %137 = vector.load %arg2[%c3, %c0_30, %c0_31] : memref<8x8x96xbf16, #tpu.memory_space<vmem>>, vector<1x8x96xbf16>
    %138 = vector.shape_cast %137 : vector<1x8x96xbf16> to vector<8x96xbf16>
    %139 = arith.extf %138 : vector<8x96xbf16> to vector<8x96xf32>
    %140 = vector.extract_strided_slice %139 {offsets = [0, 0], sizes = [8, 32], strides = [1, 1]} : vector<8x96xf32> to vector<8x32xf32>
    %141 = vector.extract_strided_slice %136 {offsets = [0, 0], sizes = [8, 32], strides = [1, 1]} : vector<8x96xf32> to vector<8x32xf32>
    %142 = arith.addf %140, %141 : vector<8x32xf32>
    %143 = arith.negf %142 : vector<8x32xf32>
    %144 = math.exp %143 : vector<8x32xf32>
    %cst_32 = arith.constant 1.000000e+00 : f32
    %145 = vector.broadcast %cst_32 : f32 to vector<8x32xf32>
    %146 = arith.addf %145, %144 : vector<8x32xf32>
    %147 = arith.divf %145, %146 : vector<8x32xf32>
    %148 = vector.extract_strided_slice %139 {offsets = [0, 32], sizes = [8, 32], strides = [1, 1]} : vector<8x96xf32> to vector<8x32xf32>
    %149 = vector.extract_strided_slice %136 {offsets = [0, 32], sizes = [8, 32], strides = [1, 1]} : vector<8x96xf32> to vector<8x32xf32>
    %150 = arith.addf %148, %149 : vector<8x32xf32>
    %151 = arith.negf %150 : vector<8x32xf32>
    %152 = math.exp %151 : vector<8x32xf32>
    %cst_33 = arith.constant 1.000000e+00 : f32
    %153 = vector.broadcast %cst_33 : f32 to vector<8x32xf32>
    %154 = arith.addf %153, %152 : vector<8x32xf32>
    %155 = arith.divf %153, %154 : vector<8x32xf32>
    %156 = vector.extract_strided_slice %139 {offsets = [0, 64], sizes = [8, 32], strides = [1, 1]} : vector<8x96xf32> to vector<8x32xf32>
    %157 = vector.extract_strided_slice %136 {offsets = [0, 64], sizes = [8, 32], strides = [1, 1]} : vector<8x96xf32> to vector<8x32xf32>
    %158 = arith.mulf %147, %157 : vector<8x32xf32>
    %159 = arith.addf %156, %158 : vector<8x32xf32>
    %160 = math.tanh %159 : vector<8x32xf32>
    %161 = arith.subf %132, %160 : vector<8x32xf32>
    %162 = arith.mulf %155, %161 : vector<8x32xf32>
    %163 = arith.addf %160, %162 : vector<8x32xf32>
    %c8_i32_34 = arith.constant 8 : i32
    %164 = arith.muli %arg1, %c8_i32_34 : i32
    %c3_i32 = arith.constant 3 : i32
    %165 = arith.addi %164, %c3_i32 : i32
    %166 = vector.broadcast %165 : i32 to vector<8x1xi32>
    %167 = arith.cmpi slt, %166, %3 : vector<8x1xi32>
    %cst_35 = arith.constant 0.000000e+00 : f32
    %168 = vector.shape_cast %167 : vector<8x1xi1> to vector<8x1xi1>
    %169 = vector.broadcast %168 : vector<8x1xi1> to vector<8x32xi1>
    %170 = vector.broadcast %cst_35 : f32 to vector<8x32xf32>
    %171 = arith.select %169, %163, %170 : vector<8x32xi1>, vector<8x32xf32>
    %172 = vector.shape_cast %167 : vector<8x1xi1> to vector<8x1xi1>
    %173 = vector.broadcast %172 : vector<8x1xi1> to vector<8x32xi1>
    %174 = arith.select %173, %163, %132 : vector<8x32xi1>, vector<8x32xf32>
    %175 = arith.truncf %174 : vector<8x32xf32> to vector<8x32xbf16>
    %cst_36 = arith.constant dense<0.000000e+00> : vector<8x96xf32>
    %176 = tpu.matmul %175, %4, %cst_36 {dimension_numbers = #tpu.dot_dimension_numbers<[1], [0], [0], [1], [0, 0, 1, 1], [], []>} : vector<8x32xbf16>, vector<32x96xbf16>, vector<8x96xf32> -> vector<8x96xf32>
    %177 = vector.broadcast %5 : vector<1x96xf32> to vector<8x96xf32>
    %178 = arith.addf %176, %177 : vector<8x96xf32>
    %c4 = arith.constant 4 : index
    %c0_37 = arith.constant 0 : index
    %c0_38 = arith.constant 0 : index
    %179 = vector.load %arg2[%c4, %c0_37, %c0_38] : memref<8x8x96xbf16, #tpu.memory_space<vmem>>, vector<1x8x96xbf16>
    %180 = vector.shape_cast %179 : vector<1x8x96xbf16> to vector<8x96xbf16>
    %181 = arith.extf %180 : vector<8x96xbf16> to vector<8x96xf32>
    %182 = vector.extract_strided_slice %181 {offsets = [0, 0], sizes = [8, 32], strides = [1, 1]} : vector<8x96xf32> to vector<8x32xf32>
    %183 = vector.extract_strided_slice %178 {offsets = [0, 0], sizes = [8, 32], strides = [1, 1]} : vector<8x96xf32> to vector<8x32xf32>
    %184 = arith.addf %182, %183 : vector<8x32xf32>
    %185 = arith.negf %184 : vector<8x32xf32>
    %186 = math.exp %185 : vector<8x32xf32>
    %cst_39 = arith.constant 1.000000e+00 : f32
    %187 = vector.broadcast %cst_39 : f32 to vector<8x32xf32>
    %188 = arith.addf %187, %186 : vector<8x32xf32>
    %189 = arith.divf %187, %188 : vector<8x32xf32>
    %190 = vector.extract_strided_slice %181 {offsets = [0, 32], sizes = [8, 32], strides = [1, 1]} : vector<8x96xf32> to vector<8x32xf32>
    %191 = vector.extract_strided_slice %178 {offsets = [0, 32], sizes = [8, 32], strides = [1, 1]} : vector<8x96xf32> to vector<8x32xf32>
    %192 = arith.addf %190, %191 : vector<8x32xf32>
    %193 = arith.negf %192 : vector<8x32xf32>
    %194 = math.exp %193 : vector<8x32xf32>
    %cst_40 = arith.constant 1.000000e+00 : f32
    %195 = vector.broadcast %cst_40 : f32 to vector<8x32xf32>
    %196 = arith.addf %195, %194 : vector<8x32xf32>
    %197 = arith.divf %195, %196 : vector<8x32xf32>
    %198 = vector.extract_strided_slice %181 {offsets = [0, 64], sizes = [8, 32], strides = [1, 1]} : vector<8x96xf32> to vector<8x32xf32>
    %199 = vector.extract_strided_slice %178 {offsets = [0, 64], sizes = [8, 32], strides = [1, 1]} : vector<8x96xf32> to vector<8x32xf32>
    %200 = arith.mulf %189, %199 : vector<8x32xf32>
    %201 = arith.addf %198, %200 : vector<8x32xf32>
    %202 = math.tanh %201 : vector<8x32xf32>
    %203 = arith.subf %174, %202 : vector<8x32xf32>
    %204 = arith.mulf %197, %203 : vector<8x32xf32>
    %205 = arith.addf %202, %204 : vector<8x32xf32>
    %c8_i32_41 = arith.constant 8 : i32
    %206 = arith.muli %arg1, %c8_i32_41 : i32
    %c4_i32 = arith.constant 4 : i32
    %207 = arith.addi %206, %c4_i32 : i32
    %208 = vector.broadcast %207 : i32 to vector<8x1xi32>
    %209 = arith.cmpi slt, %208, %3 : vector<8x1xi32>
    %cst_42 = arith.constant 0.000000e+00 : f32
    %210 = vector.shape_cast %209 : vector<8x1xi1> to vector<8x1xi1>
    %211 = vector.broadcast %210 : vector<8x1xi1> to vector<8x32xi1>
    %212 = vector.broadcast %cst_42 : f32 to vector<8x32xf32>
    %213 = arith.select %211, %205, %212 : vector<8x32xi1>, vector<8x32xf32>
    %214 = vector.shape_cast %209 : vector<8x1xi1> to vector<8x1xi1>
    %215 = vector.broadcast %214 : vector<8x1xi1> to vector<8x32xi1>
    %216 = arith.select %215, %205, %174 : vector<8x32xi1>, vector<8x32xf32>
    %217 = arith.truncf %216 : vector<8x32xf32> to vector<8x32xbf16>
    %cst_43 = arith.constant dense<0.000000e+00> : vector<8x96xf32>
    %218 = tpu.matmul %217, %4, %cst_43 {dimension_numbers = #tpu.dot_dimension_numbers<[1], [0], [0], [1], [0, 0, 1, 1], [], []>} : vector<8x32xbf16>, vector<32x96xbf16>, vector<8x96xf32> -> vector<8x96xf32>
    %219 = vector.broadcast %5 : vector<1x96xf32> to vector<8x96xf32>
    %220 = arith.addf %218, %219 : vector<8x96xf32>
    %c5 = arith.constant 5 : index
    %c0_44 = arith.constant 0 : index
    %c0_45 = arith.constant 0 : index
    %221 = vector.load %arg2[%c5, %c0_44, %c0_45] : memref<8x8x96xbf16, #tpu.memory_space<vmem>>, vector<1x8x96xbf16>
    %222 = vector.shape_cast %221 : vector<1x8x96xbf16> to vector<8x96xbf16>
    %223 = arith.extf %222 : vector<8x96xbf16> to vector<8x96xf32>
    %224 = vector.extract_strided_slice %223 {offsets = [0, 0], sizes = [8, 32], strides = [1, 1]} : vector<8x96xf32> to vector<8x32xf32>
    %225 = vector.extract_strided_slice %220 {offsets = [0, 0], sizes = [8, 32], strides = [1, 1]} : vector<8x96xf32> to vector<8x32xf32>
    %226 = arith.addf %224, %225 : vector<8x32xf32>
    %227 = arith.negf %226 : vector<8x32xf32>
    %228 = math.exp %227 : vector<8x32xf32>
    %cst_46 = arith.constant 1.000000e+00 : f32
    %229 = vector.broadcast %cst_46 : f32 to vector<8x32xf32>
    %230 = arith.addf %229, %228 : vector<8x32xf32>
    %231 = arith.divf %229, %230 : vector<8x32xf32>
    %232 = vector.extract_strided_slice %223 {offsets = [0, 32], sizes = [8, 32], strides = [1, 1]} : vector<8x96xf32> to vector<8x32xf32>
    %233 = vector.extract_strided_slice %220 {offsets = [0, 32], sizes = [8, 32], strides = [1, 1]} : vector<8x96xf32> to vector<8x32xf32>
    %234 = arith.addf %232, %233 : vector<8x32xf32>
    %235 = arith.negf %234 : vector<8x32xf32>
    %236 = math.exp %235 : vector<8x32xf32>
    %cst_47 = arith.constant 1.000000e+00 : f32
    %237 = vector.broadcast %cst_47 : f32 to vector<8x32xf32>
    %238 = arith.addf %237, %236 : vector<8x32xf32>
    %239 = arith.divf %237, %238 : vector<8x32xf32>
    %240 = vector.extract_strided_slice %223 {offsets = [0, 64], sizes = [8, 32], strides = [1, 1]} : vector<8x96xf32> to vector<8x32xf32>
    %241 = vector.extract_strided_slice %220 {offsets = [0, 64], sizes = [8, 32], strides = [1, 1]} : vector<8x96xf32> to vector<8x32xf32>
    %242 = arith.mulf %231, %241 : vector<8x32xf32>
    %243 = arith.addf %240, %242 : vector<8x32xf32>
    %244 = math.tanh %243 : vector<8x32xf32>
    %245 = arith.subf %216, %244 : vector<8x32xf32>
    %246 = arith.mulf %239, %245 : vector<8x32xf32>
    %247 = arith.addf %244, %246 : vector<8x32xf32>
    %c8_i32_48 = arith.constant 8 : i32
    %248 = arith.muli %arg1, %c8_i32_48 : i32
    %c5_i32 = arith.constant 5 : i32
    %249 = arith.addi %248, %c5_i32 : i32
    %250 = vector.broadcast %249 : i32 to vector<8x1xi32>
    %251 = arith.cmpi slt, %250, %3 : vector<8x1xi32>
    %cst_49 = arith.constant 0.000000e+00 : f32
    %252 = vector.shape_cast %251 : vector<8x1xi1> to vector<8x1xi1>
    %253 = vector.broadcast %252 : vector<8x1xi1> to vector<8x32xi1>
    %254 = vector.broadcast %cst_49 : f32 to vector<8x32xf32>
    %255 = arith.select %253, %247, %254 : vector<8x32xi1>, vector<8x32xf32>
    %256 = vector.shape_cast %251 : vector<8x1xi1> to vector<8x1xi1>
    %257 = vector.broadcast %256 : vector<8x1xi1> to vector<8x32xi1>
    %258 = arith.select %257, %247, %216 : vector<8x32xi1>, vector<8x32xf32>
    %259 = arith.truncf %258 : vector<8x32xf32> to vector<8x32xbf16>
    %cst_50 = arith.constant dense<0.000000e+00> : vector<8x96xf32>
    %260 = tpu.matmul %259, %4, %cst_50 {dimension_numbers = #tpu.dot_dimension_numbers<[1], [0], [0], [1], [0, 0, 1, 1], [], []>} : vector<8x32xbf16>, vector<32x96xbf16>, vector<8x96xf32> -> vector<8x96xf32>
    %261 = vector.broadcast %5 : vector<1x96xf32> to vector<8x96xf32>
    %262 = arith.addf %260, %261 : vector<8x96xf32>
    %c6 = arith.constant 6 : index
    %c0_51 = arith.constant 0 : index
    %c0_52 = arith.constant 0 : index
    %263 = vector.load %arg2[%c6, %c0_51, %c0_52] : memref<8x8x96xbf16, #tpu.memory_space<vmem>>, vector<1x8x96xbf16>
    %264 = vector.shape_cast %263 : vector<1x8x96xbf16> to vector<8x96xbf16>
    %265 = arith.extf %264 : vector<8x96xbf16> to vector<8x96xf32>
    %266 = vector.extract_strided_slice %265 {offsets = [0, 0], sizes = [8, 32], strides = [1, 1]} : vector<8x96xf32> to vector<8x32xf32>
    %267 = vector.extract_strided_slice %262 {offsets = [0, 0], sizes = [8, 32], strides = [1, 1]} : vector<8x96xf32> to vector<8x32xf32>
    %268 = arith.addf %266, %267 : vector<8x32xf32>
    %269 = arith.negf %268 : vector<8x32xf32>
    %270 = math.exp %269 : vector<8x32xf32>
    %cst_53 = arith.constant 1.000000e+00 : f32
    %271 = vector.broadcast %cst_53 : f32 to vector<8x32xf32>
    %272 = arith.addf %271, %270 : vector<8x32xf32>
    %273 = arith.divf %271, %272 : vector<8x32xf32>
    %274 = vector.extract_strided_slice %265 {offsets = [0, 32], sizes = [8, 32], strides = [1, 1]} : vector<8x96xf32> to vector<8x32xf32>
    %275 = vector.extract_strided_slice %262 {offsets = [0, 32], sizes = [8, 32], strides = [1, 1]} : vector<8x96xf32> to vector<8x32xf32>
    %276 = arith.addf %274, %275 : vector<8x32xf32>
    %277 = arith.negf %276 : vector<8x32xf32>
    %278 = math.exp %277 : vector<8x32xf32>
    %cst_54 = arith.constant 1.000000e+00 : f32
    %279 = vector.broadcast %cst_54 : f32 to vector<8x32xf32>
    %280 = arith.addf %279, %278 : vector<8x32xf32>
    %281 = arith.divf %279, %280 : vector<8x32xf32>
    %282 = vector.extract_strided_slice %265 {offsets = [0, 64], sizes = [8, 32], strides = [1, 1]} : vector<8x96xf32> to vector<8x32xf32>
    %283 = vector.extract_strided_slice %262 {offsets = [0, 64], sizes = [8, 32], strides = [1, 1]} : vector<8x96xf32> to vector<8x32xf32>
    %284 = arith.mulf %273, %283 : vector<8x32xf32>
    %285 = arith.addf %282, %284 : vector<8x32xf32>
    %286 = math.tanh %285 : vector<8x32xf32>
    %287 = arith.subf %258, %286 : vector<8x32xf32>
    %288 = arith.mulf %281, %287 : vector<8x32xf32>
    %289 = arith.addf %286, %288 : vector<8x32xf32>
    %c8_i32_55 = arith.constant 8 : i32
    %290 = arith.muli %arg1, %c8_i32_55 : i32
    %c6_i32 = arith.constant 6 : i32
    %291 = arith.addi %290, %c6_i32 : i32
    %292 = vector.broadcast %291 : i32 to vector<8x1xi32>
    %293 = arith.cmpi slt, %292, %3 : vector<8x1xi32>
    %cst_56 = arith.constant 0.000000e+00 : f32
    %294 = vector.shape_cast %293 : vector<8x1xi1> to vector<8x1xi1>
    %295 = vector.broadcast %294 : vector<8x1xi1> to vector<8x32xi1>
    %296 = vector.broadcast %cst_56 : f32 to vector<8x32xf32>
    %297 = arith.select %295, %289, %296 : vector<8x32xi1>, vector<8x32xf32>
    %298 = vector.shape_cast %293 : vector<8x1xi1> to vector<8x1xi1>
    %299 = vector.broadcast %298 : vector<8x1xi1> to vector<8x32xi1>
    %300 = arith.select %299, %289, %258 : vector<8x32xi1>, vector<8x32xf32>
    %301 = arith.truncf %300 : vector<8x32xf32> to vector<8x32xbf16>
    %cst_57 = arith.constant dense<0.000000e+00> : vector<8x96xf32>
    %302 = tpu.matmul %301, %4, %cst_57 {dimension_numbers = #tpu.dot_dimension_numbers<[1], [0], [0], [1], [0, 0, 1, 1], [], []>} : vector<8x32xbf16>, vector<32x96xbf16>, vector<8x96xf32> -> vector<8x96xf32>
    %303 = vector.broadcast %5 : vector<1x96xf32> to vector<8x96xf32>
    %304 = arith.addf %302, %303 : vector<8x96xf32>
    %c7 = arith.constant 7 : index
    %c0_58 = arith.constant 0 : index
    %c0_59 = arith.constant 0 : index
    %305 = vector.load %arg2[%c7, %c0_58, %c0_59] : memref<8x8x96xbf16, #tpu.memory_space<vmem>>, vector<1x8x96xbf16>
    %306 = vector.shape_cast %305 : vector<1x8x96xbf16> to vector<8x96xbf16>
    %307 = arith.extf %306 : vector<8x96xbf16> to vector<8x96xf32>
    %308 = vector.extract_strided_slice %307 {offsets = [0, 0], sizes = [8, 32], strides = [1, 1]} : vector<8x96xf32> to vector<8x32xf32>
    %309 = vector.extract_strided_slice %304 {offsets = [0, 0], sizes = [8, 32], strides = [1, 1]} : vector<8x96xf32> to vector<8x32xf32>
    %310 = arith.addf %308, %309 : vector<8x32xf32>
    %311 = arith.negf %310 : vector<8x32xf32>
    %312 = math.exp %311 : vector<8x32xf32>
    %cst_60 = arith.constant 1.000000e+00 : f32
    %313 = vector.broadcast %cst_60 : f32 to vector<8x32xf32>
    %314 = arith.addf %313, %312 : vector<8x32xf32>
    %315 = arith.divf %313, %314 : vector<8x32xf32>
    %316 = vector.extract_strided_slice %307 {offsets = [0, 32], sizes = [8, 32], strides = [1, 1]} : vector<8x96xf32> to vector<8x32xf32>
    %317 = vector.extract_strided_slice %304 {offsets = [0, 32], sizes = [8, 32], strides = [1, 1]} : vector<8x96xf32> to vector<8x32xf32>
    %318 = arith.addf %316, %317 : vector<8x32xf32>
    %319 = arith.negf %318 : vector<8x32xf32>
    %320 = math.exp %319 : vector<8x32xf32>
    %cst_61 = arith.constant 1.000000e+00 : f32
    %321 = vector.broadcast %cst_61 : f32 to vector<8x32xf32>
    %322 = arith.addf %321, %320 : vector<8x32xf32>
    %323 = arith.divf %321, %322 : vector<8x32xf32>
    %324 = vector.extract_strided_slice %307 {offsets = [0, 64], sizes = [8, 32], strides = [1, 1]} : vector<8x96xf32> to vector<8x32xf32>
    %325 = vector.extract_strided_slice %304 {offsets = [0, 64], sizes = [8, 32], strides = [1, 1]} : vector<8x96xf32> to vector<8x32xf32>
    %326 = arith.mulf %315, %325 : vector<8x32xf32>
    %327 = arith.addf %324, %326 : vector<8x32xf32>
    %328 = math.tanh %327 : vector<8x32xf32>
    %329 = arith.subf %300, %328 : vector<8x32xf32>
    %330 = arith.mulf %323, %329 : vector<8x32xf32>
    %331 = arith.addf %328, %330 : vector<8x32xf32>
    %c8_i32_62 = arith.constant 8 : i32
    %332 = arith.muli %arg1, %c8_i32_62 : i32
    %c7_i32 = arith.constant 7 : i32
    %333 = arith.addi %332, %c7_i32 : i32
    %334 = vector.broadcast %333 : i32 to vector<8x1xi32>
    %335 = arith.cmpi slt, %334, %3 : vector<8x1xi32>
    %cst_63 = arith.constant 0.000000e+00 : f32
    %336 = vector.shape_cast %335 : vector<8x1xi1> to vector<8x1xi1>
    %337 = vector.broadcast %336 : vector<8x1xi1> to vector<8x32xi1>
    %338 = vector.broadcast %cst_63 : f32 to vector<8x32xf32>
    %339 = arith.select %337, %331, %338 : vector<8x32xi1>, vector<8x32xf32>
    %340 = vector.shape_cast %335 : vector<8x1xi1> to vector<8x1xi1>
    %341 = vector.broadcast %340 : vector<8x1xi1> to vector<8x32xi1>
    %342 = arith.select %341, %331, %300 : vector<8x32xi1>, vector<8x32xf32>
    %c0_64 = arith.constant 0 : index
    %c0_65 = arith.constant 0 : index
    %343 = vector.load %arg9[%c0_64, %c0_65] : memref<8x32xf32, #tpu.memory_space<vmem>>, vector<8x32xf32>
    tpu.vector_store %arg9[%c0_64, %c0_65], %342 {strides = array<i32>} : memref<8x32xf32, #tpu.memory_space<vmem>>, vector<8x32xf32>,
    %344 = vector.shape_cast %45 : vector<8x32xf32> to vector<8x1x32xf32>
    %345 = vector.shape_cast %87 : vector<8x32xf32> to vector<8x1x32xf32>
    %346 = vector.shape_cast %129 : vector<8x32xf32> to vector<8x1x32xf32>
    %347 = vector.shape_cast %171 : vector<8x32xf32> to vector<8x1x32xf32>
    %348 = vector.shape_cast %213 : vector<8x32xf32> to vector<8x1x32xf32>
    %349 = vector.shape_cast %255 : vector<8x32xf32> to vector<8x1x32xf32>
    %350 = vector.shape_cast %297 : vector<8x32xf32> to vector<8x1x32xf32>
    %351 = vector.shape_cast %339 : vector<8x32xf32> to vector<8x1x32xf32>
    %352 = tpu.concatenate %344, %345, %346, %347, %348, %349, %350, %351 in 1 : vector<8x1x32xf32>, vector<8x1x32xf32>, vector<8x1x32xf32>, vector<8x1x32xf32>, vector<8x1x32xf32>, vector<8x1x32xf32>, vector<8x1x32xf32>, vector<8x1x32xf32> -> vector<8x8x32xf32>
    %353 = arith.truncf %352 : vector<8x8x32xf32> to vector<8x8x32xbf16>
    %c0_66 = arith.constant 0 : index
    %c0_67 = arith.constant 0 : index
    %c0_68 = arith.constant 0 : index
    %354 = vector.load %arg7[%c0_66, %c0_67, %c0_68] : memref<8x8x32xbf16, #tpu.memory_space<vmem>>, vector<8x8x32xbf16>
    tpu.vector_store %arg7[%c0_66, %c0_67, %c0_68], %353 {strides = array<i32>} : memref<8x8x32xbf16, #tpu.memory_space<vmem>>, vector<8x8x32xbf16>,
    %c0_i32_69 = arith.constant 0 : i32
    %355 = arith.cmpi eq, %arg1, %c0_i32_69 : i32
    %356 = arith.extui %355 : i1 to i32
    %c0_i32_70 = arith.constant 0 : i32
    %357 = arith.cmpi ne, %356, %c0_i32_70 : i32
    scf.if %357 {
      %c0_71 = arith.constant 0 : index
      %c0_72 = arith.constant 0 : index
      %358 = vector.load %arg9[%c0_71, %c0_72] : memref<8x32xf32, #tpu.memory_space<vmem>>, vector<8x32xf32>
      %c0_73 = arith.constant 0 : index
      %c0_74 = arith.constant 0 : index
      %359 = vector.load %arg8[%c0_73, %c0_74] : memref<8x32xf32, #tpu.memory_space<vmem>>, vector<8x32xf32>
      tpu.vector_store %arg8[%c0_73, %c0_74], %358 {strides = array<i32>} : memref<8x32xf32, #tpu.memory_space<vmem>>, vector<8x32xf32>,
    } else {
    }
    return
  }
  func.func @transform_0(%arg0: i32, %arg1: i32) -> (i32, i32, i32) {
    %c0_i32 = arith.constant 0 : i32
    %c0_i32_0 = arith.constant 0 : i32
    return %arg1, %arg0, %c0_i32 : i32, i32, i32
  }
  func.func @transform_1(%arg0: i32, %arg1: i32) -> (i32, i32) {
    %c0_i32 = arith.constant 0 : i32
    %c0_i32_0 = arith.constant 0 : i32
    return %arg0, %c0_i32 : i32, i32
  }
  func.func @transform_2(%arg0: i32, %arg1: i32) -> (i32, i32) {
    %c0_i32 = arith.constant 0 : i32
    %c0_i32_0 = arith.constant 0 : i32
    return %arg0, %c0_i32 : i32, i32
  }
  func.func @transform_3(%arg0: i32, %arg1: i32) -> (i32, i32) {
    %c0_i32 = arith.constant 0 : i32
    %c0_i32_0 = arith.constant 0 : i32
    %c0_i32_1 = arith.constant 0 : i32
    return %c0_i32, %c0_i32_0 : i32, i32
  }
  func.func @transform_4(%arg0: i32, %arg1: i32) -> (i32, i32) {
    %c0_i32 = arith.constant 0 : i32
    %c0_i32_0 = arith.constant 0 : i32
    %c0_i32_1 = arith.constant 0 : i32
    return %c0_i32, %c0_i32_0 : i32, i32
  }
  func.func @transform_5(%arg0: i32, %arg1: i32) -> (i32, i32, i32) {
    %c0_i32 = arith.constant 0 : i32
    %c0_i32_0 = arith.constant 0 : i32
    return %arg0, %arg1, %c0_i32 : i32, i32, i32
  }
  func.func @transform_6(%arg0: i32, %arg1: i32) -> (i32, i32) {
    %c0_i32 = arith.constant 0 : i32
    %c0_i32_0 = arith.constant 0 : i32
    return %arg0, %c0_i32 : i32, i32
  }
}

module attributes {stable_mosaic.version = 11 : i64} {
  func.func @_gru_chunk_kernel(%arg0: i32, %arg1: i32, %arg2: memref<8x8x96xbf16, #tpu.memory_space<vmem>>, %arg3: memref<8x1xi32, #tpu.memory_space<vmem>>, %arg4: memref<8x32xf32, #tpu.memory_space<vmem>>, %arg5: memref<32x96xbf16, #tpu.memory_space<vmem>>, %arg6: memref<1x96xf32, #tpu.memory_space<vmem>>, %arg7: memref<8x8x32xbf16, #tpu.memory_space<vmem>>, %arg8: memref<8x32xf32, #tpu.memory_space<vmem>>, %arg9: memref<8x32xf32, #tpu.memory_space<vmem>>) attributes {dimension_semantics = [#tpu.dimension_semantics<parallel>, #tpu.dimension_semantics<arbitrary>], iteration_bounds = array<i64: 1, 1>, scalar_prefetch = 0 : i64, scratch_operands = 1 : i64, tpu.core_type = #tpu.core_type<tc>, window_params = [{transform_indices = @transform_0, window_bounds = array<i64: 8, 8, 96>}, {transform_indices = @transform_1, window_bounds = array<i64: 8, 1>}, {transform_indices = @transform_2, window_bounds = array<i64: 8, 32>}, {pipeline_mode = #tpu.pipeline_mode<synchronous>, transform_indices = @transform_3, window_bounds = array<i64: 32, 96>}, {pipeline_mode = #tpu.pipeline_mode<synchronous>, transform_indices = @transform_4, window_bounds = array<i64: 1, 96>}, {transform_indices = @transform_5, window_bounds = array<i64: 8, 8, 32>}, {transform_indices = @transform_6, window_bounds = array<i64: 8, 32>}]} {
    %c0_i32 = arith.constant 0 : i32
    %0 = arith.cmpi eq, %arg1, %c0_i32 : i32
    %1 = arith.extui %0 : i1 to i32
    %c0_i32_0 = arith.constant 0 : i32
    %2 = arith.cmpi ne, %1, %c0_i32_0 : i32
    scf.if %2 {
      %c0_71 = arith.constant 0 : index
      %c0_72 = arith.constant 0 : index
      %358 = vector.load %arg4[%c0_71, %c0_72] : memref<8x32xf32, #tpu.memory_space<vmem>>, vector<8x32xf32>
      %c0_73 = arith.constant 0 : index
      %c0_74 = arith.constant 0 : index
      %359 = vector.load %arg9[%c0_73, %c0_74] : memref<8x32xf32, #tpu.memory_space<vmem>>, vector<8x32xf32>
      tpu.vector_store %arg9[%c0_73, %c0_74], %358 {strides = array<i32>} : memref<8x32xf32, #tpu.memory_space<vmem>>, vector<8x32xf32>,
    } else {
    }
    %c0 = arith.constant 0 : index
    %c0_1 = arith.constant 0 : index
    %3 = vector.load %arg3[%c0, %c0_1] : memref<8x1xi32, #tpu.memory_space<vmem>>, vector<8x1xi32>
    %c0_2 = arith.constant 0 : index
    %c0_3 = arith.constant 0 : index
    %4 = vector.load %arg5[%c0_2, %c0_3] : memref<32x96xbf16, #tpu.memory_space<vmem>>, vector<32x96xbf16>
    %c0_4 = arith.constant 0 : index
    %c0_5 = arith.constant 0 : index
    %5 = vector.load %arg6[%c0_4, %c0_5] : memref<1x96xf32, #tpu.memory_space<vmem>>, vector<1x96xf32>
    %c0_6 = arith.constant 0 : index
    %c0_7 = arith.constant 0 : index
    %6 = vector.load %arg9[%c0_6, %c0_7] : memref<8x32xf32, #tpu.memory_space<vmem>>, vector<8x32xf32>
    %7 = arith.truncf %6 : vector<8x32xf32> to vector<8x32xbf16>
    %cst = arith.constant dense<0.000000e+00> : vector<8x96xf32>
    %8 = tpu.matmul %7, %4, %cst {dimension_numbers = #tpu.dot_dimension_numbers<[1], [0], [0], [1], [0, 0, 1, 1], [], []>} : vector<8x32xbf16>, vector<32x96xbf16>, vector<8x96xf32> -> vector<8x96xf32>
    %9 = vector.broadcast %5 : vector<1x96xf32> to vector<8x96xf32>
    %10 = arith.addf %8, %9 : vector<8x96xf32>
    %c0_8 = arith.constant 0 : index
    %c0_9 = arith.constant 0 : index
    %c0_10 = arith.constant 0 : index
    %11 = vector.load %arg2[%c0_8, %c0_9, %c0_10] : memref<8x8x96xbf16, #tpu.memory_space<vmem>>, vector<1x8x96xbf16>
    %12 = vector.shape_cast %11 : vector<1x8x96xbf16> to vector<8x96xbf16>
    %13 = arith.extf %12 : vector<8x96xbf16> to vector<8x96xf32>
    %14 = vector.extract_strided_slice %13 {offsets = [0, 0], sizes = [8, 32], strides = [1, 1]} : vector<8x96xf32> to vector<8x32xf32>
    %15 = vector.extract_strided_slice %10 {offsets = [0, 0], sizes = [8, 32], strides = [1, 1]} : vector<8x96xf32> to vector<8x32xf32>
    %16 = arith.addf %14, %15 : vector<8x32xf32>
    %17 = arith.negf %16 : vector<8x32xf32>
    %18 = math.exp %17 : vector<8x32xf32>
    %cst_11 = arith.constant 1.000000e+00 : f32
    %19 = vector.broadcast %cst_11 : f32 to vector<8x32xf32>
    %20 = arith.addf %19, %18 : vector<8x32xf32>
    %21 = arith.divf %19, %20 : vector<8x32xf32>
    %22 = vector.extract_strided_slice %13 {offsets = [0, 32], sizes = [8, 32], strides = [1, 1]} : vector<8x96xf32> to vector<8x32xf32>
    %23 = vector.extract_strided_slice %10 {offsets = [0, 32], sizes = [8, 32], strides = [1, 1]} : vector<8x96xf32> to vector<8x32xf32>
    %24 = arith.addf %22, %23 : vector<8x32xf32>
    %25 = arith.negf %24 : vector<8x32xf32>
    %26 = math.exp %25 : vector<8x32xf32>
    %cst_12 = arith.constant 1.000000e+00 : f32
    %27 = vector.broadcast %cst_12 : f32 to vector<8x32xf32>
    %28 = arith.addf %27, %26 : vector<8x32xf32>
    %29 = arith.divf %27, %28 : vector<8x32xf32>
    %30 = vector.extract_strided_slice %13 {offsets = [0, 64], sizes = [8, 32], strides = [1, 1]} : vector<8x96xf32> to vector<8x32xf32>
    %31 = vector.extract_strided_slice %10 {offsets = [0, 64], sizes = [8, 32], strides = [1, 1]} : vector<8x96xf32> to vector<8x32xf32>
    %32 = arith.mulf %21, %31 : vector<8x32xf32>
    %33 = arith.addf %30, %32 : vector<8x32xf32>
    %34 = math.tanh %33 : vector<8x32xf32>
    %35 = arith.subf %6, %34 : vector<8x32xf32>
    %36 = arith.mulf %29, %35 : vector<8x32xf32>
    %37 = arith.addf %34, %36 : vector<8x32xf32>
    %c8_i32 = arith.constant 8 : i32
    %38 = arith.muli %arg1, %c8_i32 : i32
    %c0_i32_13 = arith.constant 0 : i32
    %39 = arith.addi %38, %c0_i32_13 : i32
    %40 = vector.broadcast %39 : i32 to vector<8x1xi32>
    %41 = arith.cmpi slt, %40, %3 : vector<8x1xi32>
    %cst_14 = arith.constant 0.000000e+00 : f32
    %42 = vector.shape_cast %41 : vector<8x1xi1> to vector<8x1xi1>
    %43 = vector.broadcast %42 : vector<8x1xi1> to vector<8x32xi1>
    %44 = vector.broadcast %cst_14 : f32 to vector<8x32xf32>
    %45 = arith.select %43, %37, %44 : vector<8x32xi1>, vector<8x32xf32>
    %46 = vector.shape_cast %41 : vector<8x1xi1> to vector<8x1xi1>
    %47 = vector.broadcast %46 : vector<8x1xi1> to vector<8x32xi1>
    %48 = arith.select %47, %37, %6 : vector<8x32xi1>, vector<8x32xf32>
    %49 = arith.truncf %48 : vector<8x32xf32> to vector<8x32xbf16>
    %cst_15 = arith.constant dense<0.000000e+00> : vector<8x96xf32>
    %50 = tpu.matmul %49, %4, %cst_15 {dimension_numbers = #tpu.dot_dimension_numbers<[1], [0], [0], [1], [0, 0, 1, 1], [], []>} : vector<8x32xbf16>, vector<32x96xbf16>, vector<8x96xf32> -> vector<8x96xf32>
    %51 = vector.broadcast %5 : vector<1x96xf32> to vector<8x96xf32>
    %52 = arith.addf %50, %51 : vector<8x96xf32>
    %c1 = arith.constant 1 : index
    %c0_16 = arith.constant 0 : index
    %c0_17 = arith.constant 0 : index
    %53 = vector.load %arg2[%c1, %c0_16, %c0_17] : memref<8x8x96xbf16, #tpu.memory_space<vmem>>, vector<1x8x96xbf16>
    %54 = vector.shape_cast %53 : vector<1x8x96xbf16> to vector<8x96xbf16>
    %55 = arith.extf %54 : vector<8x96xbf16> to vector<8x96xf32>
    %56 = vector.extract_strided_slice %55 {offsets = [0, 0], sizes = [8, 32], strides = [1, 1]} : vector<8x96xf32> to vector<8x32xf32>
    %57 = vector.extract_strided_slice %52 {offsets = [0, 0], sizes = [8, 32], strides = [1, 1]} : vector<8x96xf32> to vector<8x32xf32>
    %58 = arith.addf %56, %57 : vector<8x32xf32>
    %59 = arith.negf %58 : vector<8x32xf32>
    %60 = math.exp %59 : vector<8x32xf32>
    %cst_18 = arith.constant 1.000000e+00 : f32
    %61 = vector.broadcast %cst_18 : f32 to vector<8x32xf32>
    %62 = arith.addf %61, %60 : vector<8x32xf32>
    %63 = arith.divf %61, %62 : vector<8x32xf32>
    %64 = vector.extract_strided_slice %55 {offsets = [0, 32], sizes = [8, 32], strides = [1, 1]} : vector<8x96xf32> to vector<8x32xf32>
    %65 = vector.extract_strided_slice %52 {offsets = [0, 32], sizes = [8, 32], strides = [1, 1]} : vector<8x96xf32> to vector<8x32xf32>
    %66 = arith.addf %64, %65 : vector<8x32xf32>
    %67 = arith.negf %66 : vector<8x32xf32>
    %68 = math.exp %67 : vector<8x32xf32>
    %cst_19 = arith.constant 1.000000e+00 : f32
    %69 = vector.broadcast %cst_19 : f32 to vector<8x32xf32>
    %70 = arith.addf %69, %68 : vector<8x32xf32>
    %71 = arith.divf %69, %70 : vector<8x32xf32>
    %72 = vector.extract_strided_slice %55 {offsets = [0, 64], sizes = [8, 32], strides = [1, 1]} : vector<8x96xf32> to vector<8x32xf32>
    %73 = vector.extract_strided_slice %52 {offsets = [0, 64], sizes = [8, 32], strides = [1, 1]} : vector<8x96xf32> to vector<8x32xf32>
    %74 = arith.mulf %63, %73 : vector<8x32xf32>
    %75 = arith.addf %72, %74 : vector<8x32xf32>
    %76 = math.tanh %75 : vector<8x32xf32>
    %77 = arith.subf %48, %76 : vector<8x32xf32>
    %78 = arith.mulf %71, %77 : vector<8x32xf32>
    %79 = arith.addf %76, %78 : vector<8x32xf32>
    %c8_i32_20 = arith.constant 8 : i32
    %80 = arith.muli %arg1, %c8_i32_20 : i32
    %c1_i32 = arith.constant 1 : i32
    %81 = arith.addi %80, %c1_i32 : i32
    %82 = vector.broadcast %81 : i32 to vector<8x1xi32>
    %83 = arith.cmpi slt, %82, %3 : vector<8x1xi32>
    %cst_21 = arith.constant 0.000000e+00 : f32
    %84 = vector.shape_cast %83 : vector<8x1xi1> to vector<8x1xi1>
    %85 = vector.broadcast %84 : vector<8x1xi1> to vector<8x32xi1>
    %86 = vector.broadcast %cst_21 : f32 to vector<8x32xf32>
    %87 = arith.select %85, %79, %86 : vector<8x32xi1>, vector<8x32xf32>
    %88 = vector.shape_cast %83 : vector<8x1xi1> to vector<8x1xi1>
    %89 = vector.broadcast %88 : vector<8x1xi1> to vector<8x32xi1>
    %90 = arith.select %89, %79, %48 : vector<8x32xi1>, vector<8x32xf32>
    %91 = arith.truncf %90 : vector<8x32xf32> to vector<8x32xbf16>
    %cst_22 = arith.constant dense<0.000000e+00> : vector<8x96xf32>
    %92 = tpu.matmul %91, %4, %cst_22 {dimension_numbers = #tpu.dot_dimension_numbers<[1], [0], [0], [1], [0, 0, 1, 1], [], []>} : vector<8x32xbf16>, vector<32x96xbf16>, vector<8x96xf32> -> vector<8x96xf32>
    %93 = vector.broadcast %5 : vector<1x96xf32> to vector<8x96xf32>
    %94 = arith.addf %92, %93 : vector<8x96xf32>
    %c2 = arith.constant 2 : index
    %c0_23 = arith.constant 0 : index
    %c0_24 = arith.constant 0 : index
    %95 = vector.load %arg2[%c2, %c0_23, %c0_24] : memref<8x8x96xbf16, #tpu.memory_space<vmem>>, vector<1x8x96xbf16>
    %96 = vector.shape_cast %95 : vector<1x8x96xbf16> to vector<8x96xbf16>
    %97 = arith.extf %96 : vector<8x96xbf16> to vector<8x96xf32>
    %98 = vector.extract_strided_slice %97 {offsets = [0, 0], sizes = [8, 32], strides = [1, 1]} : vector<8x96xf32> to vector<8x32xf32>
    %99 = vector.extract_strided_slice %94 {offsets = [0, 0], sizes = [8, 32], strides = [1, 1]} : vector<8x96xf32> to vector<8x32xf32>
    %100 = arith.addf %98, %99 : vector<8x32xf32>
    %101 = arith.negf %100 : vector<8x32xf32>
    %102 = math.exp %101 : vector<8x32xf32>
    %cst_25 = arith.constant 1.000000e+00 : f32
    %103 = vector.broadcast %cst_25 : f32 to vector<8x32xf32>
    %104 = arith.addf %103, %102 : vector<8x32xf32>
    %105 = arith.divf %103, %104 : vector<8x32xf32>
    %106 = vector.extract_strided_slice %97 {offsets = [0, 32], sizes = [8, 32], strides = [1, 1]} : vector<8x96xf32> to vector<8x32xf32>
    %107 = vector.extract_strided_slice %94 {offsets = [0, 32], sizes = [8, 32], strides = [1, 1]} : vector<8x96xf32> to vector<8x32xf32>
    %108 = arith.addf %106, %107 : vector<8x32xf32>
    %109 = arith.negf %108 : vector<8x32xf32>
    %110 = math.exp %109 : vector<8x32xf32>
    %cst_26 = arith.constant 1.000000e+00 : f32
    %111 = vector.broadcast %cst_26 : f32 to vector<8x32xf32>
    %112 = arith.addf %111, %110 : vector<8x32xf32>
    %113 = arith.divf %111, %112 : vector<8x32xf32>
    %114 = vector.extract_strided_slice %97 {offsets = [0, 64], sizes = [8, 32], strides = [1, 1]} : vector<8x96xf32> to vector<8x32xf32>
    %115 = vector.extract_strided_slice %94 {offsets = [0, 64], sizes = [8, 32], strides = [1, 1]} : vector<8x96xf32> to vector<8x32xf32>
    %116 = arith.mulf %105, %115 : vector<8x32xf32>
    %117 = arith.addf %114, %116 : vector<8x32xf32>
    %118 = math.tanh %117 : vector<8x32xf32>
    %119 = arith.subf %90, %118 : vector<8x32xf32>
    %120 = arith.mulf %113, %119 : vector<8x32xf32>
    %121 = arith.addf %118, %120 : vector<8x32xf32>
    %c8_i32_27 = arith.constant 8 : i32
    %122 = arith.muli %arg1, %c8_i32_27 : i32
    %c2_i32 = arith.constant 2 : i32
    %123 = arith.addi %122, %c2_i32 : i32
    %124 = vector.broadcast %123 : i32 to vector<8x1xi32>
    %125 = arith.cmpi slt, %124, %3 : vector<8x1xi32>
    %cst_28 = arith.constant 0.000000e+00 : f32
    %126 = vector.shape_cast %125 : vector<8x1xi1> to vector<8x1xi1>
    %127 = vector.broadcast %126 : vector<8x1xi1> to vector<8x32xi1>
    %128 = vector.broadcast %cst_28 : f32 to vector<8x32xf32>
    %129 = arith.select %127, %121, %128 : vector<8x32xi1>, vector<8x32xf32>
    %130 = vector.shape_cast %125 : vector<8x1xi1> to vector<8x1xi1>
    %131 = vector.broadcast %130 : vector<8x1xi1> to vector<8x32xi1>
    %132 = arith.select %131, %121, %90 : vector<8x32xi1>, vector<8x32xf32>
    %133 = arith.truncf %132 : vector<8x32xf32> to vector<8x32xbf16>
    %cst_29 = arith.constant dense<0.000000e+00> : vector<8x96xf32>
    %134 = tpu.matmul %133, %4, %cst_29 {dimension_numbers = #tpu.dot_dimension_numbers<[1], [0], [0], [1], [0, 0, 1, 1], [], []>} : vector<8x32xbf16>, vector<32x96xbf16>, vector<8x96xf32> -> vector<8x96xf32>
    %135 = vector.broadcast %5 : vector<1x96xf32> to vector<8x96xf32>
    %136 = arith.addf %134, %135 : vector<8x96xf32>
    %c3 = arith.constant 3 : index
    %c0_30 = arith.constant 0 : index
    %c0_31 = arith.constant 0 : index
    %137 = vector.load %arg2[%c3, %c0_30, %c0_31] : memref<8x8x96xbf16, #tpu.memory_space<vmem>>, vector<1x8x96xbf16>
    %138 = vector.shape_cast %137 : vector<1x8x96xbf16> to vector<8x96xbf16>
    %139 = arith.extf %138 : vector<8x96xbf16> to vector<8x96xf32>
    %140 = vector.extract_strided_slice %139 {offsets = [0, 0], sizes = [8, 32], strides = [1, 1]} : vector<8x96xf32> to vector<8x32xf32>
    %141 = vector.extract_strided_slice %136 {offsets = [0, 0], sizes = [8, 32], strides = [1, 1]} : vector<8x96xf32> to vector<8x32xf32>
    %142 = arith.addf %140, %141 : vector<8x32xf32>
    %143 = arith.negf %142 : vector<8x32xf32>
    %144 = math.exp %143 : vector<8x32xf32>
    %cst_32 = arith.constant 1.000000e+00 : f32
    %145 = vector.broadcast %cst_32 : f32 to vector<8x32xf32>
    %146 = arith.addf %145, %144 : vector<8x32xf32>
    %147 = arith.divf %145, %146 : vector<8x32xf32>
    %148 = vector.extract_strided_slice %139 {offsets = [0, 32], sizes = [8, 32], strides = [1, 1]} : vector<8x96xf32> to vector<8x32xf32>
    %149 = vector.extract_strided_slice %136 {offsets = [0, 32], sizes = [8, 32], strides = [1, 1]} : vector<8x96xf32> to vector<8x32xf32>
    %150 = arith.addf %148, %149 : vector<8x32xf32>
    %151 = arith.negf %150 : vector<8x32xf32>
    %152 = math.exp %151 : vector<8x32xf32>
    %cst_33 = arith.constant 1.000000e+00 : f32
    %153 = vector.broadcast %cst_33 : f32 to vector<8x32xf32>
    %154 = arith.addf %153, %152 : vector<8x32xf32>
    %155 = arith.divf %153, %154 : vector<8x32xf32>
    %156 = vector.extract_strided_slice %139 {offsets = [0, 64], sizes = [8, 32], strides = [1, 1]} : vector<8x96xf32> to vector<8x32xf32>
    %157 = vector.extract_strided_slice %136 {offsets = [0, 64], sizes = [8, 32], strides = [1, 1]} : vector<8x96xf32> to vector<8x32xf32>
    %158 = arith.mulf %147, %157 : vector<8x32xf32>
    %159 = arith.addf %156, %158 : vector<8x32xf32>
    %160 = math.tanh %159 : vector<8x32xf32>
    %161 = arith.subf %132, %160 : vector<8x32xf32>
    %162 = arith.mulf %155, %161 : vector<8x32xf32>
    %163 = arith.addf %160, %162 : vector<8x32xf32>
    %c8_i32_34 = arith.constant 8 : i32
    %164 = arith.muli %arg1, %c8_i32_34 : i32
    %c3_i32 = arith.constant 3 : i32
    %165 = arith.addi %164, %c3_i32 : i32
    %166 = vector.broadcast %165 : i32 to vector<8x1xi32>
    %167 = arith.cmpi slt, %166, %3 : vector<8x1xi32>
    %cst_35 = arith.constant 0.000000e+00 : f32
    %168 = vector.shape_cast %167 : vector<8x1xi1> to vector<8x1xi1>
    %169 = vector.broadcast %168 : vector<8x1xi1> to vector<8x32xi1>
    %170 = vector.broadcast %cst_35 : f32 to vector<8x32xf32>
    %171 = arith.select %169, %163, %170 : vector<8x32xi1>, vector<8x32xf32>
    %172 = vector.shape_cast %167 : vector<8x1xi1> to vector<8x1xi1>
    %173 = vector.broadcast %172 : vector<8x1xi1> to vector<8x32xi1>
    %174 = arith.select %173, %163, %132 : vector<8x32xi1>, vector<8x32xf32>
    %175 = arith.truncf %174 : vector<8x32xf32> to vector<8x32xbf16>
    %cst_36 = arith.constant dense<0.000000e+00> : vector<8x96xf32>
    %176 = tpu.matmul %175, %4, %cst_36 {dimension_numbers = #tpu.dot_dimension_numbers<[1], [0], [0], [1], [0, 0, 1, 1], [], []>} : vector<8x32xbf16>, vector<32x96xbf16>, vector<8x96xf32> -> vector<8x96xf32>
    %177 = vector.broadcast %5 : vector<1x96xf32> to vector<8x96xf32>
    %178 = arith.addf %176, %177 : vector<8x96xf32>
    %c4 = arith.constant 4 : index
    %c0_37 = arith.constant 0 : index
    %c0_38 = arith.constant 0 : index
    %179 = vector.load %arg2[%c4, %c0_37, %c0_38] : memref<8x8x96xbf16, #tpu.memory_space<vmem>>, vector<1x8x96xbf16>
    %180 = vector.shape_cast %179 : vector<1x8x96xbf16> to vector<8x96xbf16>
    %181 = arith.extf %180 : vector<8x96xbf16> to vector<8x96xf32>
    %182 = vector.extract_strided_slice %181 {offsets = [0, 0], sizes = [8, 32], strides = [1, 1]} : vector<8x96xf32> to vector<8x32xf32>
    %183 = vector.extract_strided_slice %178 {offsets = [0, 0], sizes = [8, 32], strides = [1, 1]} : vector<8x96xf32> to vector<8x32xf32>
    %184 = arith.addf %182, %183 : vector<8x32xf32>
    %185 = arith.negf %184 : vector<8x32xf32>
    %186 = math.exp %185 : vector<8x32xf32>
    %cst_39 = arith.constant 1.000000e+00 : f32
    %187 = vector.broadcast %cst_39 : f32 to vector<8x32xf32>
    %188 = arith.addf %187, %186 : vector<8x32xf32>
    %189 = arith.divf %187, %188 : vector<8x32xf32>
    %190 = vector.extract_strided_slice %181 {offsets = [0, 32], sizes = [8, 32], strides = [1, 1]} : vector<8x96xf32> to vector<8x32xf32>
    %191 = vector.extract_strided_slice %178 {offsets = [0, 32], sizes = [8, 32], strides = [1, 1]} : vector<8x96xf32> to vector<8x32xf32>
    %192 = arith.addf %190, %191 : vector<8x32xf32>
    %193 = arith.negf %192 : vector<8x32xf32>
    %194 = math.exp %193 : vector<8x32xf32>
    %cst_40 = arith.constant 1.000000e+00 : f32
    %195 = vector.broadcast %cst_40 : f32 to vector<8x32xf32>
    %196 = arith.addf %195, %194 : vector<8x32xf32>
    %197 = arith.divf %195, %196 : vector<8x32xf32>
    %198 = vector.extract_strided_slice %181 {offsets = [0, 64], sizes = [8, 32], strides = [1, 1]} : vector<8x96xf32> to vector<8x32xf32>
    %199 = vector.extract_strided_slice %178 {offsets = [0, 64], sizes = [8, 32], strides = [1, 1]} : vector<8x96xf32> to vector<8x32xf32>
    %200 = arith.mulf %189, %199 : vector<8x32xf32>
    %201 = arith.addf %198, %200 : vector<8x32xf32>
    %202 = math.tanh %201 : vector<8x32xf32>
    %203 = arith.subf %174, %202 : vector<8x32xf32>
    %204 = arith.mulf %197, %203 : vector<8x32xf32>
    %205 = arith.addf %202, %204 : vector<8x32xf32>
    %c8_i32_41 = arith.constant 8 : i32
    %206 = arith.muli %arg1, %c8_i32_41 : i32
    %c4_i32 = arith.constant 4 : i32
    %207 = arith.addi %206, %c4_i32 : i32
    %208 = vector.broadcast %207 : i32 to vector<8x1xi32>
    %209 = arith.cmpi slt, %208, %3 : vector<8x1xi32>
    %cst_42 = arith.constant 0.000000e+00 : f32
    %210 = vector.shape_cast %209 : vector<8x1xi1> to vector<8x1xi1>
    %211 = vector.broadcast %210 : vector<8x1xi1> to vector<8x32xi1>
    %212 = vector.broadcast %cst_42 : f32 to vector<8x32xf32>
    %213 = arith.select %211, %205, %212 : vector<8x32xi1>, vector<8x32xf32>
    %214 = vector.shape_cast %209 : vector<8x1xi1> to vector<8x1xi1>
    %215 = vector.broadcast %214 : vector<8x1xi1> to vector<8x32xi1>
    %216 = arith.select %215, %205, %174 : vector<8x32xi1>, vector<8x32xf32>
    %217 = arith.truncf %216 : vector<8x32xf32> to vector<8x32xbf16>
    %cst_43 = arith.constant dense<0.000000e+00> : vector<8x96xf32>
    %218 = tpu.matmul %217, %4, %cst_43 {dimension_numbers = #tpu.dot_dimension_numbers<[1], [0], [0], [1], [0, 0, 1, 1], [], []>} : vector<8x32xbf16>, vector<32x96xbf16>, vector<8x96xf32> -> vector<8x96xf32>
    %219 = vector.broadcast %5 : vector<1x96xf32> to vector<8x96xf32>
    %220 = arith.addf %218, %219 : vector<8x96xf32>
    %c5 = arith.constant 5 : index
    %c0_44 = arith.constant 0 : index
    %c0_45 = arith.constant 0 : index
    %221 = vector.load %arg2[%c5, %c0_44, %c0_45] : memref<8x8x96xbf16, #tpu.memory_space<vmem>>, vector<1x8x96xbf16>
    %222 = vector.shape_cast %221 : vector<1x8x96xbf16> to vector<8x96xbf16>
    %223 = arith.extf %222 : vector<8x96xbf16> to vector<8x96xf32>
    %224 = vector.extract_strided_slice %223 {offsets = [0, 0], sizes = [8, 32], strides = [1, 1]} : vector<8x96xf32> to vector<8x32xf32>
    %225 = vector.extract_strided_slice %220 {offsets = [0, 0], sizes = [8, 32], strides = [1, 1]} : vector<8x96xf32> to vector<8x32xf32>
    %226 = arith.addf %224, %225 : vector<8x32xf32>
    %227 = arith.negf %226 : vector<8x32xf32>
    %228 = math.exp %227 : vector<8x32xf32>
    %cst_46 = arith.constant 1.000000e+00 : f32
    %229 = vector.broadcast %cst_46 : f32 to vector<8x32xf32>
    %230 = arith.addf %229, %228 : vector<8x32xf32>
    %231 = arith.divf %229, %230 : vector<8x32xf32>
    %232 = vector.extract_strided_slice %223 {offsets = [0, 32], sizes = [8, 32], strides = [1, 1]} : vector<8x96xf32> to vector<8x32xf32>
    %233 = vector.extract_strided_slice %220 {offsets = [0, 32], sizes = [8, 32], strides = [1, 1]} : vector<8x96xf32> to vector<8x32xf32>
    %234 = arith.addf %232, %233 : vector<8x32xf32>
    %235 = arith.negf %234 : vector<8x32xf32>
    %236 = math.exp %235 : vector<8x32xf32>
    %cst_47 = arith.constant 1.000000e+00 : f32
    %237 = vector.broadcast %cst_47 : f32 to vector<8x32xf32>
    %238 = arith.addf %237, %236 : vector<8x32xf32>
    %239 = arith.divf %237, %238 : vector<8x32xf32>
    %240 = vector.extract_strided_slice %223 {offsets = [0, 64], sizes = [8, 32], strides = [1, 1]} : vector<8x96xf32> to vector<8x32xf32>
    %241 = vector.extract_strided_slice %220 {offsets = [0, 64], sizes = [8, 32], strides = [1, 1]} : vector<8x96xf32> to vector<8x32xf32>
    %242 = arith.mulf %231, %241 : vector<8x32xf32>
    %243 = arith.addf %240, %242 : vector<8x32xf32>
    %244 = math.tanh %243 : vector<8x32xf32>
    %245 = arith.subf %216, %244 : vector<8x32xf32>
    %246 = arith.mulf %239, %245 : vector<8x32xf32>
    %247 = arith.addf %244, %246 : vector<8x32xf32>
    %c8_i32_48 = arith.constant 8 : i32
    %248 = arith.muli %arg1, %c8_i32_48 : i32
    %c5_i32 = arith.constant 5 : i32
    %249 = arith.addi %248, %c5_i32 : i32
    %250 = vector.broadcast %249 : i32 to vector<8x1xi32>
    %251 = arith.cmpi slt, %250, %3 : vector<8x1xi32>
    %cst_49 = arith.constant 0.000000e+00 : f32
    %252 = vector.shape_cast %251 : vector<8x1xi1> to vector<8x1xi1>
    %253 = vector.broadcast %252 : vector<8x1xi1> to vector<8x32xi1>
    %254 = vector.broadcast %cst_49 : f32 to vector<8x32xf32>
    %255 = arith.select %253, %247, %254 : vector<8x32xi1>, vector<8x32xf32>
    %256 = vector.shape_cast %251 : vector<8x1xi1> to vector<8x1xi1>
    %257 = vector.broadcast %256 : vector<8x1xi1> to vector<8x32xi1>
    %258 = arith.select %257, %247, %216 : vector<8x32xi1>, vector<8x32xf32>
    %259 = arith.truncf %258 : vector<8x32xf32> to vector<8x32xbf16>
    %cst_50 = arith.constant dense<0.000000e+00> : vector<8x96xf32>
    %260 = tpu.matmul %259, %4, %cst_50 {dimension_numbers = #tpu.dot_dimension_numbers<[1], [0], [0], [1], [0, 0, 1, 1], [], []>} : vector<8x32xbf16>, vector<32x96xbf16>, vector<8x96xf32> -> vector<8x96xf32>
    %261 = vector.broadcast %5 : vector<1x96xf32> to vector<8x96xf32>
    %262 = arith.addf %260, %261 : vector<8x96xf32>
    %c6 = arith.constant 6 : index
    %c0_51 = arith.constant 0 : index
    %c0_52 = arith.constant 0 : index
    %263 = vector.load %arg2[%c6, %c0_51, %c0_52] : memref<8x8x96xbf16, #tpu.memory_space<vmem>>, vector<1x8x96xbf16>
    %264 = vector.shape_cast %263 : vector<1x8x96xbf16> to vector<8x96xbf16>
    %265 = arith.extf %264 : vector<8x96xbf16> to vector<8x96xf32>
    %266 = vector.extract_strided_slice %265 {offsets = [0, 0], sizes = [8, 32], strides = [1, 1]} : vector<8x96xf32> to vector<8x32xf32>
    %267 = vector.extract_strided_slice %262 {offsets = [0, 0], sizes = [8, 32], strides = [1, 1]} : vector<8x96xf32> to vector<8x32xf32>
    %268 = arith.addf %266, %267 : vector<8x32xf32>
    %269 = arith.negf %268 : vector<8x32xf32>
    %270 = math.exp %269 : vector<8x32xf32>
    %cst_53 = arith.constant 1.000000e+00 : f32
    %271 = vector.broadcast %cst_53 : f32 to vector<8x32xf32>
    %272 = arith.addf %271, %270 : vector<8x32xf32>
    %273 = arith.divf %271, %272 : vector<8x32xf32>
    %274 = vector.extract_strided_slice %265 {offsets = [0, 32], sizes = [8, 32], strides = [1, 1]} : vector<8x96xf32> to vector<8x32xf32>
    %275 = vector.extract_strided_slice %262 {offsets = [0, 32], sizes = [8, 32], strides = [1, 1]} : vector<8x96xf32> to vector<8x32xf32>
    %276 = arith.addf %274, %275 : vector<8x32xf32>
    %277 = arith.negf %276 : vector<8x32xf32>
    %278 = math.exp %277 : vector<8x32xf32>
    %cst_54 = arith.constant 1.000000e+00 : f32
    %279 = vector.broadcast %cst_54 : f32 to vector<8x32xf32>
    %280 = arith.addf %279, %278 : vector<8x32xf32>
    %281 = arith.divf %279, %280 : vector<8x32xf32>
    %282 = vector.extract_strided_slice %265 {offsets = [0, 64], sizes = [8, 32], strides = [1, 1]} : vector<8x96xf32> to vector<8x32xf32>
    %283 = vector.extract_strided_slice %262 {offsets = [0, 64], sizes = [8, 32], strides = [1, 1]} : vector<8x96xf32> to vector<8x32xf32>
    %284 = arith.mulf %273, %283 : vector<8x32xf32>
    %285 = arith.addf %282, %284 : vector<8x32xf32>
    %286 = math.tanh %285 : vector<8x32xf32>
    %287 = arith.subf %258, %286 : vector<8x32xf32>
    %288 = arith.mulf %281, %287 : vector<8x32xf32>
    %289 = arith.addf %286, %288 : vector<8x32xf32>
    %c8_i32_55 = arith.constant 8 : i32
    %290 = arith.muli %arg1, %c8_i32_55 : i32
    %c6_i32 = arith.constant 6 : i32
    %291 = arith.addi %290, %c6_i32 : i32
    %292 = vector.broadcast %291 : i32 to vector<8x1xi32>
    %293 = arith.cmpi slt, %292, %3 : vector<8x1xi32>
    %cst_56 = arith.constant 0.000000e+00 : f32
    %294 = vector.shape_cast %293 : vector<8x1xi1> to vector<8x1xi1>
    %295 = vector.broadcast %294 : vector<8x1xi1> to vector<8x32xi1>
    %296 = vector.broadcast %cst_56 : f32 to vector<8x32xf32>
    %297 = arith.select %295, %289, %296 : vector<8x32xi1>, vector<8x32xf32>
    %298 = vector.shape_cast %293 : vector<8x1xi1> to vector<8x1xi1>
    %299 = vector.broadcast %298 : vector<8x1xi1> to vector<8x32xi1>
    %300 = arith.select %299, %289, %258 : vector<8x32xi1>, vector<8x32xf32>
    %301 = arith.truncf %300 : vector<8x32xf32> to vector<8x32xbf16>
    %cst_57 = arith.constant dense<0.000000e+00> : vector<8x96xf32>
    %302 = tpu.matmul %301, %4, %cst_57 {dimension_numbers = #tpu.dot_dimension_numbers<[1], [0], [0], [1], [0, 0, 1, 1], [], []>} : vector<8x32xbf16>, vector<32x96xbf16>, vector<8x96xf32> -> vector<8x96xf32>
    %303 = vector.broadcast %5 : vector<1x96xf32> to vector<8x96xf32>
    %304 = arith.addf %302, %303 : vector<8x96xf32>
    %c7 = arith.constant 7 : index
    %c0_58 = arith.constant 0 : index
    %c0_59 = arith.constant 0 : index
    %305 = vector.load %arg2[%c7, %c0_58, %c0_59] : memref<8x8x96xbf16, #tpu.memory_space<vmem>>, vector<1x8x96xbf16>
    %306 = vector.shape_cast %305 : vector<1x8x96xbf16> to vector<8x96xbf16>
    %307 = arith.extf %306 : vector<8x96xbf16> to vector<8x96xf32>
    %308 = vector.extract_strided_slice %307 {offsets = [0, 0], sizes = [8, 32], strides = [1, 1]} : vector<8x96xf32> to vector<8x32xf32>
    %309 = vector.extract_strided_slice %304 {offsets = [0, 0], sizes = [8, 32], strides = [1, 1]} : vector<8x96xf32> to vector<8x32xf32>
    %310 = arith.addf %308, %309 : vector<8x32xf32>
    %311 = arith.negf %310 : vector<8x32xf32>
    %312 = math.exp %311 : vector<8x32xf32>
    %cst_60 = arith.constant 1.000000e+00 : f32
    %313 = vector.broadcast %cst_60 : f32 to vector<8x32xf32>
    %314 = arith.addf %313, %312 : vector<8x32xf32>
    %315 = arith.divf %313, %314 : vector<8x32xf32>
    %316 = vector.extract_strided_slice %307 {offsets = [0, 32], sizes = [8, 32], strides = [1, 1]} : vector<8x96xf32> to vector<8x32xf32>
    %317 = vector.extract_strided_slice %304 {offsets = [0, 32], sizes = [8, 32], strides = [1, 1]} : vector<8x96xf32> to vector<8x32xf32>
    %318 = arith.addf %316, %317 : vector<8x32xf32>
    %319 = arith.negf %318 : vector<8x32xf32>
    %320 = math.exp %319 : vector<8x32xf32>
    %cst_61 = arith.constant 1.000000e+00 : f32
    %321 = vector.broadcast %cst_61 : f32 to vector<8x32xf32>
    %322 = arith.addf %321, %320 : vector<8x32xf32>
    %323 = arith.divf %321, %322 : vector<8x32xf32>
    %324 = vector.extract_strided_slice %307 {offsets = [0, 64], sizes = [8, 32], strides = [1, 1]} : vector<8x96xf32> to vector<8x32xf32>
    %325 = vector.extract_strided_slice %304 {offsets = [0, 64], sizes = [8, 32], strides = [1, 1]} : vector<8x96xf32> to vector<8x32xf32>
    %326 = arith.mulf %315, %325 : vector<8x32xf32>
    %327 = arith.addf %324, %326 : vector<8x32xf32>
    %328 = math.tanh %327 : vector<8x32xf32>
    %329 = arith.subf %300, %328 : vector<8x32xf32>
    %330 = arith.mulf %323, %329 : vector<8x32xf32>
    %331 = arith.addf %328, %330 : vector<8x32xf32>
    %c8_i32_62 = arith.constant 8 : i32
    %332 = arith.muli %arg1, %c8_i32_62 : i32
    %c7_i32 = arith.constant 7 : i32
    %333 = arith.addi %332, %c7_i32 : i32
    %334 = vector.broadcast %333 : i32 to vector<8x1xi32>
    %335 = arith.cmpi slt, %334, %3 : vector<8x1xi32>
    %cst_63 = arith.constant 0.000000e+00 : f32
    %336 = vector.shape_cast %335 : vector<8x1xi1> to vector<8x1xi1>
    %337 = vector.broadcast %336 : vector<8x1xi1> to vector<8x32xi1>
    %338 = vector.broadcast %cst_63 : f32 to vector<8x32xf32>
    %339 = arith.select %337, %331, %338 : vector<8x32xi1>, vector<8x32xf32>
    %340 = vector.shape_cast %335 : vector<8x1xi1> to vector<8x1xi1>
    %341 = vector.broadcast %340 : vector<8x1xi1> to vector<8x32xi1>
    %342 = arith.select %341, %331, %300 : vector<8x32xi1>, vector<8x32xf32>
    %c0_64 = arith.constant 0 : index
    %c0_65 = arith.constant 0 : index
    %343 = vector.load %arg9[%c0_64, %c0_65] : memref<8x32xf32, #tpu.memory_space<vmem>>, vector<8x32xf32>
    tpu.vector_store %arg9[%c0_64, %c0_65], %342 {strides = array<i32>} : memref<8x32xf32, #tpu.memory_space<vmem>>, vector<8x32xf32>,
    %344 = vector.shape_cast %45 : vector<8x32xf32> to vector<8x1x32xf32>
    %345 = vector.shape_cast %87 : vector<8x32xf32> to vector<8x1x32xf32>
    %346 = vector.shape_cast %129 : vector<8x32xf32> to vector<8x1x32xf32>
    %347 = vector.shape_cast %171 : vector<8x32xf32> to vector<8x1x32xf32>
    %348 = vector.shape_cast %213 : vector<8x32xf32> to vector<8x1x32xf32>
    %349 = vector.shape_cast %255 : vector<8x32xf32> to vector<8x1x32xf32>
    %350 = vector.shape_cast %297 : vector<8x32xf32> to vector<8x1x32xf32>
    %351 = vector.shape_cast %339 : vector<8x32xf32> to vector<8x1x32xf32>
    %352 = tpu.concatenate %344, %345, %346, %347, %348, %349, %350, %351 in 1 : vector<8x1x32xf32>, vector<8x1x32xf32>, vector<8x1x32xf32>, vector<8x1x32xf32>, vector<8x1x32xf32>, vector<8x1x32xf32>, vector<8x1x32xf32>, vector<8x1x32xf32> -> vector<8x8x32xf32>
    %353 = arith.truncf %352 : vector<8x8x32xf32> to vector<8x8x32xbf16>
    %c0_66 = arith.constant 0 : index
    %c0_67 = arith.constant 0 : index
    %c0_68 = arith.constant 0 : index
    %354 = vector.load %arg7[%c0_66, %c0_67, %c0_68] : memref<8x8x32xbf16, #tpu.memory_space<vmem>>, vector<8x8x32xbf16>
    tpu.vector_store %arg7[%c0_66, %c0_67, %c0_68], %353 {strides = array<i32>} : memref<8x8x32xbf16, #tpu.memory_space<vmem>>, vector<8x8x32xbf16>,
    %c0_i32_69 = arith.constant 0 : i32
    %355 = arith.cmpi eq, %arg1, %c0_i32_69 : i32
    %356 = arith.extui %355 : i1 to i32
    %c0_i32_70 = arith.constant 0 : i32
    %357 = arith.cmpi ne, %356, %c0_i32_70 : i32
    scf.if %357 {
      %c0_71 = arith.constant 0 : index
      %c0_72 = arith.constant 0 : index
      %358 = vector.load %arg9[%c0_71, %c0_72] : memref<8x32xf32, #tpu.memory_space<vmem>>, vector<8x32xf32>
      %c0_73 = arith.constant 0 : index
      %c0_74 = arith.constant 0 : index
      %359 = vector.load %arg8[%c0_73, %c0_74] : memref<8x32xf32, #tpu.memory_space<vmem>>, vector<8x32xf32>
      tpu.vector_store %arg8[%c0_73, %c0_74], %358 {strides = array<i32>} : memref<8x32xf32, #tpu.memory_space<vmem>>, vector<8x32xf32>,
    } else {
    }
    return
  }
  func.func @transform_0(%arg0: i32, %arg1: i32) -> (i32, i32, i32) {
    %c0_i32 = arith.constant 0 : i32
    %c0_i32_0 = arith.constant 0 : i32
    return %arg1, %arg0, %c0_i32 : i32, i32, i32
  }
  func.func @transform_1(%arg0: i32, %arg1: i32) -> (i32, i32) {
    %c0_i32 = arith.constant 0 : i32
    %c0_i32_0 = arith.constant 0 : i32
    return %arg0, %c0_i32 : i32, i32
  }
  func.func @transform_2(%arg0: i32, %arg1: i32) -> (i32, i32) {
    %c0_i32 = arith.constant 0 : i32
    %c0_i32_0 = arith.constant 0 : i32
    return %arg0, %c0_i32 : i32, i32
  }
  func.func @transform_3(%arg0: i32, %arg1: i32) -> (i32, i32) {
    %c0_i32 = arith.constant 0 : i32
    %c0_i32_0 = arith.constant 0 : i32
    %c0_i32_1 = arith.constant 0 : i32
    return %c0_i32, %c0_i32_0 : i32, i32
  }
  func.func @transform_4(%arg0: i32, %arg1: i32) -> (i32, i32) {
    %c0_i32 = arith.constant 0 : i32
    %c0_i32_0 = arith.constant 0 : i32
    %c0_i32_1 = arith.constant 0 : i32
    return %c0_i32, %c0_i32_0 : i32, i32
  }
  func.func @transform_5(%arg0: i32, %arg1: i32) -> (i32, i32, i32) {
    %c0_i32 = arith.constant 0 : i32
    %c0_i32_0 = arith.constant 0 : i32
    return %arg0, %arg1, %c0_i32 : i32, i32, i32
  }
  func.func @transform_6(%arg0: i32, %arg1: i32) -> (i32, i32) {
    %c0_i32 = arith.constant 0 : i32
    %c0_i32_0 = arith.constant 0 : i32
    return %arg0, %c0_i32 : i32, i32
  }
}

module attributes {stable_mosaic.version = 11 : i64} {
  func.func @_attention_core_kernel(%arg0: i32, %arg1: i32, %arg2: memref<8x8x32xbf16, #tpu.memory_space<vmem>>, %arg3: memref<8x8x32xbf16, #tpu.memory_space<vmem>>, %arg4: memref<8x1xi32, #tpu.memory_space<vmem>>, %arg5: memref<8x1xi32, #tpu.memory_space<vmem>>, %arg6: memref<32x32xbf16, #tpu.memory_space<vmem>>, %arg7: memref<32x32xbf16, #tpu.memory_space<vmem>>, %arg8: memref<32x32xbf16, #tpu.memory_space<vmem>>, %arg9: memref<8x8x32xbf16, #tpu.memory_space<vmem>>, %arg10: memref<8x8x32xbf16, #tpu.memory_space<vmem>>) attributes {dimension_semantics = [#tpu.dimension_semantics<parallel>, #tpu.dimension_semantics<arbitrary>], iteration_bounds = array<i64: 1, 1>, scalar_prefetch = 0 : i64, scratch_operands = 1 : i64, tpu.core_type = #tpu.core_type<tc>, window_params = [{transform_indices = @transform_0, window_bounds = array<i64: 8, 8, 32>}, {transform_indices = @transform_1, window_bounds = array<i64: 8, 8, 32>}, {transform_indices = @transform_2, window_bounds = array<i64: 8, 1>}, {transform_indices = @transform_3, window_bounds = array<i64: 8, 1>}, {pipeline_mode = #tpu.pipeline_mode<synchronous>, transform_indices = @transform_4, window_bounds = array<i64: 32, 32>}, {pipeline_mode = #tpu.pipeline_mode<synchronous>, transform_indices = @transform_5, window_bounds = array<i64: 32, 32>}, {pipeline_mode = #tpu.pipeline_mode<synchronous>, transform_indices = @transform_6, window_bounds = array<i64: 32, 32>}, {transform_indices = @transform_7, window_bounds = array<i64: 8, 8, 32>}]} {
    %c0_i32 = arith.constant 0 : i32
    %0 = arith.cmpi eq, %arg1, %c0_i32 : i32
    %1 = arith.extui %0 : i1 to i32
    %c0_i32_0 = arith.constant 0 : i32
    %2 = arith.cmpi ne, %1, %c0_i32_0 : i32
    scf.if %2 {
      %c0_26 = arith.constant 0 : index
      %c0_27 = arith.constant 0 : index
      %c0_28 = arith.constant 0 : index
      %51 = vector.load %arg3[%c0_26, %c0_27, %c0_28] : memref<8x8x32xbf16, #tpu.memory_space<vmem>>, vector<8x8x32xbf16>
      %52 = vector.shape_cast %51 : vector<8x8x32xbf16> to vector<64x32xbf16>
      %c0_29 = arith.constant 0 : index
      %c0_30 = arith.constant 0 : index
      %53 = vector.load %arg6[%c0_29, %c0_30] : memref<32x32xbf16, #tpu.memory_space<vmem>>, vector<32x32xbf16>
      %cst_31 = arith.constant dense<0.000000e+00> : vector<64x32xf32>
      %54 = tpu.matmul %52, %53, %cst_31 {dimension_numbers = #tpu.dot_dimension_numbers<[1], [0], [0], [1], [0, 0, 1, 1], [], []>} : vector<64x32xbf16>, vector<32x32xbf16>, vector<64x32xf32> -> vector<64x32xf32>
      %55 = vector.shape_cast %54 : vector<64x32xf32> to vector<8x8x32xf32>
      %56 = arith.truncf %55 : vector<8x8x32xf32> to vector<8x8x32xbf16>
      %c0_32 = arith.constant 0 : index
      %c0_33 = arith.constant 0 : index
      %c0_34 = arith.constant 0 : index
      %57 = vector.load %arg10[%c0_32, %c0_33, %c0_34] : memref<8x8x32xbf16, #tpu.memory_space<vmem>>, vector<8x8x32xbf16>
      tpu.vector_store %arg10[%c0_32, %c0_33, %c0_34], %56 {strides = array<i32>} : memref<8x8x32xbf16, #tpu.memory_space<vmem>>, vector<8x8x32xbf16>,
    } else {
    }
    %c0 = arith.constant 0 : index
    %c0_1 = arith.constant 0 : index
    %c0_2 = arith.constant 0 : index
    %3 = vector.load %arg2[%c0, %c0_1, %c0_2] : memref<8x8x32xbf16, #tpu.memory_space<vmem>>, vector<8x8x32xbf16>
    %4 = vector.shape_cast %3 : vector<8x8x32xbf16> to vector<64x32xbf16>
    %c0_3 = arith.constant 0 : index
    %c0_4 = arith.constant 0 : index
    %5 = vector.load %arg8[%c0_3, %c0_4] : memref<32x32xbf16, #tpu.memory_space<vmem>>, vector<32x32xbf16>
    %cst = arith.constant dense<0.000000e+00> : vector<64x32xf32>
    %6 = tpu.matmul %4, %5, %cst {dimension_numbers = #tpu.dot_dimension_numbers<[1], [0], [0], [1], [0, 0, 1, 1], [], []>} : vector<64x32xbf16>, vector<32x32xbf16>, vector<64x32xf32> -> vector<64x32xf32>
    %c0_5 = arith.constant 0 : index
    %c0_6 = arith.constant 0 : index
    %c0_7 = arith.constant 0 : index
    %7 = vector.load %arg10[%c0_5, %c0_6, %c0_7] : memref<8x8x32xbf16, #tpu.memory_space<vmem>>, vector<8x8x32xbf16>
    "tpu.trace_start"() <{level = 10 : i32, message = "bth,bsh->bts"}> : () -> ()
    %cst_8 = arith.constant dense<0.000000e+00> : vector<8x8x8xf32>
    %8 = tpu.matmul %3, %7, %cst_8 {dimension_numbers = #tpu.dot_dimension_numbers<[2], [2], [1], [1], [0, 0, 0, 1, 1, 1], [0], [0]>} : vector<8x8x32xbf16>, vector<8x8x32xbf16>, vector<8x8x8xf32> -> vector<8x8x8xf32>
    "tpu.trace_stop"() : () -> ()
    %c8_i32 = arith.constant 8 : i32
    %9 = arith.muli %arg1, %c8_i32 : i32
    %10 = tpu.iota {dimensions = array<i32: 0>} : vector<8x8xi32>
    %11 = vector.broadcast %9 : i32 to vector<8x8xi32>
    %12 = arith.addi %11, %10 : vector<8x8xi32>
    %13 = tpu.iota {dimensions = array<i32: 1>} : vector<8x8xi32>
    %c0_9 = arith.constant 0 : index
    %c0_10 = arith.constant 0 : index
    %14 = vector.load %arg5[%c0_9, %c0_10] : memref<8x1xi32, #tpu.memory_space<vmem>>, vector<8x1xi32>
    %15 = vector.shape_cast %14 : vector<8x1xi32> to vector<8x1x1xi32>
    %c0_11 = arith.constant 0 : index
    %c0_12 = arith.constant 0 : index
    %16 = vector.load %arg4[%c0_11, %c0_12] : memref<8x1xi32, #tpu.memory_space<vmem>>, vector<8x1xi32>
    %17 = vector.shape_cast %16 : vector<8x1xi32> to vector<8x1x1xi32>
    %18 = vector.shape_cast %12 : vector<8x8xi32> to vector<1x8x8xi32>
    %19 = vector.broadcast %18 : vector<1x8x8xi32> to vector<8x8x8xi32>
    %20 = vector.broadcast %15 : vector<8x1x1xi32> to vector<8x8x8xi32>
    %21 = arith.cmpi slt, %19, %20 : vector<8x8x8xi32>
    %22 = vector.shape_cast %13 : vector<8x8xi32> to vector<1x8x8xi32>
    %23 = vector.broadcast %22 : vector<1x8x8xi32> to vector<8x8x8xi32>
    %24 = vector.broadcast %17 : vector<8x1x1xi32> to vector<8x8x8xi32>
    %25 = arith.cmpi slt, %23, %24 : vector<8x8x8xi32>
    %26 = arith.andi %21, %25 : vector<8x8x8xi1>
    %cst_13 = arith.constant -1.000000e+06 : f32
    %27 = vector.broadcast %cst_13 : f32 to vector<8x8x8xf32>
    %28 = arith.select %26, %8, %27 : vector<8x8x8xi1>, vector<8x8x8xf32>
    %cst_14 = arith.constant dense<0xFF800000> : vector<8x8xf32>
    %29 = vector.multi_reduction <maximumf>, %28, %cst_14 [2] : vector<8x8x8xf32> to vector<8x8xf32>
    %30 = vector.shape_cast %29 : vector<8x8xf32> to vector<8x8x1xf32>
    %31 = vector.broadcast %30 : vector<8x8x1xf32> to vector<8x8x8xf32>
    %32 = arith.subf %28, %31 : vector<8x8x8xf32>
    %33 = math.exp %32 : vector<8x8x8xf32>
    %cst_15 = arith.constant dense<0.000000e+00> : vector<8x8xf32>
    %34 = vector.multi_reduction <add>, %33, %cst_15 [2] : vector<8x8x8xf32> to vector<8x8xf32>
    %35 = vector.shape_cast %34 : vector<8x8xf32> to vector<8x8x1xf32>
    %36 = tpu.reciprocal %35 {approx = true} : vector<8x8x1xf32> -> vector<8x8x1xf32>
    %37 = vector.broadcast %36 : vector<8x8x1xf32> to vector<8x8x8xf32>
    %38 = arith.mulf %33, %37 : vector<8x8x8xf32>
    %39 = arith.truncf %38 : vector<8x8x8xf32> to vector<8x8x8xbf16>
    %c0_16 = arith.constant 0 : index
    %c0_17 = arith.constant 0 : index
    %c0_18 = arith.constant 0 : index
    %40 = vector.load %arg3[%c0_16, %c0_17, %c0_18] : memref<8x8x32xbf16, #tpu.memory_space<vmem>>, vector<8x8x32xbf16>
    "tpu.trace_start"() <{level = 10 : i32, message = "bts,bsh->bth"}> : () -> ()
    %cst_19 = arith.constant dense<0.000000e+00> : vector<8x8x32xf32>
    %41 = tpu.matmul %39, %40, %cst_19 {dimension_numbers = #tpu.dot_dimension_numbers<[2], [1], [1], [2], [0, 0, 0, 1, 1, 2], [0], [0]>} : vector<8x8x8xbf16>, vector<8x8x32xbf16>, vector<8x8x32xf32> -> vector<8x8x32xf32>
    "tpu.trace_stop"() : () -> ()
    %42 = vector.shape_cast %41 : vector<8x8x32xf32> to vector<64x32xf32>
    %43 = arith.truncf %42 : vector<64x32xf32> to vector<64x32xbf16>
    %c0_20 = arith.constant 0 : index
    %c0_21 = arith.constant 0 : index
    %44 = vector.load %arg7[%c0_20, %c0_21] : memref<32x32xbf16, #tpu.memory_space<vmem>>, vector<32x32xbf16>
    %cst_22 = arith.constant dense<0.000000e+00> : vector<64x32xf32>
    %45 = tpu.matmul %43, %44, %cst_22 {dimension_numbers = #tpu.dot_dimension_numbers<[1], [0], [0], [1], [0, 0, 1, 1], [], []>} : vector<64x32xbf16>, vector<32x32xbf16>, vector<64x32xf32> -> vector<64x32xf32>
    %46 = arith.addf %45, %6 : vector<64x32xf32>
    %47 = math.tanh %46 : vector<64x32xf32>
    %48 = vector.shape_cast %47 : vector<64x32xf32> to vector<8x8x32xf32>
    %49 = arith.truncf %48 : vector<8x8x32xf32> to vector<8x8x32xbf16>
    %c0_23 = arith.constant 0 : index
    %c0_24 = arith.constant 0 : index
    %c0_25 = arith.constant 0 : index
    %50 = vector.load %arg9[%c0_23, %c0_24, %c0_25] : memref<8x8x32xbf16, #tpu.memory_space<vmem>>, vector<8x8x32xbf16>
    tpu.vector_store %arg9[%c0_23, %c0_24, %c0_25], %49 {strides = array<i32>} : memref<8x8x32xbf16, #tpu.memory_space<vmem>>, vector<8x8x32xbf16>,
    return
  }
  func.func @transform_0(%arg0: i32, %arg1: i32) -> (i32, i32, i32) {
    %c0_i32 = arith.constant 0 : i32
    %c0_i32_0 = arith.constant 0 : i32
    return %arg0, %arg1, %c0_i32 : i32, i32, i32
  }
  func.func @transform_1(%arg0: i32, %arg1: i32) -> (i32, i32, i32) {
    %c0_i32 = arith.constant 0 : i32
    %c0_i32_0 = arith.constant 0 : i32
    %c0_i32_1 = arith.constant 0 : i32
    return %arg0, %c0_i32, %c0_i32_0 : i32, i32, i32
  }
  func.func @transform_2(%arg0: i32, %arg1: i32) -> (i32, i32) {
    %c0_i32 = arith.constant 0 : i32
    %c0_i32_0 = arith.constant 0 : i32
    return %arg0, %c0_i32 : i32, i32
  }
  func.func @transform_3(%arg0: i32, %arg1: i32) -> (i32, i32) {
    %c0_i32 = arith.constant 0 : i32
    %c0_i32_0 = arith.constant 0 : i32
    return %arg0, %c0_i32 : i32, i32
  }
  func.func @transform_4(%arg0: i32, %arg1: i32) -> (i32, i32) {
    %c0_i32 = arith.constant 0 : i32
    %c0_i32_0 = arith.constant 0 : i32
    %c0_i32_1 = arith.constant 0 : i32
    return %c0_i32, %c0_i32_0 : i32, i32
  }
  func.func @transform_5(%arg0: i32, %arg1: i32) -> (i32, i32) {
    %c0_i32 = arith.constant 0 : i32
    %c0_i32_0 = arith.constant 0 : i32
    %c0_i32_1 = arith.constant 0 : i32
    return %c0_i32, %c0_i32_0 : i32, i32
  }
  func.func @transform_6(%arg0: i32, %arg1: i32) -> (i32, i32) {
    %c0_i32 = arith.constant 0 : i32
    %c0_i32_0 = arith.constant 0 : i32
    %c0_i32_1 = arith.constant 0 : i32
    return %c0_i32, %c0_i32_0 : i32, i32
  }
  func.func @transform_7(%arg0: i32, %arg1: i32) -> (i32, i32, i32) {
    %c0_i32 = arith.constant 0 : i32
    %c0_i32_0 = arith.constant 0 : i32
    return %arg0, %arg1, %c0_i32 : i32, i32, i32
  }
}

module attributes {stable_mosaic.version = 11 : i64} {
  func.func @_vocab_lse_kernel(%arg0: i32, %arg1: i32, %arg2: memref<16x32xbf16, #tpu.memory_space<vmem>>, %arg3: memref<32x128xbf16, #tpu.memory_space<vmem>>, %arg4: memref<1x128xf32, #tpu.memory_space<vmem>>, %arg5: memref<16x1xf32, #tpu.memory_space<vmem>>, %arg6: memref<16x1xf32, #tpu.memory_space<vmem>>, %arg7: memref<16x1xf32, #tpu.memory_space<vmem>>) attributes {dimension_semantics = [#tpu.dimension_semantics<parallel>, #tpu.dimension_semantics<arbitrary>], iteration_bounds = array<i64: 1, 1>, scalar_prefetch = 0 : i64, scratch_operands = 2 : i64, tpu.core_type = #tpu.core_type<tc>, window_params = [{transform_indices = @transform_0, window_bounds = array<i64: 16, 32>}, {transform_indices = @transform_1, window_bounds = array<i64: 32, 128>}, {transform_indices = @transform_2, window_bounds = array<i64: 1, 128>}, {transform_indices = @transform_3, window_bounds = array<i64: 16, 1>}]} {
    %c0_i32 = arith.constant 0 : i32
    %0 = arith.cmpi eq, %arg1, %c0_i32 : i32
    %1 = arith.extui %0 : i1 to i32
    %c0_i32_0 = arith.constant 0 : i32
    %2 = arith.cmpi ne, %1, %c0_i32_0 : i32
    scf.if %2 {
      %cst_20 = arith.constant 0xFF800000 : f32
      %29 = vector.broadcast %cst_20 : f32 to vector<16x1xf32>
      %c0_21 = arith.constant 0 : index
      %c0_22 = arith.constant 0 : index
      %30 = vector.load %arg6[%c0_21, %c0_22] : memref<16x1xf32, #tpu.memory_space<vmem>>, vector<16x1xf32>
      tpu.vector_store %arg6[%c0_21, %c0_22], %29 {strides = array<i32>} : memref<16x1xf32, #tpu.memory_space<vmem>>, vector<16x1xf32>,
      %cst_23 = arith.constant 0.000000e+00 : f32
      %31 = vector.broadcast %cst_23 : f32 to vector<16x1xf32>
      %c0_24 = arith.constant 0 : index
      %c0_25 = arith.constant 0 : index
      %32 = vector.load %arg7[%c0_24, %c0_25] : memref<16x1xf32, #tpu.memory_space<vmem>>, vector<16x1xf32>
      tpu.vector_store %arg7[%c0_24, %c0_25], %31 {strides = array<i32>} : memref<16x1xf32, #tpu.memory_space<vmem>>, vector<16x1xf32>,
    } else {
    }
    %c0 = arith.constant 0 : index
    %c0_1 = arith.constant 0 : index
    %3 = vector.load %arg2[%c0, %c0_1] : memref<16x32xbf16, #tpu.memory_space<vmem>>, vector<16x32xbf16>
    %c0_2 = arith.constant 0 : index
    %c0_3 = arith.constant 0 : index
    %4 = vector.load %arg3[%c0_2, %c0_3] : memref<32x128xbf16, #tpu.memory_space<vmem>>, vector<32x128xbf16>
    %cst = arith.constant dense<0.000000e+00> : vector<16x128xf32>
    %5 = tpu.matmul %3, %4, %cst {dimension_numbers = #tpu.dot_dimension_numbers<[1], [0], [0], [1], [0, 0, 1, 1], [], []>} : vector<16x32xbf16>, vector<32x128xbf16>, vector<16x128xf32> -> vector<16x128xf32>
    %c0_4 = arith.constant 0 : index
    %c0_5 = arith.constant 0 : index
    %6 = vector.load %arg4[%c0_4, %c0_5] : memref<1x128xf32, #tpu.memory_space<vmem>>, vector<1x128xf32>
    %7 = vector.broadcast %6 : vector<1x128xf32> to vector<16x128xf32>
    %8 = arith.addf %5, %7 : vector<16x128xf32>
    %c0_6 = arith.constant 0 : index
    %c0_7 = arith.constant 0 : index
    %9 = vector.load %arg6[%c0_6, %c0_7] : memref<16x1xf32, #tpu.memory_space<vmem>>, vector<16x1xf32>
    %cst_8 = arith.constant dense<0xFF800000> : vector<16xf32>
    %10 = vector.multi_reduction <maximumf>, %8, %cst_8 [1] : vector<16x128xf32> to vector<16xf32>
    %11 = vector.shape_cast %10 : vector<16xf32> to vector<16x1xf32>
    %12 = arith.maximumf %9, %11 : vector<16x1xf32>
    %c0_9 = arith.constant 0 : index
    %c0_10 = arith.constant 0 : index
    %13 = vector.load %arg7[%c0_9, %c0_10] : memref<16x1xf32, #tpu.memory_space<vmem>>, vector<16x1xf32>
    %c0_11 = arith.constant 0 : index
    %c0_12 = arith.constant 0 : index
    %14 = vector.load %arg6[%c0_11, %c0_12] : memref<16x1xf32, #tpu.memory_space<vmem>>, vector<16x1xf32>
    %15 = arith.subf %14, %12 : vector<16x1xf32>
    %16 = math.exp %15 : vector<16x1xf32>
    %17 = arith.mulf %13, %16 : vector<16x1xf32>
    %18 = vector.broadcast %12 : vector<16x1xf32> to vector<16x128xf32>
    %19 = arith.subf %8, %18 : vector<16x128xf32>
    %20 = math.exp %19 : vector<16x128xf32>
    %cst_13 = arith.constant dense<0.000000e+00> : vector<16xf32>
    %21 = vector.multi_reduction <add>, %20, %cst_13 [1] : vector<16x128xf32> to vector<16xf32>
    %22 = vector.shape_cast %21 : vector<16xf32> to vector<16x1xf32>
    %23 = arith.addf %17, %22 : vector<16x1xf32>
    %c0_14 = arith.constant 0 : index
    %c0_15 = arith.constant 0 : index
    %24 = vector.load %arg7[%c0_14, %c0_15] : memref<16x1xf32, #tpu.memory_space<vmem>>, vector<16x1xf32>
    tpu.vector_store %arg7[%c0_14, %c0_15], %23 {strides = array<i32>} : memref<16x1xf32, #tpu.memory_space<vmem>>, vector<16x1xf32>,
    %c0_16 = arith.constant 0 : index
    %c0_17 = arith.constant 0 : index
    %25 = vector.load %arg6[%c0_16, %c0_17] : memref<16x1xf32, #tpu.memory_space<vmem>>, vector<16x1xf32>
    tpu.vector_store %arg6[%c0_16, %c0_17], %12 {strides = array<i32>} : memref<16x1xf32, #tpu.memory_space<vmem>>, vector<16x1xf32>,
    %c0_i32_18 = arith.constant 0 : i32
    %26 = arith.cmpi eq, %arg1, %c0_i32_18 : i32
    %27 = arith.extui %26 : i1 to i32
    %c0_i32_19 = arith.constant 0 : i32
    %28 = arith.cmpi ne, %27, %c0_i32_19 : i32
    scf.if %28 {
      %c0_20 = arith.constant 0 : index
      %c0_21 = arith.constant 0 : index
      %29 = vector.load %arg6[%c0_20, %c0_21] : memref<16x1xf32, #tpu.memory_space<vmem>>, vector<16x1xf32>
      %c0_22 = arith.constant 0 : index
      %c0_23 = arith.constant 0 : index
      %30 = vector.load %arg7[%c0_22, %c0_23] : memref<16x1xf32, #tpu.memory_space<vmem>>, vector<16x1xf32>
      %31 = math.log %30 : vector<16x1xf32>
      %32 = arith.addf %29, %31 : vector<16x1xf32>
      %c0_24 = arith.constant 0 : index
      %c0_25 = arith.constant 0 : index
      %33 = vector.load %arg5[%c0_24, %c0_25] : memref<16x1xf32, #tpu.memory_space<vmem>>, vector<16x1xf32>
      tpu.vector_store %arg5[%c0_24, %c0_25], %32 {strides = array<i32>} : memref<16x1xf32, #tpu.memory_space<vmem>>, vector<16x1xf32>,
    } else {
    }
    return
  }
  func.func @transform_0(%arg0: i32, %arg1: i32) -> (i32, i32) {
    %c0_i32 = arith.constant 0 : i32
    %c0_i32_0 = arith.constant 0 : i32
    return %arg0, %c0_i32 : i32, i32
  }
  func.func @transform_1(%arg0: i32, %arg1: i32) -> (i32, i32) {
    %c0_i32 = arith.constant 0 : i32
    %c0_i32_0 = arith.constant 0 : i32
    return %c0_i32, %arg1 : i32, i32
  }
  func.func @transform_2(%arg0: i32, %arg1: i32) -> (i32, i32) {
    %c0_i32 = arith.constant 0 : i32
    %c0_i32_0 = arith.constant 0 : i32
    return %c0_i32, %arg1 : i32, i32
  }
  func.func @transform_3(%arg0: i32, %arg1: i32) -> (i32, i32) {
    %c0_i32 = arith.constant 0 : i32
    %c0_i32_0 = arith.constant 0 : i32
    return %arg0, %c0_i32 : i32, i32
  }
}

module attributes {stable_mosaic.version = 11 : i64} {
  func.func @_vocab_logp_kernel(%arg0: i32, %arg1: i32, %arg2: memref<16x32xbf16, #tpu.memory_space<vmem>>, %arg3: memref<32x128xbf16, #tpu.memory_space<vmem>>, %arg4: memref<1x128xf32, #tpu.memory_space<vmem>>, %arg5: memref<16x1xf32, #tpu.memory_space<vmem>>, %arg6: memref<16x128xf32, #tpu.memory_space<vmem>>) attributes {dimension_semantics = [#tpu.dimension_semantics<parallel>, #tpu.dimension_semantics<parallel>], iteration_bounds = array<i64: 1, 1>, scalar_prefetch = 0 : i64, scratch_operands = 0 : i64, tpu.core_type = #tpu.core_type<tc>, window_params = [{transform_indices = @transform_0, window_bounds = array<i64: 16, 32>}, {transform_indices = @transform_1, window_bounds = array<i64: 32, 128>}, {transform_indices = @transform_2, window_bounds = array<i64: 1, 128>}, {transform_indices = @transform_3, window_bounds = array<i64: 16, 1>}, {transform_indices = @transform_4, window_bounds = array<i64: 16, 128>}]} {
    %c0 = arith.constant 0 : index
    %c0_0 = arith.constant 0 : index
    %0 = vector.load %arg2[%c0, %c0_0] : memref<16x32xbf16, #tpu.memory_space<vmem>>, vector<16x32xbf16>
    %c0_1 = arith.constant 0 : index
    %c0_2 = arith.constant 0 : index
    %1 = vector.load %arg3[%c0_1, %c0_2] : memref<32x128xbf16, #tpu.memory_space<vmem>>, vector<32x128xbf16>
    %cst = arith.constant dense<0.000000e+00> : vector<16x128xf32>
    %2 = tpu.matmul %0, %1, %cst {dimension_numbers = #tpu.dot_dimension_numbers<[1], [0], [0], [1], [0, 0, 1, 1], [], []>} : vector<16x32xbf16>, vector<32x128xbf16>, vector<16x128xf32> -> vector<16x128xf32>
    %c0_3 = arith.constant 0 : index
    %c0_4 = arith.constant 0 : index
    %3 = vector.load %arg4[%c0_3, %c0_4] : memref<1x128xf32, #tpu.memory_space<vmem>>, vector<1x128xf32>
    %4 = vector.broadcast %3 : vector<1x128xf32> to vector<16x128xf32>
    %5 = arith.addf %2, %4 : vector<16x128xf32>
    %c0_5 = arith.constant 0 : index
    %c0_6 = arith.constant 0 : index
    %6 = vector.load %arg5[%c0_5, %c0_6] : memref<16x1xf32, #tpu.memory_space<vmem>>, vector<16x1xf32>
    %7 = vector.broadcast %6 : vector<16x1xf32> to vector<16x128xf32>
    %8 = arith.subf %5, %7 : vector<16x128xf32>
    %c0_7 = arith.constant 0 : index
    %c0_8 = arith.constant 0 : index
    %9 = vector.load %arg6[%c0_7, %c0_8] : memref<16x128xf32, #tpu.memory_space<vmem>>, vector<16x128xf32>
    tpu.vector_store %arg6[%c0_7, %c0_8], %8 {strides = array<i32>} : memref<16x128xf32, #tpu.memory_space<vmem>>, vector<16x128xf32>,
    return
  }
  func.func @transform_0(%arg0: i32, %arg1: i32) -> (i32, i32) {
    %c0_i32 = arith.constant 0 : i32
    %c0_i32_0 = arith.constant 0 : i32
    return %arg0, %c0_i32 : i32, i32
  }
  func.func @transform_1(%arg0: i32, %arg1: i32) -> (i32, i32) {
    %c0_i32 = arith.constant 0 : i32
    %c0_i32_0 = arith.constant 0 : i32
    return %c0_i32, %arg1 : i32, i32
  }
  func.func @transform_2(%arg0: i32, %arg1: i32) -> (i32, i32) {
    %c0_i32 = arith.constant 0 : i32
    %c0_i32_0 = arith.constant 0 : i32
    return %c0_i32, %arg1 : i32, i32
  }
  func.func @transform_3(%arg0: i32, %arg1: i32) -> (i32, i32) {
    %c0_i32 = arith.constant 0 : i32
    %c0_i32_0 = arith.constant 0 : i32
    return %arg0, %c0_i32 : i32, i32
  }
  func.func @transform_4(%arg0: i32, %arg1: i32) -> (i32, i32) {
    %c0_i32 = arith.constant 0 : i32
    return %arg0, %arg1 : i32, i32
  }
}

</mosaic_0001>

<bundles_post_ra>
// kernel: attention_gru_forward.7
= control target key start
LH: loop header
LB: loop body
LE: loop exit
PB: predicated region body
PF: predicated region fallthrough
CT: control target
= control target key end

     0   :  { %vm66_vm0 = vcmask 261120   ;;  %vm176_vm1 = vcmask 781312   ;;  %s317_s1 = inlined_call_operand.vmem [shape: bf16[32,96], index: 1, kind: input, shape index: {}]   ;;  %s318_s0 = inlined_call_operand.vmem [shape: bf16[64,32], index: 0, kind: input, shape index: {}]   ;;  %s319_s2 = inlined_call_operand.vmem [shape: f32[1,96], index: 2, kind: input, shape index: {}]   ;;  %s320_s3 = inlined_call_operand.vmem [shape: bf16[64,96], index: 3, kind: output, shape index: {}]  }
   0x1   :  { %v238_v0 = vld [vmem:[%s317_s1] sm:$0xff]   ;;  %v239_v1 = vld [vmem:[%s317_s1 + $0x8] sm:$0xff]   ;;  %v241_v3 = vld [vmem:[%s318_s0 + $0x10] sm:$0xff]  }
   0x2   :  { %222 = vmatprep.subr.bf16.mxu0 %v238_v0  ;;  %234 = vmatprep.subr.bf16.mxu1 %v238_v0  ;;  %v240_v2 = vld [vmem:[%s318_s0] sm:$0xff]   ;;  %v242_v4 = vld [vmem:[%s318_s0 + $0x8] sm:$0xff]   ;;  %v243_v5 = vld [vmem:[%s318_s0 + $0x18] sm:$0xff]  }
   0x3   :  { %223 = vmatpush3.bf16.msra.mxu0 %v238_v0  ;;  %236 = vmatpush3.bf16.msra.mxu1 %v238_v0  ;;  %v189_v6 = vld [vmem:[%s319_s2] ss:$0 sm:$0xff] }
   0x4   :  { %224 = vmatprep.subr.bf16.mxu0 %v239_v1  ;;  %235 = vmatprep.subr.bf16.mxu1 %v239_v1 }
   0x5   :  { %226 = vmatprep.mubr.msk.bf16.mxu0 %vm66_vm0, %v240_v2  ;;  %230 = vmatprep.mubr.msk.bf16.mxu1 %vm66_vm0, %v241_v3 }
   0x7   :  { %225 = vmatpush3.bf16.msra.mxu0 %v239_v1  ;;  %237 = vmatpush3.bf16.msra.mxu1 %v239_v1 }
   0xa   :  { %227 = vmatmul.mubr.msk.bf16.vlgmr.msra.gmra.mrb[0].mxu0 %vm66_vm0, %v242_v4  ;;  %231 = vmatmul.mubr.msk.bf16.vlgmr.msra.gmra.mrb[0].mxu1 %vm66_vm0, %v243_v5 }
  0xdd   :  { %v228_v7 = vpop.f32.mrb[0].mxu0  ;;  %v232_v8 = vpop.f32.mrb[0].mxu1 }
  0xde   :  { %v122_v9 = vadd.f32 %v228_v7, %v189_v6  ;;  %v138_v10 = vadd.f32 %v232_v8, %v189_v6  ;;  %v113_v11 = vpop.f32.mrb[1].mxu0  ;;  %v129_v12 = vpop.f32.mrb[1].mxu1 }
  0xdf   :  { %v114_v13 = vadd.f32 %v189_v6, %v113_v11  ;;  %v130_v14 = vadd.f32 %v189_v6, %v129_v12  ;;  %v229_v15 = vpop.f32.mrb[2].mxu0  ;;  %v233_v16 = vpop.f32.mrb[2].mxu1 }
  0xe0   :  { %v210_v17 = vpack.c.bf16 %v122_v9, %v122_v9  ;;  %v214_v18 = vpack.c.bf16 %v138_v10, %v138_v10  ;;  %v125_v19 = vadd.f32 %v229_v15, %v189_v6  ;;  %v141_v20 = vadd.f32 %v233_v16, %v189_v6  ;;  %v116_v21 = vpop.f32.mrb[3].mxu0  ;;  %v132_v22 = vpop.f32.mrb[3].mxu1 }
  0xe1   :  { %v208_v23 = vpack.c.bf16 %v114_v13, %v114_v13  ;;  %v212_v24 = vpack.c.bf16 %v130_v14, %v130_v14  ;;  %v117_v25 = vadd.f32 %v189_v6, %v116_v21  ;;  %v133_v26 = vadd.f32 %v189_v6, %v132_v22 }
  0xe2   :  { %179 = vst.msk [vmem:[%s320_s3 + $0x8] sm:$0xf] %vm176_vm1, %v210_v17  ;;  %183 = vst.msk [vmem:[%s320_s3 + $0x18] sm:$0xf] %vm176_vm1, %v214_v18  ;;  %v211_v27 = vpack.c.bf16 %v125_v19, %v125_v19  ;;  %v215_v28 = vpack.c.bf16 %v141_v20, %v141_v20 }
  0xe3   :  { %177 = vst.msk [vmem:[%s320_s3] sm:$0xf] %vm176_vm1, %v208_v23  ;;  %181 = vst.msk [vmem:[%s320_s3 + $0x10] sm:$0xf] %vm176_vm1, %v212_v24  ;;  %v209_v29 = vpack.c.bf16 %v117_v25, %v117_v25  ;;  %v213_v30 = vpack.c.bf16 %v133_v26, %v133_v26 }
  0xe4   :  { %180 = vst.msk [vmem:[%s320_s3 + $0xc] sm:$0xf] %vm176_vm1, %v211_v27  ;;  %184 = vst.msk [vmem:[%s320_s3 + $0x1c] sm:$0xf] %vm176_vm1, %v215_v28 }
  0xe5   :  { %178 = vst.msk [vmem:[%s320_s3 + $0x4] sm:$0xf] %vm176_vm1, %v209_v29  ;;  %182 = vst.msk [vmem:[%s320_s3 + $0x14] sm:$0xf] %vm176_vm1, %v213_v30 }

// kernel: attention_gru_forward.9
= control target key start
LH: loop header
LB: loop body
LE: loop exit
PB: predicated region body
PF: predicated region fallthrough
CT: control target
= control target key end

     0   :  { %v1803_v0 = vmov 0.0   ;;  %vm1804_vm0 = vmmov 0   ;;  %vm28_vm1 = vcmask 261120   ;;  %s1805_s27 = smov 64   ;;  %v1806_v23 = vmov 0   ;;  %s1807_s8 = smov 32   ;;  %s2410_s3 = inlined_call_operand.vmem [shape: bf16[32,96], index: 3, kind: input, shape index: {}]   ;;  %s2411_s2 = inlined_call_operand.vmem [shape: f32[8,32], index: 2, kind: input, shape index: {}]   ;;  %s2412_s4 = inlined_call_operand.vmem [shape: f32[1,96], index: 4, kind: input, shape index: {}]   ;;  %s2413_s0 = inlined_call_operand.vmem [shape: bf16[8,8,96], index: 0, kind: input, shape index: {}]   ;;  %s2414_s1 = inlined_call_operand.vmem [shape: s32[8,1], index: 1, kind: input, shape index: {}]   ;;  %s2415_s6 = inlined_call_operand.vmem [shape: f32[8,32], index: 6, kind: output, shape index: {1}]   ;;  %s2416_s5 = inlined_call_operand.vmem [shape: bf16[8,8,32], index: 5, kind: output, shape index: {0}]  }
   0x1   :  { %1680 = vmatprep.subr.bf16.mxu0 %v1803_v0  ;;  %v1849_v1 = vld [vmem:[%s2410_s3] sm:$0xff]   ;;  %1684 = vmatprep.mubr.msk.bf16.mxu0 %vm1804_vm0, %v1803_v0  ;;  %v1860_v2 = vld [vmem:[%s2410_s3 + $0x8] sm:$0xff]   ;;  %s1808_s10 = smov 96   ;;  %v1809_v60 = vmov 1966171168   ;;  %v782_v62 = vlaneseq  ;;  %vm1465_vm6 = vcmask 1040384  }
   0x2   :  { %1688 = vmatprep.subr.bf16.mxu1 %v1803_v0  ;;  %1692 = vmatprep.mubr.msk.bf16.mxu1 %vm1804_vm0, %v1803_v0  ;;  %v27_v3 = vld [vmem:[%s2411_s2] sm:$0xff]  ;;  %v780_v61 = vunpack.c.l.s4 %v1809_v60  ;;  %vm1474_vm9 = vcmask 1041408   ;;  %vm1483_vm12 = vcmask 1042432   ;;  %vm1492_vm15 = vcmask 1043456  }
   0x3   :  { %1681 = vmatpush3.bf16.msra.mxu0 %v1849_v1  ;;  %1689 = vmatpush3.bf16.msra.mxu1 %v1849_v1  ;;  %29 = vst.msk [vmem:[#allocation2] sm:$0xff] %vm28_vm1, %v27_v3  ;;  %v1883_v6 = vld [vmem:[%s2412_s4] ss:$0 sm:$0xff]  ;;  %v1916_v44 = vld [vmem:[%s2413_s0 + $0x4] sm:$0xff]   ;;  %v783_v3 = vshrl.u32 %v782_v62, 7 }
   0x4   :  { %1682 = vmatprep.subr.bf16.mxu0 %v1803_v0  ;;  %1690 = vmatprep.subr.bf16.mxu1 %v1803_v0  ;;  %v100_v12 = vld [vmem:[%s2413_s0] sm:$0xf]  ;;  %v198_v45 = vunpack.c.l.bf16 %v1916_v44  ;;  %v781_v63 = vunpack.c.0.s8 %v780_v61 }
   0x5   :  { %v101_v13 = vunpack.c.l.bf16 %v100_v12  ;;  %1751 = vset.pattern.permute.xlu0 %v1806_v23  ;;  %v1895_v24 = vld [vmem:[%s2414_s1] sm:$0xff] }
   0x6   :  { %vm1611_vm2 = vcmp.gt.s32.totalorder %v1895_v24, 0  ;;  %vm1615_vm4 = vcmp.gt.s32.totalorder %v1895_v24, 1  ;;  %vm1619_vm7 = vcmp.gt.s32.totalorder %v1895_v24, 2  ;;  %vm1623_vm10 = vcmp.gt.s32.totalorder %v1895_v24, 3 }
   0x7   :  { %1683 = vmatpush3.bf16.msra.mxu0 %v1860_v2  ;;  %1691 = vmatpush3.bf16.msra.mxu1 %v1860_v2  ;;  %v138_v25 = vsel %vm1611_vm2, 1, %v1806_v23  ;;  %v231_v53 = vsel %vm1615_vm4, 1, %v1806_v23  ;;  %vm1627_vm13 = vcmp.gt.s32.totalorder %v1895_v24, 4  ;;  %vm1635_vm4 = vcmp.gt.s32.totalorder %v1895_v24, 6 }
   0x8   :  { %1696 = vmatprep.subr.bf16.mxu0 %v1803_v0  ;;  %1704 = vmatprep.subr.bf16.mxu1 %v1803_v0 }
   0xa   :  { %v36_v4 = vld [vmem:[#allocation2] sm:$0xff] }
   0xb   :  { %v37_v5 = vpack.c.bf16 %v36_v4, %v36_v4 }
   0xd   :  { %1685 = vmatmul.mubr.msk.bf16.vlgmr.msra.gmra.mrb[0].mxu0 %vm28_vm1, %v37_v5 }
   0xe   :  { %1697 = vmatpush3.bf16.msra.mxu0 %v1849_v1  ;;  %1700 = vmatprep.mubr.msk.bf16.mxu0 %vm1804_vm0, %v1803_v0 }
   0xf   :  { %1698 = vmatprep.subr.bf16.mxu0 %v1803_v0 }
  0x12   :  { %1699 = vmatpush3.bf16.msra.mxu0 %v1860_v2 }
  0x13   :  { %1712 = vmatprep.subr.bf16.mxu0 %v1803_v0 }
  0xe0   :  { %v94_v7 = vpop.f32.mrb[0].mxu0 }
  0xe1   :  { %v95_v8 = vadd.f32 %v1883_v6, %v94_v7  ;;  %v1686_v9 = vpop.f32.mrb[1].mxu0 }
  0xe2   :  { %v97_v10 = vpop.f32.mrb[2].mxu0 }
  0xe3   :  { %110 = vrot.lane.b32.xlu0 %v95_v8, %s1805_s27  ;;  %v1687_v11 = vpop.f32.mrb[3].mxu0  ;;  %v102_v14 = vadd.f32 %v101_v13, %v95_v8 }
  0xe5   :  { %v1610_v15 = vmul.f32 -1.442695, %v102_v14 }
  0xe7   :  { %1754 = vpow2.f32 %v1610_v15 }
  0xf1   :  { %v1755_v16 = vpop.eup %1754 }
  0xf2   :  { %v106_v17 = vadd.f32 1.0, %v1755_v16 }
  0xf4   :  { %1756 = vrcp.f32 %v106_v17 }
  0xfe   :  { %v1757_v18 = vpop.eup %1756 }
 0x155   :  { %v111_v19 = vpop.permute.xlu0 %110 }
 0x156   :  { %v113_v20 = vmul.f32 %v1757_v18, %v111_v19 }
 0x158   :  { %115 = vrot.lane.b32.xlu0 %v113_v20, %s1805_s27 }
 0x15c   :  { %140 = vperm.xlu0 %1751, %v138_v25  }
 0x1ca   :  { %v116_v21 = vpop.permute.xlu0 %115 }
 0x1cb   :  { %v118_v22 = vadd.f32 %v116_v21, %v101_v13  ;;  %v1935_v21 = vsub.s32 0, %v783_v3 }
 0x1cd   :  { %1758 = vtanh.f32 %v118_v22 }
 0x1d7   :  { %v1759_v26 = vpop.eup %1758 }
 0x1d8   :  { %121 = vrot.lane.b32.xlu1 %v1759_v26, %s1805_s27 }
 0x1db   :  { %v141_v31 = vpop.permute.xlu0 %140 }
 0x1dc   :  { %vm142_vm3 = vcmp.eq.s32.totalorder %v141_v31, 1 }
 0x24a   :  { %v122_v27 = vpop.permute.xlu1 %121 }
 0x24b   :  { %v124_v28 = vsub.f32 %v36_v4, %v122_v27 }
 0x24d   :  { %126 = vrot.lane.b32.xlu1 %v124_v28, %s1807_s8 }
 0x2bf   :  { %v127_v29 = vpop.permute.xlu1 %126 }
 0x2c0   :  { %v129_v30 = vmul.f32 %v1757_v18, %v127_v29 }
 0x2c2   :  { %131 = vrot.lane.b32.xlu1 %v129_v30, %s1807_s8 }
 0x2c6   :  { %145 = vrot.lane.b32.xlu1 %v36_v4, %s1805_s27  ;;  %v1924_v4 = vsub.s32 %v781_v63, %v783_v3  ;;  %v287_v3 = vunpack.c.h.bf16 %v1916_v44 }
 0x334   :  { %v132_v32 = vpop.permute.xlu1 %131 }
 0x335   :  { %v134_v33 = vadd.f32 %v1759_v26, %v132_v32 }
 0x337   :  { %v143_v34 = vsel %vm142_vm3, %v134_v33, 0.0 }
 0x338   :  { %v146_v35 = vpop.permute.xlu1 %145  ;;  %v778_v5 = vcombine.high %v143_v34, %v143_v34  ;;  %v785_v7 = vrot.slane %v143_v34, %v1924_v4 }
 0x339   :  { %v148_v36 = vsel %vm142_vm3, %v134_v33, %v146_v35  ;;  %vm1501_vm3 = vcmask 1044480  }
 0x33a   :  { %v149_v37 = vpack.c.bf16 %v148_v36, %v148_v36  ;;  %v792_v10 = vrot.slane %v778_v5, %v1924_v4  ;;  %v793_v12 = vcombine.high %v785_v7, %v785_v7  ;;  %v801_v19 = vrot.slane %v785_v7, %v1924_v4 }
 0x33c   :  { %151 = vrot.lane.b32.xlu0 %v149_v37, %s1805_s27  ;;  %v794_v18 = vcombine.high %v792_v10, %v792_v10  ;;  %v808_v20 = vrot.slane %v792_v10, %v1924_v4  ;;  %v815_v27 = vrot.slane %v793_v12, %v1924_v4  ;;  %v823_v33 = vcombine.high %v801_v19, %v801_v19 }
 0x33e   :  { %v822_v32 = vrot.slane %v794_v18, %v1924_v4  ;;  %v824_v34 = vcombine.high %v808_v20, %v808_v20 }
 0x3ae   :  { %v152_v38 = vpop.permute.xlu0 %151 }
 0x3af   :  { %1693 = vmatmul.mubr.msk.bf16.vlgmr.msra.gmra.mrb[0].mxu1 %vm28_vm1, %v152_v38 }
 0x3b0   :  { %1705 = vmatpush3.bf16.msra.mxu1 %v1849_v1  ;;  %1708 = vmatprep.mubr.msk.bf16.mxu1 %vm1804_vm0, %v1803_v0 }
 0x3b1   :  { %1706 = vmatprep.subr.bf16.mxu1 %v1803_v0 }
 0x3b4   :  { %1707 = vmatpush3.bf16.msra.mxu1 %v1860_v2 }
 0x3b5   :  { %1720 = vmatprep.subr.bf16.mxu1 %v1803_v0 }
 0x482   :  { %v190_v39 = vpop.f32.mrb[0].mxu1 }
 0x483   :  { %v191_v40 = vadd.f32 %v1883_v6, %v190_v39  ;;  %v1694_v41 = vpop.f32.mrb[1].mxu1 }
 0x484   :  { %v193_v42 = vpop.f32.mrb[2].mxu1 }
 0x485   :  { %207 = vrot.lane.b32.xlu1 %v191_v40, %s1805_s27  ;;  %v1695_v43 = vpop.f32.mrb[3].mxu1  ;;  %v199_v46 = vadd.f32 %v198_v45, %v191_v40  ;;  %v825_v40 = vcombine.high %v815_v27, %v815_v27 }
 0x487   :  { %v1614_v47 = vmul.f32 -1.442695, %v199_v46 }
 0x489   :  { %1760 = vpow2.f32 %v1614_v47 }
 0x493   :  { %v1761_v48 = vpop.eup %1760 }
 0x494   :  { %v203_v49 = vadd.f32 1.0, %v1761_v48 }
 0x496   :  { %1762 = vrcp.f32 %v203_v49  ;;  %v826_v49 = vcombine.high %v822_v32, %v822_v32 }
 0x4a0   :  { %v1763_v50 = vpop.eup %1762 }
 0x4f7   :  { %v208_v51 = vpop.permute.xlu1 %207 }
 0x4f8   :  { %v210_v52 = vmul.f32 %v1763_v50, %v208_v51 }
 0x4fa   :  { %212 = vrot.lane.b32.xlu0 %v210_v52, %s1805_s27 }
 0x4fe   :  { %233 = vperm.xlu0 %1751, %v231_v53  }
 0x56c   :  { %v213_v54 = vpop.permute.xlu0 %212 }
 0x56d   :  { %v215_v55 = vadd.f32 %v213_v54, %v198_v45 }
 0x56f   :  { %1764 = vtanh.f32 %v215_v55 }
 0x579   :  { %v1765_v56 = vpop.eup %1764 }
 0x57a   :  { %v217_v57 = vsub.f32 %v148_v36, %v1765_v56 }
 0x57c   :  { %219 = vrot.lane.b32.xlu1 %v217_v57, %s1808_s10 }
 0x57d   :  { %v234_v8 = vpop.permute.xlu0 %233 }
 0x57e   :  { %vm235_vm5 = vcmp.eq.s32.totalorder %v234_v8, 1 }
 0x5ee   :  { %v220_v58 = vpop.permute.xlu1 %219 }
 0x5ef   :  { %v222_v59 = vmul.f32 %v1763_v50, %v220_v58 }
 0x5f1   :  { %224 = vrot.lane.b32.xlu1 %v222_v59, %s1807_s8 }
 0x663   :  { %v225_v9 = vpop.permute.xlu1 %224 }
 0x664   :  { %v227_v11 = vadd.f32 %v1765_v56, %v225_v9 }
 0x666   :  { %v236_v13 = vsel %vm235_vm5, %v227_v11, 0.0  ;;  %v1928_v14 = vsel %vm235_vm5, %v227_v11, %v148_v36 }
 0x667   :  { %v836_v15 = vcombine.high %v236_v13, %v236_v13  ;;  %v843_v16 = vrot.slane %v236_v13, %v1924_v4  ;;  %v238_v17 = vpack.c.bf16 %v1928_v14, %v1928_v14  ;;  %v320_v13 = vsel %vm1619_vm7, 1, %v1806_v23 }
 0x668   :  { %vm1639_vm7 = vcmp.gt.s32.totalorder %v1895_v24, 7 }
 0x669   :  { %v850_v22 = vrot.slane %v836_v15, %v1924_v4  ;;  %v851_v25 = vcombine.high %v843_v16, %v843_v16  ;;  %v859_v26 = vrot.slane %v843_v16, %v1924_v4  ;;  %240 = vrot.lane.b32.xlu0 %v238_v17, %s1805_s27 }
 0x66b   :  { %v852_v28 = vcombine.high %v850_v22, %v850_v22  ;;  %v866_v29 = vrot.slane %v850_v22, %v1924_v4  ;;  %v873_v30 = vrot.slane %v851_v25, %v1924_v4  ;;  %v881_v31 = vcombine.high %v859_v26, %v859_v26 }
 0x66c   :  { %v1188_v35 = vrot.slane %v859_v26, %v1935_v21 }
 0x66d   :  { %v880_v36 = vrot.slane %v852_v28, %v1924_v4  ;;  %v882_v37 = vcombine.high %v866_v29, %v866_v29  ;;  %v883_v38 = vcombine.high %v873_v30, %v873_v30  ;;  %v1192_v39 = vrot.slane %v873_v30, %v1935_v21 }
 0x66e   :  { %v1196_v41 = vrot.slane %v881_v31, %v1935_v21  ;;  %v1204_v42 = vrot.slane %v866_v29, %v1935_v21  ;;  %v1950_v43 = vsel %vm1465_vm6, %v801_v19, %v1188_v35 }
 0x66f   :  { %v884_v45 = vcombine.high %v880_v36, %v880_v36  ;;  %v1200_v46 = vrot.slane %v883_v38, %v1935_v21  ;;  %v1208_v47 = vrot.slane %v880_v36, %v1935_v21  ;;  %v1212_v48 = vrot.slane %v882_v37, %v1935_v21 }
 0x670   :  { %v1956_v50 = vsel %vm1465_vm6, %v815_v27, %v1192_v39  ;;  %v1959_v51 = vsel %vm1465_vm6, %v823_v33, %v1196_v41  ;;  %v1962_v52 = vsel %vm1465_vm6, %v808_v20, %v1204_v42 }
 0x671   :  { %v1216_v53 = vrot.slane %v884_v45, %v1935_v21  ;;  %v1966_v54 = vsel %vm1465_vm6, %v825_v40, %v1200_v46  ;;  %v1969_v55 = vsel %vm1465_vm6, %v822_v32, %v1208_v47  ;;  %v1972_v56 = vsel %vm1465_vm6, %v824_v34, %v1212_v48 }
 0x673   :  { %v1975_v57 = vsel %vm1465_vm6, %v826_v49, %v1216_v53  ;;  %vm1510_vm6 = vcmask 1045504  }
 0x6db   :  { %v241_v58 = vpop.permute.xlu0 %240 }
 0x6dc   :  { %1701 = vmatmul.mubr.msk.bf16.vlgmr.msra.gmra.mrb[4].mxu0 %vm28_vm1, %v241_v58 }
 0x6dd   :  { %1713 = vmatpush3.bf16.msra.mxu0 %v1849_v1  ;;  %1716 = vmatprep.mubr.msk.bf16.mxu0 %vm1804_vm0, %v1803_v0 }
 0x6de   :  { %1714 = vmatprep.subr.bf16.mxu0 %v1803_v0 }
 0x6e1   :  { %1715 = vmatpush3.bf16.msra.mxu0 %v1860_v2 }
 0x6e2   :  { %1728 = vmatprep.subr.bf16.mxu0 %v1803_v0 }
 0x7af   :  { %v279_v59 = vpop.f32.mrb[4].mxu0 }
 0x7b0   :  { %v280_v60 = vadd.f32 %v1883_v6, %v279_v59  ;;  %v1702_v61 = vpop.f32.mrb[5].mxu0 }
 0x7b1   :  { %v282_v62 = vpop.f32.mrb[6].mxu0 }
 0x7b2   :  { %296 = vrot.lane.b32.xlu1 %v280_v60, %s1805_s27  ;;  %v1703_v63 = vpop.f32.mrb[7].mxu0  ;;  %v288_v5 = vadd.f32 %v287_v3, %v280_v60 }
 0x7b4   :  { %v1618_v7 = vmul.f32 -1.442695, %v288_v5 }
 0x7b6   :  { %1766 = vpow2.f32 %v1618_v7 }
 0x7c0   :  { %v1767_v8 = vpop.eup %1766 }
 0x7c1   :  { %v292_v9 = vadd.f32 1.0, %v1767_v8 }
 0x7c3   :  { %1768 = vrcp.f32 %v292_v9 }
 0x7cd   :  { %v1769_v10 = vpop.eup %1768 }
 0x824   :  { %v297_v11 = vpop.permute.xlu1 %296 }
 0x825   :  { %v299_v12 = vmul.f32 %v1769_v10, %v297_v11 }
 0x827   :  { %301 = vrot.lane.b32.xlu0 %v299_v12, %s1805_s27 }
 0x82b   :  { %322 = vperm.xlu0 %1751, %v320_v13  }
 0x899   :  { %v302_v15 = vpop.permute.xlu0 %301 }
 0x89a   :  { %v304_v16 = vadd.f32 %v302_v15, %v287_v3  ;;  %v2057_v3 = vld [vmem:[%s2413_s0 + $0xc] sm:$0xff]   ;;  %v409_v15 = vsel %vm1623_vm10, 1, %v1806_v23  ;;  %vm1584_vm10 = vcmask 257024  }
 0x89b   :  { %v376_v5 = vunpack.c.l.bf16 %v2057_v3 }
 0x89c   :  { %1770 = vtanh.f32 %v304_v16 }
 0x8a6   :  { %v1771_v44 = vpop.eup %1770 }
 0x8a7   :  { %v306_v17 = vsub.f32 %v1928_v14, %v1771_v44 }
 0x8a9   :  { %308 = vrot.lane.b32.xlu1 %v306_v17, %s1808_s10 }
 0x8aa   :  { %v323_v20 = vpop.permute.xlu0 %322 }
 0x8ab   :  { %vm324_vm8 = vcmp.eq.s32.totalorder %v323_v20, 1 }
 0x91b   :  { %v309_v18 = vpop.permute.xlu1 %308 }
 0x91c   :  { %v311_v19 = vmul.f32 %v1769_v10, %v309_v18 }
 0x91e   :  { %313 = vrot.lane.b32.xlu1 %v311_v19, %s1807_s8 }
 0x990   :  { %v314_v22 = vpop.permute.xlu1 %313 }
 0x991   :  { %v316_v25 = vadd.f32 %v1771_v44, %v314_v22 }
 0x993   :  { %v325_v26 = vsel %vm324_vm8, %v316_v25, 0.0  ;;  %v1994_v27 = vsel %vm324_vm8, %v316_v25, %v1928_v14 }
 0x994   :  { %v886_v28 = vcombine.high %v325_v26, %v325_v26  ;;  %v893_v29 = vrot.slane %v325_v26, %v1924_v4  ;;  %v327_v30 = vpack.c.bf16 %v1994_v27, %v1994_v27 }
 0x996   :  { %v900_v31 = vrot.slane %v886_v28, %v1924_v4  ;;  %v901_v32 = vcombine.high %v893_v29, %v893_v29  ;;  %v909_v33 = vrot.slane %v893_v29, %v1924_v4  ;;  %329 = vrot.lane.b32.xlu0 %v327_v30, %s1805_s27 }
 0x998   :  { %v902_v34 = vcombine.high %v900_v31, %v900_v31  ;;  %v916_v35 = vrot.slane %v900_v31, %v1924_v4  ;;  %v923_v14 = vrot.slane %v901_v32, %v1924_v4  ;;  %v931_v36 = vcombine.high %v909_v33, %v909_v33 }
 0x999   :  { %v1228_v37 = vrot.slane %v909_v33, %v1935_v21 }
 0x99a   :  { %v930_v38 = vrot.slane %v902_v34, %v1924_v4  ;;  %v932_v39 = vcombine.high %v916_v35, %v916_v35  ;;  %v933_v40 = vcombine.high %v923_v14, %v923_v14  ;;  %v1232_v41 = vrot.slane %v923_v14, %v1935_v21 }
 0x99b   :  { %v1236_v42 = vrot.slane %v931_v36, %v1935_v21  ;;  %v1244_v45 = vrot.slane %v916_v35, %v1935_v21  ;;  %v2011_v46 = vsel %vm1474_vm9, %v1950_v43, %v1228_v37 }
 0x99c   :  { %v934_v47 = vcombine.high %v930_v38, %v930_v38  ;;  %v1240_v48 = vrot.slane %v933_v40, %v1935_v21  ;;  %v1248_v49 = vrot.slane %v930_v38, %v1935_v21  ;;  %v1252_v53 = vrot.slane %v932_v39, %v1935_v21 }
 0x99d   :  { %v2018_v58 = vsel %vm1474_vm9, %v1956_v50, %v1232_v41  ;;  %v2022_v59 = vsel %vm1474_vm9, %v1959_v51, %v1236_v42  ;;  %v2026_v60 = vsel %vm1474_vm9, %v1962_v52, %v1244_v45 }
 0x99e   :  { %v1256_v43 = vrot.slane %v934_v47, %v1935_v21  ;;  %v2031_v61 = vsel %vm1474_vm9, %v1966_v54, %v1240_v48  ;;  %v2035_v62 = vsel %vm1474_vm9, %v1969_v55, %v1248_v49  ;;  %v2039_v50 = vsel %vm1474_vm9, %v1972_v56, %v1252_v53 }
 0x9a0   :  { %v2043_v51 = vsel %vm1474_vm9, %v1975_v57, %v1256_v43  ;;  %vm1519_vm9 = vcmask 1046528  }
 0xa08   :  { %v330_v52 = vpop.permute.xlu0 %329 }
 0xa09   :  { %1709 = vmatmul.mubr.msk.bf16.vlgmr.msra.gmra.mrb[4].mxu1 %vm28_vm1, %v330_v52 }
 0xa0a   :  { %1721 = vmatpush3.bf16.msra.mxu1 %v1849_v1  ;;  %1724 = vmatprep.mubr.msk.bf16.mxu1 %vm1804_vm0, %v1803_v0 }
 0xa0b   :  { %1722 = vmatprep.subr.bf16.mxu1 %v1803_v0 }
 0xa0e   :  { %1723 = vmatpush3.bf16.msra.mxu1 %v1860_v2 }
 0xa0f   :  { %1736 = vmatprep.subr.bf16.mxu1 %v1803_v0 }
 0xadc   :  { %v368_v54 = vpop.f32.mrb[4].mxu1 }
 0xadd   :  { %v369_v55 = vadd.f32 %v1883_v6, %v368_v54  ;;  %v1710_v56 = vpop.f32.mrb[5].mxu1 }
 0xade   :  { %v371_v57 = vpop.f32.mrb[6].mxu1 }
 0xadf   :  { %385 = vrot.lane.b32.xlu1 %v369_v55, %s1805_s27  ;;  %v1711_v63 = vpop.f32.mrb[7].mxu1  ;;  %v377_v7 = vadd.f32 %v376_v5, %v369_v55 }
 0xae1   :  { %v1622_v8 = vmul.f32 -1.442695, %v377_v7  ;;  %v465_v7 = vunpack.c.h.bf16 %v2057_v3 }
 0xae3   :  { %1772 = vpow2.f32 %v1622_v8 }
 0xaed   :  { %v1773_v9 = vpop.eup %1772 }
 0xaee   :  { %v381_v10 = vadd.f32 1.0, %v1773_v9 }
 0xaf0   :  { %1774 = vrcp.f32 %v381_v10 }
 0xafa   :  { %v1775_v11 = vpop.eup %1774 }
 0xb51   :  { %v386_v12 = vpop.permute.xlu1 %385 }
 0xb52   :  { %v388_v13 = vmul.f32 %v1775_v11, %v386_v12 }
 0xb54   :  { %390 = vrot.lane.b32.xlu0 %v388_v13, %s1805_s27 }
 0xb58   :  { %411 = vperm.xlu0 %1751, %v409_v15  }
 0xbc6   :  { %v391_v16 = vpop.permute.xlu0 %390 }
 0xbc7   :  { %v393_v44 = vadd.f32 %v391_v16, %v376_v5  ;;  %v498_v16 = vsel %vm1627_vm13, 1, %v1806_v23 }
 0xbc9   :  { %1776 = vtanh.f32 %v393_v44 }
 0xbd3   :  { %v1777_v17 = vpop.eup %1776 }
 0xbd4   :  { %v395_v18 = vsub.f32 %v1994_v27, %v1777_v17 }
 0xbd6   :  { %397 = vrot.lane.b32.xlu1 %v395_v18, %s1808_s10 }
 0xbd7   :  { %v412_v22 = vpop.permute.xlu0 %411 }
 0xbd8   :  { %vm413_vm11 = vcmp.eq.s32.totalorder %v412_v22, 1 }
 0xc48   :  { %v398_v19 = vpop.permute.xlu1 %397 }
 0xc49   :  { %v400_v20 = vmul.f32 %v1775_v11, %v398_v19 }
 0xc4b   :  { %402 = vrot.lane.b32.xlu1 %v400_v20, %s1807_s8 }
 0xcbd   :  { %v403_v25 = vpop.permute.xlu1 %402 }
 0xcbe   :  { %v405_v26 = vadd.f32 %v1777_v17, %v403_v25 }
 0xcc0   :  { %v414_v28 = vsel %vm413_vm11, %v405_v26, 0.0  ;;  %v2067_v29 = vsel %vm413_vm11, %v405_v26, %v1994_v27 }
 0xcc1   :  { %v936_v30 = vcombine.high %v414_v28, %v414_v28  ;;  %v943_v31 = vrot.slane %v414_v28, %v1924_v4  ;;  %v416_v32 = vpack.c.bf16 %v2067_v29, %v2067_v29 }
 0xcc3   :  { %v950_v33 = vrot.slane %v936_v30, %v1924_v4  ;;  %v951_v34 = vcombine.high %v943_v31, %v943_v31  ;;  %v959_v35 = vrot.slane %v943_v31, %v1924_v4  ;;  %418 = vrot.lane.b32.xlu0 %v416_v32, %s1805_s27 }
 0xcc5   :  { %v952_v14 = vcombine.high %v950_v33, %v950_v33  ;;  %v966_v36 = vrot.slane %v950_v33, %v1924_v4  ;;  %v973_v27 = vrot.slane %v951_v34, %v1924_v4  ;;  %v981_v37 = vcombine.high %v959_v35, %v959_v35 }
 0xcc6   :  { %v1268_v38 = vrot.slane %v959_v35, %v1935_v21 }
 0xcc7   :  { %v980_v39 = vrot.slane %v952_v14, %v1924_v4  ;;  %v982_v40 = vcombine.high %v966_v36, %v966_v36  ;;  %v983_v41 = vcombine.high %v973_v27, %v973_v27  ;;  %v1272_v42 = vrot.slane %v973_v27, %v1935_v21 }
 0xcc8   :  { %v1276_v45 = vrot.slane %v981_v37, %v1935_v21  ;;  %v1284_v47 = vrot.slane %v966_v36, %v1935_v21  ;;  %v2084_v48 = vsel %vm1483_vm12, %v2011_v46, %v1268_v38 }
 0xcc9   :  { %v984_v49 = vcombine.high %v980_v39, %v980_v39  ;;  %v1280_v53 = vrot.slane %v983_v41, %v1935_v21  ;;  %v1288_v43 = vrot.slane %v980_v39, %v1935_v21  ;;  %v1292_v52 = vrot.slane %v982_v40, %v1935_v21 }
 0xcca   :  { %v2091_v54 = vsel %vm1483_vm12, %v2018_v58, %v1272_v42  ;;  %v2095_v55 = vsel %vm1483_vm12, %v2022_v59, %v1276_v45  ;;  %v2099_v56 = vsel %vm1483_vm12, %v2026_v60, %v1284_v47 }
 0xccb   :  { %v1296_v46 = vrot.slane %v984_v49, %v1935_v21  ;;  %v2104_v57 = vsel %vm1483_vm12, %v2031_v61, %v1280_v53  ;;  %v2108_v63 = vsel %vm1483_vm12, %v2035_v62, %v1288_v43  ;;  %v2112_v58 = vsel %vm1483_vm12, %v2039_v50, %v1292_v52 }
 0xccd   :  { %v2116_v59 = vsel %vm1483_vm12, %v2043_v51, %v1296_v46 }
 0xd35   :  { %v419_v60 = vpop.permute.xlu0 %418 }
 0xd36   :  { %1717 = vmatmul.mubr.msk.bf16.vlgmr.msra.gmra.mrb[8].mxu0 %vm28_vm1, %v419_v60 }
 0xd37   :  { %1729 = vmatpush3.bf16.msra.mxu0 %v1849_v1  ;;  %1732 = vmatprep.mubr.msk.bf16.mxu0 %vm1804_vm0, %v1803_v0 }
 0xd38   :  { %1730 = vmatprep.subr.bf16.mxu0 %v1803_v0 }
 0xd3b   :  { %1731 = vmatpush3.bf16.msra.mxu0 %v1860_v2 }
 0xe09   :  { %v457_v61 = vpop.f32.mrb[8].mxu0 }
 0xe0a   :  { %v458_v62 = vadd.f32 %v1883_v6, %v457_v61  ;;  %v1718_v50 = vpop.f32.mrb[9].mxu0 }
 0xe0b   :  { %v460_v5 = vpop.f32.mrb[10].mxu0 }
 0xe0c   :  { %474 = vrot.lane.b32.xlu1 %v458_v62, %s1805_s27  ;;  %v1719_v51 = vpop.f32.mrb[11].mxu0  ;;  %v466_v8 = vadd.f32 %v465_v7, %v458_v62 }
 0xe0e   :  { %v1626_v9 = vmul.f32 -1.442695, %v466_v8 }
 0xe10   :  { %1778 = vpow2.f32 %v1626_v9 }
 0xe1a   :  { %v1779_v10 = vpop.eup %1778 }
 0xe1b   :  { %v470_v11 = vadd.f32 1.0, %v1779_v10 }
 0xe1d   :  { %1780 = vrcp.f32 %v470_v11 }
 0xe27   :  { %v1781_v12 = vpop.eup %1780 }
 0xe7e   :  { %v475_v13 = vpop.permute.xlu1 %474 }
 0xe7f   :  { %v477_v15 = vmul.f32 %v1781_v12, %v475_v13 }
 0xe81   :  { %479 = vrot.lane.b32.xlu0 %v477_v15, %s1805_s27 }
 0xe85   :  { %500 = vperm.xlu0 %1751, %v498_v16  }
 0xef3   :  { %v480_v44 = vpop.permute.xlu0 %479 }
 0xef4   :  { %v482_v17 = vadd.f32 %v480_v44, %v465_v7  ;;  %v2196_v7 = vld [vmem:[%s2413_s0 + $0x14] sm:$0xff]  }
 0xef6   :  { %1782 = vtanh.f32 %v482_v17 }
 0xf00   :  { %v1783_v3 = vpop.eup %1782 }
 0xf01   :  { %v484_v18 = vsub.f32 %v2067_v29, %v1783_v3 }
 0xf03   :  { %486 = vrot.lane.b32.xlu1 %v484_v18, %s1808_s10 }
 0xf04   :  { %v501_v22 = vpop.permute.xlu0 %500 }
 0xf05   :  { %vm502_vm14 = vcmp.eq.s32.totalorder %v501_v22, 1 }
 0xf75   :  { %v487_v19 = vpop.permute.xlu1 %486 }
 0xf76   :  { %v489_v20 = vmul.f32 %v1781_v12, %v487_v19 }
 0xf78   :  { %491 = vrot.lane.b32.xlu1 %v489_v20, %s1807_s8 }
 0xfea   :  { %v492_v25 = vpop.permute.xlu1 %491 }
 0xfeb   :  { %v494_v26 = vadd.f32 %v1783_v3, %v492_v25 }
 0xfed   :  { %v503_v28 = vsel %vm502_vm14, %v494_v26, 0.0  ;;  %v2134_v30 = vsel %vm502_vm14, %v494_v26, %v2067_v29 }
 0xfee   :  { %v986_v31 = vcombine.high %v503_v28, %v503_v28  ;;  %v993_v32 = vrot.slane %v503_v28, %v1924_v4  ;;  %v505_v33 = vpack.c.bf16 %v2134_v30, %v2134_v30 }
 0xff0   :  { %v1000_v34 = vrot.slane %v986_v31, %v1924_v4  ;;  %v1001_v35 = vcombine.high %v993_v32, %v993_v32  ;;  %v1009_v14 = vrot.slane %v993_v32, %v1924_v4  ;;  %507 = vrot.lane.b32.xlu0 %v505_v33, %s1805_s27 }
 0xff2   :  { %v1002_v36 = vcombine.high %v1000_v34, %v1000_v34  ;;  %v1016_v27 = vrot.slane %v1000_v34, %v1924_v4  ;;  %v1023_v29 = vrot.slane %v1001_v35, %v1924_v4  ;;  %v1031_v37 = vcombine.high %v1009_v14, %v1009_v14 }
 0xff3   :  { %v1308_v38 = vrot.slane %v1009_v14, %v1935_v21 }
 0xff4   :  { %v1030_v39 = vrot.slane %v1002_v36, %v1924_v4  ;;  %v1032_v40 = vcombine.high %v1016_v27, %v1016_v27  ;;  %v1033_v41 = vcombine.high %v1023_v29, %v1023_v29  ;;  %v1312_v42 = vrot.slane %v1023_v29, %v1935_v21 }
 0xff5   :  { %v1316_v45 = vrot.slane %v1031_v37, %v1935_v21  ;;  %v1324_v47 = vrot.slane %v1016_v27, %v1935_v21  ;;  %v2151_v49 = vsel %vm1492_vm15, %v2084_v48, %v1308_v38 }
 0xff6   :  { %v1034_v53 = vcombine.high %v1030_v39, %v1030_v39  ;;  %v1320_v43 = vrot.slane %v1033_v41, %v1935_v21  ;;  %v1328_v52 = vrot.slane %v1030_v39, %v1935_v21  ;;  %v1332_v46 = vrot.slane %v1032_v40, %v1935_v21 }
 0xff7   :  { %v2158_v60 = vsel %vm1492_vm15, %v2091_v54, %v1312_v42  ;;  %v2162_v61 = vsel %vm1492_vm15, %v2095_v55, %v1316_v45  ;;  %v2166_v62 = vsel %vm1492_vm15, %v2099_v56, %v1324_v47 }
 0xff8   :  { %v1336_v48 = vrot.slane %v1034_v53, %v1935_v21  ;;  %v2171_v50 = vsel %vm1492_vm15, %v2104_v57, %v1320_v43  ;;  %v2175_v5 = vsel %vm1492_vm15, %v2108_v63, %v1328_v52  ;;  %v2179_v54 = vsel %vm1492_vm15, %v2112_v58, %v1332_v46 }
 0xffa   :  { %v2183_v55 = vsel %vm1492_vm15, %v2116_v59, %v1336_v48 }
0x1062   :  { %v508_v56 = vpop.permute.xlu0 %507 }
0x1063   :  { %1725 = vmatmul.mubr.msk.bf16.vlgmr.msra.gmra.mrb[8].mxu1 %vm28_vm1, %v508_v56 }
0x1064   :  { %1737 = vmatpush3.bf16.msra.mxu1 %v1849_v1  ;;  %1740 = vmatprep.mubr.msk.bf16.mxu1 %vm1804_vm0, %v1803_v0  ;;  %v554_v1 = vunpack.c.l.bf16 %v2196_v7  ;;  %vm1631_vm0 = vcmp.gt.s32.totalorder %v1895_v24, 5 }
0x1065   :  { %1738 = vmatprep.subr.bf16.mxu1 %v1803_v0  ;;  %v587_v13 = vsel %vm1631_vm0, 1, %v1806_v23 }
0x1068   :  { %1739 = vmatpush3.bf16.msra.mxu1 %v1860_v2 }
0x1136   :  { %v546_v57 = vpop.f32.mrb[8].mxu1 }
0x1137   :  { %v547_v63 = vadd.f32 %v1883_v6, %v546_v57  ;;  %v1726_v58 = vpop.f32.mrb[9].mxu1 }
0x1138   :  { %v549_v51 = vpop.f32.mrb[10].mxu1 }
0x1139   :  { %563 = vrot.lane.b32.xlu1 %v547_v63, %s1805_s27  ;;  %v1727_v59 = vpop.f32.mrb[11].mxu1  ;;  %v555_v8 = vadd.f32 %v554_v1, %v547_v63 }
0x113b   :  { %v1630_v9 = vmul.f32 -1.442695, %v555_v8 }
0x113d   :  { %1784 = vpow2.f32 %v1630_v9 }
0x1147   :  { %v1785_v0 = vpop.eup %1784 }
0x1148   :  { %v559_v2 = vadd.f32 1.0, %v1785_v0 }
0x114a   :  { %1786 = vrcp.f32 %v559_v2 }
0x1154   :  { %v1787_v10 = vpop.eup %1786 }
0x11ab   :  { %v564_v11 = vpop.permute.xlu1 %563 }
0x11ac   :  { %v566_v12 = vmul.f32 %v1787_v10, %v564_v11 }
0x11ae   :  { %568 = vrot.lane.b32.xlu0 %v566_v12, %s1805_s27 }
0x11b2   :  { %589 = vperm.xlu0 %1751, %v587_v13  }
0x1220   :  { %v569_v15 = vpop.permute.xlu0 %568 }
0x1221   :  { %v571_v16 = vadd.f32 %v569_v15, %v554_v1 }
0x1223   :  { %1788 = vtanh.f32 %v571_v16 }
0x122d   :  { %v1789_v44 = vpop.eup %1788 }
0x122e   :  { %v573_v17 = vsub.f32 %v2134_v30, %v1789_v44 }
0x1230   :  { %575 = vrot.lane.b32.xlu1 %v573_v17, %s1808_s10 }
0x1231   :  { %v590_v19 = vpop.permute.xlu0 %589 }
0x1232   :  { %vm591_vm2 = vcmp.eq.s32.totalorder %v590_v19, 1 }
0x12a2   :  { %v576_v3 = vpop.permute.xlu1 %575 }
0x12a3   :  { %v578_v18 = vmul.f32 %v1787_v10, %v576_v3 }
0x12a5   :  { %580 = vrot.lane.b32.xlu1 %v578_v18, %s1807_s8 }
0x1317   :  { %v581_v20 = vpop.permute.xlu1 %580 }
0x1318   :  { %v583_v22 = vadd.f32 %v1789_v44, %v581_v20 }
0x131a   :  { %v592_v25 = vsel %vm591_vm2, %v583_v22, 0.0  ;;  %v2206_v26 = vsel %vm591_vm2, %v583_v22, %v2134_v30 }
0x131b   :  { %v1036_v28 = vcombine.high %v592_v25, %v592_v25  ;;  %v1043_v31 = vrot.slane %v592_v25, %v1924_v4  ;;  %v594_v32 = vpack.c.bf16 %v2206_v26, %v2206_v26 }
0x131d   :  { %v1050_v33 = vrot.slane %v1036_v28, %v1924_v4  ;;  %v1051_v34 = vcombine.high %v1043_v31, %v1043_v31  ;;  %v1059_v35 = vrot.slane %v1043_v31, %v1924_v4  ;;  %596 = vrot.lane.b32.xlu0 %v594_v32, %s1805_s27 }
0x131f   :  { %v1052_v14 = vcombine.high %v1050_v33, %v1050_v33  ;;  %v1066_v36 = vrot.slane %v1050_v33, %v1924_v4  ;;  %v1073_v30 = vrot.slane %v1051_v34, %v1924_v4  ;;  %v1081_v27 = vcombine.high %v1059_v35, %v1059_v35 }
0x1320   :  { %v1348_v29 = vrot.slane %v1059_v35, %v1935_v21 }
0x1321   :  { %v1080_v37 = vrot.slane %v1052_v14, %v1924_v4  ;;  %v1082_v38 = vcombine.high %v1066_v36, %v1066_v36  ;;  %v1083_v39 = vcombine.high %v1073_v30, %v1073_v30  ;;  %v1352_v40 = vrot.slane %v1073_v30, %v1935_v21 }
0x1322   :  { %v1356_v41 = vrot.slane %v1081_v27, %v1935_v21  ;;  %v1364_v42 = vrot.slane %v1066_v36, %v1935_v21  ;;  %v2223_v45 = vsel %vm1501_vm3, %v2151_v49, %v1348_v29 }
0x1323   :  { %v1084_v47 = vcombine.high %v1080_v37, %v1080_v37  ;;  %v1360_v53 = vrot.slane %v1083_v39, %v1935_v21  ;;  %v1368_v43 = vrot.slane %v1080_v37, %v1935_v21  ;;  %v1372_v52 = vrot.slane %v1082_v38, %v1935_v21 }
0x1324   :  { %v2230_v46 = vsel %vm1501_vm3, %v2158_v60, %v1352_v40  ;;  %v2234_v48 = vsel %vm1501_vm3, %v2162_v61, %v1356_v41  ;;  %v2238_v56 = vsel %vm1501_vm3, %v2166_v62, %v1364_v42 }
0x1325   :  { %v2242_v49 = vsel %vm1501_vm3, %v2171_v50, %v1360_v53  ;;  %v2246_v57 = vsel %vm1501_vm3, %v2175_v5, %v1368_v43  ;;  %v2250_v60 = vsel %vm1501_vm3, %v2179_v54, %v1372_v52  ;;  %v1376_v63 = vrot.slane %v1084_v47, %v1935_v21 }
0x1326   :  { %v643_v54 = vunpack.c.h.bf16 %v2196_v7 }
0x1327   :  { %v2255_v61 = vsel %vm1501_vm3, %v2183_v55, %v1376_v63 }
0x138f   :  { %v597_v62 = vpop.permute.xlu0 %596 }
0x1390   :  { %1733 = vmatmul.mubr.msk.bf16.vlgmr.msra.gmra.mrb[12].mxu0 %vm28_vm1, %v597_v62 }
0x1463   :  { %v635_v58 = vpop.f32.mrb[12].mxu0 }
0x1464   :  { %v636_v50 = vadd.f32 %v1883_v6, %v635_v58  ;;  %v1734_v51 = vpop.f32.mrb[13].mxu0  ;;  %v676_v6 = vsel %vm1635_vm4, 1, %v1806_v23 }
0x1465   :  { %v638_v59 = vpop.f32.mrb[14].mxu0 }
0x1466   :  { %652 = vrot.lane.b32.xlu1 %v636_v50, %s1805_s27  ;;  %v1735_v5 = vpop.f32.mrb[15].mxu0  ;;  %v644_v1 = vadd.f32 %v643_v54, %v636_v50 }
0x1468   :  { %v1634_v8 = vmul.f32 -1.442695, %v644_v1 }
0x146a   :  { %1790 = vpow2.f32 %v1634_v8 }
0x1474   :  { %v1791_v9 = vpop.eup %1790 }
0x1475   :  { %v648_v0 = vadd.f32 1.0, %v1791_v9 }
0x1477   :  { %1792 = vrcp.f32 %v648_v0 }
0x1481   :  { %v1793_v55 = vpop.eup %1792 }
0x14d8   :  { %v653_v2 = vpop.permute.xlu1 %652 }
0x14d9   :  { %v655_v10 = vmul.f32 %v1793_v55, %v653_v2  ;;  %v765_v2 = vsel %vm1639_vm7, 1, %v1806_v23 }
0x14db   :  { %657 = vrot.lane.b32.xlu0 %v655_v10, %s1805_s27 }
0x14df   :  { %678 = vperm.xlu0 %1751, %v676_v6  }
0x154d   :  { %v658_v11 = vpop.permute.xlu0 %657 }
0x154e   :  { %v660_v12 = vadd.f32 %v658_v11, %v643_v54 }
0x1550   :  { %1794 = vtanh.f32 %v660_v12 }
0x155a   :  { %v1795_v7 = vpop.eup %1794 }
0x155b   :  { %v662_v13 = vsub.f32 %v2206_v26, %v1795_v7 }
0x155d   :  { %664 = vrot.lane.b32.xlu1 %v662_v13, %s1808_s10 }
0x155e   :  { %v679_v44 = vpop.permute.xlu0 %678 }
0x155f   :  { %vm680_vm5 = vcmp.eq.s32.totalorder %v679_v44, 1 }
0x15cf   :  { %v665_v15 = vpop.permute.xlu1 %664 }
0x15d0   :  { %v667_v16 = vmul.f32 %v1793_v55, %v665_v15 }
0x15d2   :  { %669 = vrot.lane.b32.xlu1 %v667_v16, %s1807_s8 }
0x1644   :  { %v670_v17 = vpop.permute.xlu1 %669 }
0x1645   :  { %v672_v3 = vadd.f32 %v1795_v7, %v670_v17 }
0x1647   :  { %v681_v18 = vsel %vm680_vm5, %v672_v3, 0.0  ;;  %v2268_v19 = vsel %vm680_vm5, %v672_v3, %v2206_v26 }
0x1648   :  { %v1086_v20 = vcombine.high %v681_v18, %v681_v18  ;;  %v1093_v22 = vrot.slane %v681_v18, %v1924_v4  ;;  %v683_v25 = vpack.c.bf16 %v2268_v19, %v2268_v19 }
0x164a   :  { %v1100_v28 = vrot.slane %v1086_v20, %v1924_v4  ;;  %v1101_v31 = vcombine.high %v1093_v22, %v1093_v22  ;;  %v1109_v32 = vrot.slane %v1093_v22, %v1924_v4  ;;  %685 = vrot.lane.b32.xlu0 %v683_v25, %s1805_s27 }
0x164c   :  { %v1102_v33 = vcombine.high %v1100_v28, %v1100_v28  ;;  %v1116_v34 = vrot.slane %v1100_v28, %v1924_v4  ;;  %v1123_v26 = vrot.slane %v1101_v31, %v1924_v4  ;;  %v1131_v35 = vcombine.high %v1109_v32, %v1109_v32 }
0x164d   :  { %v1388_v14 = vrot.slane %v1109_v32, %v1935_v21 }
0x164e   :  { %v1130_v36 = vrot.slane %v1102_v33, %v1924_v4  ;;  %v1132_v30 = vcombine.high %v1116_v34, %v1116_v34  ;;  %v1133_v27 = vcombine.high %v1123_v26, %v1123_v26  ;;  %v1392_v29 = vrot.slane %v1123_v26, %v1935_v21 }
0x164f   :  { %v1396_v37 = vrot.slane %v1131_v35, %v1935_v21  ;;  %v1404_v38 = vrot.slane %v1116_v34, %v1935_v21  ;;  %v2285_v39 = vsel %vm1510_vm6, %v2223_v45, %v1388_v14 }
0x1650   :  { %v1134_v40 = vcombine.high %v1130_v36, %v1130_v36  ;;  %v2289_v41 = vsel %vm1510_vm6, %v2230_v46, %v1392_v29  ;;  %v1400_v42 = vrot.slane %v1133_v27, %v1935_v21  ;;  %v1408_v47 = vrot.slane %v1130_v36, %v1935_v21 }
0x1651   :  { %v2295_v53 = vsel %vm1510_vm6, %v2234_v48, %v1396_v37  ;;  %v2299_v43 = vsel %vm1510_vm6, %v2238_v56, %v1404_v38  ;;  %v1412_v45 = vrot.slane %v1132_v30, %v1935_v21 }
0x1652   :  { %v2304_v52 = vsel %vm1510_vm6, %v2242_v49, %v1400_v42  ;;  %v2308_v46 = vsel %vm1510_vm6, %v2246_v57, %v1408_v47  ;;  %v1416_v63 = vrot.slane %v1134_v40, %v1935_v21  ;;  %v1802_v49 = vld [vmem:[%s2412_s4] ss:$0 sm:$0xff] }
0x1653   :  { %v2313_v48 = vsel %vm1510_vm6, %v2250_v60, %v1412_v45  ;;  %v1637_v60 = vld [vmem:[%s2413_s0 + $0x1c] sm:$0xf] }
0x1654   :  { %v2317_v56 = vsel %vm1510_vm6, %v2255_v61, %v1416_v63  ;;  %v732_v61 = vunpack.c.l.bf16 %v1637_v60 }
0x16bc   :  { %v686_v62 = vpop.permute.xlu0 %685 }
0x16bd   :  { %1741 = vmatmul.mubr.msk.bf16.vlgmr.msra.gmra.mrb[12].mxu1 %vm28_vm1, %v686_v62 }
0x1790   :  { %v724_v58 = vpop.f32.mrb[12].mxu1 }
0x1791   :  { %v725_v57 = vadd.f32 %v1802_v49, %v724_v58  ;;  %v1742_v50 = vpop.f32.mrb[13].mxu1 }
0x1792   :  { %v727_v51 = vpop.f32.mrb[14].mxu1 }
0x1793   :  { %741 = vrot.lane.b32.xlu1 %v725_v57, %s1805_s27  ;;  %v1743_v59 = vpop.f32.mrb[15].mxu1  ;;  %v733_v5 = vadd.f32 %v732_v61, %v725_v57 }
0x1795   :  { %v1638_v54 = vmul.f32 -1.442695, %v733_v5 }
0x1797   :  { %1796 = vpow2.f32 %v1638_v54 }
0x17a1   :  { %v1797_v1 = vpop.eup %1796 }
0x17a2   :  { %v737_v8 = vadd.f32 1.0, %v1797_v1 }
0x17a4   :  { %1798 = vrcp.f32 %v737_v8 }
0x17ae   :  { %v1799_v9 = vpop.eup %1798 }
0x1805   :  { %v742_v0 = vpop.permute.xlu1 %741 }
0x1806   :  { %v744_v55 = vmul.f32 %v1799_v9, %v742_v0 }
0x1808   :  { %746 = vrot.lane.b32.xlu0 %v744_v55, %s1805_s27 }
0x180c   :  { %767 = vperm.xlu0 %1751, %v765_v2  }
0x187a   :  { %v747_v10 = vpop.permute.xlu0 %746 }
0x187b   :  { %v749_v6 = vadd.f32 %v747_v10, %v732_v61 }
0x187d   :  { %1800 = vtanh.f32 %v749_v6 }
0x1887   :  { %v1801_v11 = vpop.eup %1800 }
0x1888   :  { %v751_v12 = vsub.f32 %v2268_v19, %v1801_v11 }
0x188a   :  { %753 = vrot.lane.b32.xlu1 %v751_v12, %s1808_s10 }
0x188b   :  { %v768_v15 = vpop.permute.xlu0 %767 }
0x188c   :  { %vm769_vm8 = vcmp.eq.s32.totalorder %v768_v15, 1 }
0x18fc   :  { %v754_v7 = vpop.permute.xlu1 %753 }
0x18fd   :  { %v756_v13 = vmul.f32 %v1799_v9, %v754_v7 }
0x18ff   :  { %758 = vrot.lane.b32.xlu1 %v756_v13, %s1807_s8 }
0x1971   :  { %v759_v16 = vpop.permute.xlu1 %758 }
0x1972   :  { %v761_v24 = vadd.f32 %v1801_v11, %v759_v16 }
0x1974   :  { %v770_v44 = vsel %vm769_vm8, %v761_v24, 0.0  ;;  %v771_v23 = vsel %vm769_vm8, %v761_v24, %v2268_v19 }
0x1975   :  { %v1136_v17 = vcombine.high %v770_v44, %v770_v44  ;;  %v1143_v3 = vrot.slane %v770_v44, %v1924_v4  ;;  %773 = vrot.lane.b32.xlu0 %v771_v23, %s1805_s27 }
0x1977   :  { %v1150_v18 = vrot.slane %v1136_v17, %v1924_v4  ;;  %v1151_v20 = vcombine.high %v1143_v3, %v1143_v3  ;;  %v1159_v22 = vrot.slane %v1143_v3, %v1924_v4 }
0x1979   :  { %v1152_v25 = vcombine.high %v1150_v18, %v1150_v18  ;;  %v1173_v28 = vrot.slane %v1151_v20, %v1924_v4  ;;  %v1181_v31 = vcombine.high %v1159_v22, %v1159_v22  ;;  %v1166_v32 = vrot.slane %v1150_v18, %v1924_v4 }
0x197a   :  { %v1428_v33 = vrot.slane %v1159_v22, %v1935_v21 }
0x197b   :  { %v1180_v19 = vrot.slane %v1152_v25, %v1924_v4  ;;  %v1183_v34 = vcombine.high %v1173_v28, %v1173_v28  ;;  %v1432_v26 = vrot.slane %v1173_v28, %v1935_v21  ;;  %v1436_v14 = vrot.slane %v1181_v31, %v1935_v21 }
0x197c   :  { %v1520_v35 = vsel %vm1519_vm9, %v2285_v39, %v1428_v33  ;;  %v1182_v29 = vcombine.high %v1166_v32, %v1166_v32  ;;  %v1444_v4 = vrot.slane %v1166_v32, %v1935_v21 }
0x197d   :  { %v1648_v36 = vpack.c.bf16 %v1520_v35, %v1520_v35  ;;  %v1521_v30 = vsel %vm1519_vm9, %v2289_v41, %v1432_v26  ;;  %v1440_v27 = vrot.slane %v1183_v34, %v1935_v21  ;;  %v1522_v38 = vsel %vm1519_vm9, %v2295_v53, %v1436_v14 }
0x197e   :  { %v1649_v37 = vpack.c.bf16 %v1521_v30, %v1521_v30  ;;  %v1448_v40 = vrot.slane %v1180_v19, %v1935_v21  ;;  %v1184_v42 = vcombine.high %v1180_v19, %v1180_v19  ;;  %v1650_v41 = vpack.c.bf16 %v1522_v38, %v1522_v38 }
0x197f   :  { %1560 = vrot.lane.b32.xlu1 %v1648_v36, %s1805_s27  ;;  %v1523_v39 = vsel %vm1519_vm9, %v2304_v52, %v1440_v27  ;;  %v1524_v45 = vsel %vm1519_vm9, %v2299_v43, %v1444_v4  ;;  %v1452_v63 = vrot.slane %v1182_v29, %v1935_v21 }
0x1980   :  { %1562 = vrot.lane.b32.xlu0 %v1649_v37, %s1805_s27  ;;  %v1651_v47 = vpack.c.bf16 %v1523_v39, %v1523_v39  ;;  %v1525_v53 = vsel %vm1519_vm9, %v2308_v46, %v1448_v40  ;;  %v1456_v62 = vrot.slane %v1184_v42, %v1935_v21  ;;  %v1652_v52 = vpack.c.bf16 %v1524_v45, %v1524_v45 }
0x1981   :  { %v1653_v58 = vpack.c.bf16 %v1525_v53, %v1525_v53  ;;  %v1526_v49 = vsel %vm1519_vm9, %v2313_v48, %v1452_v63 }
0x1982   :  { %v1527_v43 = vsel %vm1519_vm9, %v2317_v56, %v1456_v62  ;;  %v1654_v57 = vpack.c.bf16 %v1526_v49, %v1526_v49 }
0x1983   :  { %1564 = vrot.lane.b32.xlu1 %v1650_v41, %s1805_s27  ;;  %v1655_v50 = vpack.c.bf16 %v1527_v43, %v1527_v43 }
0x1984   :  { %1566 = vrot.lane.b32.xlu0 %v1651_v47, %s1805_s27 }
0x1987   :  { %1568 = vrot.lane.b32.xlu1 %v1652_v52, %s1805_s27 }
0x1988   :  { %1570 = vrot.lane.b32.xlu0 %v1653_v58, %s1805_s27 }
0x198b   :  { %1572 = vrot.lane.b32.xlu1 %v1654_v57, %s1805_s27 }
0x198c   :  { %1574 = vrot.lane.b32.xlu0 %v1655_v50, %s1805_s27 }
0x19e7   :  { %v774_v21 = vpop.permute.xlu0 %773 }
0x19e8   :  { %776 = vst.msk [vmem:[#allocation2] sm:$0xff] %vm28_vm1, %v774_v21 }
0x19ef   :  { %v1596_v46 = vld [vmem:[#allocation2] sm:$0xff] }
0x19f0   :  { %1597 = vst.msk [vmem:[%s2415_s6] sm:$0xff] %vm28_vm1, %v1596_v46 }
0x19f1   :  { %v1561_v48 = vpop.permute.xlu1 %1560 }
0x19f2   :  { %1585 = vst.msk [vmem:[%s2416_s5] sm:$0xf] %vm1584_vm10, %v1561_v48  ;;  %v1563_v56 = vpop.permute.xlu0 %1562 }
0x19f3   :  { %1586 = vst.msk [vmem:[%s2416_s5 + $0x4] sm:$0xf] %vm1584_vm10, %v1563_v56 }
0x19f5   :  { %v1565_v51 = vpop.permute.xlu1 %1564 }
0x19f6   :  { %1587 = vst.msk [vmem:[%s2416_s5 + $0x8] sm:$0xf] %vm1584_vm10, %v1565_v51  ;;  %v1567_v59 = vpop.permute.xlu0 %1566 }
0x19f7   :  { %1588 = vst.msk [vmem:[%s2416_s5 + $0xc] sm:$0xf] %vm1584_vm10, %v1567_v59 }
0x19f9   :  { %v1569_v60 = vpop.permute.xlu1 %1568 }
0x19fa   :  { %1589 = vst.msk [vmem:[%s2416_s5 + $0x10] sm:$0xf] %vm1584_vm10, %v1569_v60  ;;  %v1571_v61 = vpop.permute.xlu0 %1570 }
0x19fb   :  { %1590 = vst.msk [vmem:[%s2416_s5 + $0x14] sm:$0xf] %vm1584_vm10, %v1571_v61 }
0x19fd   :  { %v1573_v5 = vpop.permute.xlu1 %1572 }
0x19fe   :  { %1591 = vst.msk [vmem:[%s2416_s5 + $0x18] sm:$0xf] %vm1584_vm10, %v1573_v5  ;;  %v1575_v54 = vpop.permute.xlu0 %1574 }
0x19ff   :  { %1592 = vst.msk [vmem:[%s2416_s5 + $0x1c] sm:$0xf] %vm1584_vm10, %v1575_v54 }

// kernel: attention_gru_forward.11
= control target key start
LH: loop header
LB: loop body
LE: loop exit
PB: predicated region body
PF: predicated region fallthrough
CT: control target
= control target key end

     0   :  { %vm75_vm0 = vcmask 261120   ;;  %v1825_v14 = vmov 0.0   ;;  %vm1826_vm1 = vmmov 0   ;;  %v669_v21 = vlaneseq  ;;  %s2209_s4 = inlined_call_operand.vmem [shape: bf16[32,32], index: 4, kind: input, shape index: {}]   ;;  %s2210_s1 = inlined_call_operand.vmem [shape: bf16[8,8,32], index: 1, kind: input, shape index: {}]   ;;  %s2211_s6 = inlined_call_operand.vmem [shape: bf16[32,32], index: 6, kind: input, shape index: {}]   ;;  %s2212_s0 = inlined_call_operand.vmem [shape: bf16[8,8,32], index: 0, kind: input, shape index: {}]   ;;  %s2213_s3 = inlined_call_operand.vmem [shape: s32[8,1], index: 3, kind: input, shape index: {}]   ;;  %s2214_s2 = inlined_call_operand.vmem [shape: s32[8,1], index: 2, kind: input, shape index: {}]   ;;  %s2215_s5 = inlined_call_operand.vmem [shape: bf16[32,32], index: 5, kind: input, shape index: {}]   ;;  %s2216_s7 = inlined_call_operand.vmem [shape: bf16[8,8,32], index: 7, kind: output, shape index: {}]  }
   0x1   :  { %v1761_v0 = vld [vmem:[%s2209_s4] sm:$0xff]   ;;  %v1762_v1 = vld [vmem:[%s2209_s4 + $0x8] sm:$0xff]   ;;  %v1765_v5 = vld [vmem:[%s2210_s1 + $0x10] sm:$0xff]   ;;  %v1827_v22 = vmov 0   ;;  %v1828_v23 = vmov 1966171168  }
   0x2   :  { %1611 = vmatprep.subr.bf16.mxu0 %v1761_v0  ;;  %v1763_v2 = vld [vmem:[%s2210_s1] sm:$0xff]   ;;  %v1764_v3 = vld [vmem:[%s2210_s1 + $0x8] sm:$0xff]   ;;  %v1766_v6 = vld [vmem:[%s2210_s1 + $0x18] sm:$0xff]   ;;  %1759 = vset.pattern.permute.xlu0 %v1827_v22  ;;  %v678_v24 = vunpack.c.l.s4 %v1828_v23  ;;  %v1956_v25 = vshrl.u32 %v669_v21, 7  ;;  %vm161_vm2 = vcmask 257024   ;;  %vm919_vm7 = vcmask 64512  }
   0x3   :  { %1612 = vmatpush3.bf16.msra.mxu0 %v1761_v0  ;;  %1615 = vmatprep.mubr.msk.bf16.mxu0 %vm75_vm0, %v1763_v2  ;;  %v1767_v4 = vld [vmem:[%s2211_s6] sm:$0xff]   ;;  %v1768_v7 = vld [vmem:[%s2211_s6 + $0x8] sm:$0xff]   ;;  %v1925_v15 = vld [vmem:[%s2212_s0 + $0x10] sm:$0xf] }
   0x4   :  { %1613 = vmatprep.subr.bf16.mxu0 %v1762_v1  ;;  %1743 = vmatprep.subr.bf16.mxu1 %v1767_v4  ;;  %v1900_v8 = vld [vmem:[%s2212_s0] sm:$0xf]  ;;  %v1905_v9 = vld [vmem:[%s2212_s0 + $0x4] sm:$0xf]  ;;  %v1912_v11 = vld [vmem:[%s2212_s0 + $0x8] sm:$0xf]  ;;  %v679_v26 = vunpack.c.0.s8 %v678_v24 }
   0x5   :  { %1745 = vmatpush3.bf16.msra.mxu1 %v1767_v4  ;;  %v1529_v10 = vcombine.low %v1900_v8, %v1905_v9  ;;  %v1917_v12 = vld [vmem:[%s2212_s0 + $0xc] sm:$0xf]  ;;  %v1930_v16 = vld [vmem:[%s2212_s0 + $0x14] sm:$0xf]  ;;  %v1941_v18 = vld [vmem:[%s2212_s0 + $0x18] sm:$0xf]  ;;  %1760 = vset.pattern.permute.xlu1 %v1827_v22 }
   0x6   :  { %1744 = vmatprep.subr.bf16.mxu1 %v1768_v7  ;;  %v1530_v13 = vcombine.low %v1912_v11, %v1917_v12  ;;  %v1531_v17 = vcombine.low %v1925_v15, %v1930_v16  ;;  %v1946_v19 = vld [vmem:[%s2212_s0 + $0x1c] sm:$0xf]  ;;  %v675_v27 = vld [vmem:[%s2213_s3] sm:$0xff]  ;;  %v682_v29 = vsub.s32 %v679_v26, %v1956_v25  ;;  %v777_v31 = vsub.s32 0, %v1956_v25 }
   0x7   :  { %1614 = vmatpush3.bf16.msra.mxu0 %v1762_v1  ;;  %v1532_v20 = vcombine.low %v1941_v18, %v1946_v19  ;;  %v725_v28 = vld [vmem:[%s2214_s2] sm:$0xff]  ;;  %v676_v37 = vcombine.high %v675_v27, %v675_v27 }
   0x8   :  { %1623 = vmatprep.subr.bf16.mxu0 %v1767_v4  ;;  %1631 = vmatprep.mubr.msk.bf16.mxu1 %vm75_vm0, %v1531_v17  ;;  %v683_v30 = vrot.slane %v675_v27, %v682_v29  ;;  %v733_v32 = vrot.slane %v725_v28, %v682_v29  ;;  %v726_v45 = vcombine.high %v725_v28, %v725_v28 }
   0x9   :  { %1746 = vmatpush3.bf16.msra.mxu1 %v1768_v7  ;;  %v690_v47 = vrot.slane %v676_v37, %v682_v29 }
   0xa   :  { %1616 = vmatmul.mubr.msk.bf16.vlgmr.msra.gmra.mrb[0].mxu0 %vm75_vm0, %v1764_v3  ;;  %1641 = vmatprep.subr.bf16.mxu1 %v1825_v14  ;;  %v699_v33 = vrot.slane %v683_v30, %v682_v29  ;;  %v691_v34 = vcombine.high %v683_v30, %v683_v30  ;;  %v749_v35 = vrot.slane %v733_v32, %v682_v29 }
   0xb   :  { %1619 = vmatprep.mubr.msk.bf16.mxu0 %vm75_vm0, %v1765_v5  ;;  %1624 = vmatpush3.bf16.msra.mxu0 %v1767_v4  ;;  %v741_v36 = vcombine.high %v733_v32, %v733_v32  ;;  %v692_v49 = vcombine.high %v690_v47, %v690_v47  ;;  %v740_v53 = vrot.slane %v726_v45, %v682_v29 }
   0xc   :  { %1625 = vmatprep.subr.bf16.mxu0 %v1768_v7  ;;  %1632 = vmatmul.mubr.msk.bf16.vlgmr.msra.gmra.mrb[0].mxu1 %vm75_vm0, %v1532_v20  ;;  %v778_v38 = vrot.slane %v699_v33, %v777_v31  ;;  %v713_v39 = vrot.slane %v691_v34, %v682_v29  ;;  %v842_v40 = vrot.slane %v749_v35, %v777_v31 }
   0xd   :  { %1643 = vmatprep.mubr.msk.bf16.mxu1 %vm1826_vm1, %v1825_v14  ;;  %v763_v41 = vrot.slane %v741_v36, %v682_v29  ;;  %v721_v42 = vcombine.high %v699_v33, %v699_v33  ;;  %v771_v48 = vcombine.high %v749_v35, %v749_v35  ;;  %v706_v54 = vrot.slane %v690_v47, %v682_v29 }
   0xe   :  { %808 = vperm.xlu0 %1759, %v778_v38   ;;  %v782_v43 = vrot.slane %v713_v39, %v777_v31  ;;  %872 = vperm.xlu1 %1760, %v842_v40   ;;  %v723_v44 = vcombine.high %v713_v39, %v713_v39  ;;  %v742_v55 = vcombine.high %v740_v53, %v740_v53 }
   0xf   :  { %1626 = vmatpush3.bf16.msra.mxu0 %v1768_v7  ;;  %v846_v46 = vrot.slane %v763_v41, %v777_v31  ;;  %v786_v50 = vrot.slane %v721_v42, %v777_v31  ;;  %v773_v52 = vcombine.high %v763_v41, %v763_v41  ;;  %v850_v56 = vrot.slane %v771_v48, %v777_v31 }
  0x10   :  { %1635 = vmatprep.subr.bf16.mxu0 %v1825_v14  ;;  %v790_v51 = vrot.slane %v723_v44, %v777_v31  ;;  %v720_v58 = vrot.slane %v692_v49, %v682_v29  ;;  %v756_v59 = vrot.slane %v740_v53, %v682_v29  ;;  %v794_v60 = vrot.slane %v706_v54, %v777_v31 }
  0x11   :  { %v854_v57 = vrot.slane %v773_v52, %v777_v31  ;;  %v770_v62 = vrot.slane %v742_v55, %v682_v29  ;;  %v722_v0 = vcombine.high %v706_v54, %v706_v54 }
  0x12   :  { %1620 = vmatmul.mubr.msk.bf16.gmra.mrb[4].mxu0 %vm75_vm0, %v1766_v6  ;;  %811 = vperm.xlu0 %1759, %v782_v43   ;;  %v798_v61 = vrot.slane %v720_v58, %v777_v31  ;;  %v858_v63 = vrot.slane %v756_v59, %v777_v31  ;;  %v724_v2 = vcombine.high %v720_v58, %v720_v58 }
  0x13   :  { %1627 = vmatprep.mubr.msk.bf16.mxu0 %vm75_vm0, %v1529_v10  ;;  %875 = vperm.xlu1 %1760, %v846_v46   ;;  %v862_v1 = vrot.slane %v770_v62, %v777_v31  ;;  %v772_v3 = vcombine.high %v756_v59, %v756_v59  ;;  %v802_v4 = vrot.slane %v722_v0, %v777_v31 }
  0x14   :  { %v806_v5 = vrot.slane %v724_v2, %v777_v31  ;;  %v774_v6 = vcombine.high %v770_v62, %v770_v62 }
  0x15   :  { %v866_v7 = vrot.slane %v772_v3, %v777_v31 }
  0x16   :  { %814 = vperm.xlu0 %1759, %v786_v50   ;;  %v870_v10 = vrot.slane %v774_v6, %v777_v31 }
  0x17   :  { %817 = vperm.xlu1 %1760, %v790_v51  }
  0x1a   :  { %1628 = vmatmul.mubr.msk.bf16.vlgmr.msra.gmra.mrb[8].mxu0 %vm75_vm0, %v1530_v13  ;;  %878 = vperm.xlu0 %1759, %v850_v56  }
  0x1b   :  { %1637 = vmatprep.mubr.msk.bf16.mxu0 %vm1826_vm1, %v1825_v14  ;;  %881 = vperm.xlu1 %1760, %v854_v57  }
  0x1e   :  { %820 = vperm.xlu0 %1759, %v794_v60  }
  0x1f   :  { %823 = vperm.xlu1 %1760, %v798_v61  }
  0x22   :  { %884 = vperm.xlu0 %1759, %v858_v63  }
  0x23   :  { %887 = vperm.xlu1 %1760, %v862_v1  }
  0x26   :  { %826 = vperm.xlu0 %1759, %v802_v4  }
  0x27   :  { %829 = vperm.xlu1 %1760, %v806_v5  }
  0x2a   :  { %890 = vperm.xlu0 %1759, %v866_v7  }
  0x2b   :  { %893 = vperm.xlu1 %1760, %v870_v10  }
  0x8d   :  { %v809_v50 = vpop.permute.xlu0 %808  ;;  %v873_v51 = vpop.permute.xlu1 %872 }
  0x8e   :  { %vm831_vm3 = vcmp.lt.s32.totalorder %v1956_v25, %v809_v50 }
  0x92   :  { %v876_v52 = vpop.permute.xlu1 %875 }
  0x96   :  { %v818_v54 = vpop.permute.xlu1 %817 }
  0x97   :  { %vm834_vm12 = vcmp.lt.s32.totalorder %v1956_v25, %v818_v54 }
  0x9a   :  { %v882_v56 = vpop.permute.xlu1 %881 }
  0x9e   :  { %v824_v58 = vpop.permute.xlu1 %823 }
  0xa2   :  { %v888_v7 = vpop.permute.xlu1 %887 }
  0xdd   :  { %v1617_v13 = vpop.f32.mrb[0].mxu0 }
  0xde   :  { %v155_v17 = vpack.c.bf16 %v1617_v13, %v1617_v13  ;;  %v122_v20 = vpop.f32.mrb[1].mxu0 }
  0xdf   :  { %v153_v22 = vpack.c.bf16 %v122_v20, %v122_v20  ;;  %v1618_v23 = vpop.f32.mrb[2].mxu0 }
  0xe0   :  { %164 = vst.msk [vmem:[#allocation2 + $0x8] sm:$0xf] %vm161_vm2, %v155_v17  ;;  %v156_v24 = vpack.c.bf16 %v1618_v23, %v1618_v23  ;;  %v125_v26 = vpop.f32.mrb[3].mxu0 }
  0xe1   :  { %162 = vst.msk [vmem:[#allocation2] sm:$0xf] %vm161_vm2, %v153_v22  ;;  %v154_v27 = vpack.c.bf16 %v125_v26, %v125_v26 }
  0xe2   :  { %165 = vst.msk [vmem:[#allocation2 + $0xc] sm:$0xf] %vm161_vm2, %v156_v24 }
  0xe3   :  { %163 = vst.msk [vmem:[#allocation2 + $0x4] sm:$0xf] %vm161_vm2, %v154_v27 }
  0xe5   :  { %v1621_v28 = vpop.f32.mrb[4].mxu0 }
  0xe6   :  { %v159_v29 = vpack.c.bf16 %v1621_v28, %v1621_v28  ;;  %v138_v30 = vpop.f32.mrb[5].mxu0 }
  0xe7   :  { %v157_v31 = vpack.c.bf16 %v138_v30, %v138_v30  ;;  %v1622_v32 = vpop.f32.mrb[6].mxu0  ;;  %v294_v40 = vld [vmem:[#allocation2 + $0x8] sm:$0xf] }
  0xe8   :  { %v292_v33 = vld [vmem:[#allocation2] sm:$0xf]  ;;  %168 = vst.msk [vmem:[#allocation2 + $0x18] sm:$0xf] %vm161_vm2, %v159_v29  ;;  %v160_v34 = vpack.c.bf16 %v1622_v32, %v1622_v32  ;;  %v141_v35 = vpop.f32.mrb[7].mxu0  ;;  %v396_v42 = vsel %vm75_vm0, %v294_v40, 0 }
  0xe9   :  { %v304_v36 = vsel %vm75_vm0, %v292_v33, 0  ;;  %166 = vst.msk [vmem:[#allocation2 + $0x10] sm:$0xf] %vm161_vm2, %v157_v31  ;;  %v158_v37 = vpack.c.bf16 %v141_v35, %v141_v35  ;;  %v295_v41 = vld [vmem:[#allocation2 + $0xc] sm:$0xf]  ;;  %v830_v31 = vpop.permute.xlu1 %829 }
  0xea   :  { %1636 = vmatpush3.bf16.xpose.msra.mxu0 %v304_v36  ;;  %v293_v38 = vld [vmem:[#allocation2 + $0x4] sm:$0xf]  ;;  %169 = vst.msk [vmem:[#allocation2 + $0x1c] sm:$0xf] %vm161_vm2, %v160_v34  ;;  %v442_v43 = vsel %vm75_vm0, %v295_v41, 0 }
  0xeb   :  { %v350_v39 = vsel %vm75_vm0, %v293_v38, 0  ;;  %167 = vst.msk [vmem:[#allocation2 + $0x14] sm:$0xf] %vm161_vm2, %v158_v37  ;;  %1647 = vmatprep.subr.bf16.mxu0 %v1825_v14 }
  0xec   :  { %1642 = vmatpush3.bf16.xpose.msra.mxu1 %v350_v39 }
  0xed   :  { %1653 = vmatprep.subr.bf16.mxu1 %v1825_v14 }
  0xf0   :  { %v296_v44 = vld [vmem:[#allocation2 + $0x10] sm:$0xf] }
  0xf1   :  { %1638 = vmatmul.mubr.msk.bf16.vlgmr.msra.gmra.mrb[12].mxu0 %vm75_vm0, %v1900_v8  ;;  %v488_v45 = vsel %vm75_vm0, %v296_v44, 0  ;;  %v299_v47 = vld [vmem:[#allocation2 + $0x1c] sm:$0xf] }
  0xf2   :  { %1648 = vmatpush3.bf16.xpose.msra.mxu0 %v396_v42  ;;  %1649 = vmatprep.mubr.msk.bf16.mxu0 %vm1826_vm1, %v1825_v14  ;;  %v297_v8 = vld [vmem:[#allocation2 + $0x14] sm:$0xf] }
  0xf3   :  { %1644 = vmatmul.mubr.msk.bf16.vlgmr.msra.gmra.mrb[4].mxu1 %vm75_vm0, %v1905_v9  ;;  %1659 = vmatprep.subr.bf16.mxu0 %v1825_v14  ;;  %v534_v46 = vsel %vm75_vm0, %v297_v8, 0  ;;  %v298_v9 = vld [vmem:[#allocation2 + $0x18] sm:$0xf] }
  0xf4   :  { %1654 = vmatpush3.bf16.xpose.msra.mxu1 %v442_v43  ;;  %1655 = vmatprep.mubr.msk.bf16.mxu1 %vm1826_vm1, %v1825_v14  ;;  %v894_v43 = vpop.permute.xlu1 %893 }
  0xf5   :  { %1665 = vmatprep.subr.bf16.mxu1 %v1825_v14 }
  0xf9   :  { %1650 = vmatmul.mubr.msk.bf16.vlgmr.msra.gmra.mrb[16].mxu0 %vm75_vm0, %v1912_v11  ;;  %v580_v11 = vsel %vm75_vm0, %v298_v9, 0 }
  0xfa   :  { %1660 = vmatpush3.bf16.xpose.msra.mxu0 %v488_v45  ;;  %1661 = vmatprep.mubr.msk.bf16.mxu0 %vm1826_vm1, %v1825_v14 }
  0xfb   :  { %1656 = vmatmul.mubr.msk.bf16.vlgmr.msra.gmra.mrb[8].mxu1 %vm75_vm0, %v1917_v12  ;;  %1671 = vmatprep.subr.bf16.mxu0 %v1825_v14  ;;  %v626_v12 = vsel %vm75_vm0, %v299_v47, 0 }
  0xfc   :  { %1666 = vmatpush3.bf16.xpose.msra.mxu1 %v534_v46  ;;  %1667 = vmatprep.mubr.msk.bf16.mxu1 %vm1826_vm1, %v1825_v14 }
  0xfd   :  { %1677 = vmatprep.subr.bf16.mxu1 %v1825_v14 }
 0x101   :  { %1662 = vmatmul.mubr.msk.bf16.vlgmr.msra.gmra.mrb[20].mxu0 %vm75_vm0, %v1925_v15  ;;  %v2022_v15 = vpop.f32.mrb[8].mxu0 }
 0x102   :  { %1672 = vmatpush3.bf16.xpose.msra.mxu0 %v580_v11  ;;  %1673 = vmatprep.mubr.msk.bf16.mxu0 %vm1826_vm1, %v1825_v14 }
 0x103   :  { %1668 = vmatmul.mubr.msk.bf16.vlgmr.msra.gmra.mrb[12].mxu1 %vm75_vm0, %v1930_v16  ;;  %1683 = vmatprep.subr.bf16.mxu0 %v1825_v14  ;;  %v2024_v16 = vpop.f32.mrb[9].mxu0 }
 0x104   :  { %1678 = vmatpush3.bf16.xpose.msra.mxu1 %v626_v12  ;;  %1679 = vmatprep.mubr.msk.bf16.mxu1 %vm1826_vm1, %v1825_v14  ;;  %v2026_v48 = vpop.f32.mrb[10].mxu0 }
 0x105   :  { %1689 = vmatprep.subr.bf16.mxu1 %v1825_v14  ;;  %v2028_v49 = vpop.f32.mrb[11].mxu0 }
 0x109   :  { %1674 = vmatmul.mubr.msk.bf16.vlgmr.msra.gmra.mrb[24].mxu0 %vm75_vm0, %v1941_v18  ;;  %v812_v18 = vpop.permute.xlu0 %811 }
 0x10a   :  { %1685 = vmatprep.mubr.msk.bf16.mxu0 %vm1826_vm1, %v1825_v14  ;;  %vm832_vm5 = vcmp.lt.s32.totalorder %v1956_v25, %v812_v18 }
 0x10b   :  { %1680 = vmatmul.mubr.msk.bf16.vlgmr.msra.gmra.mrb[16].mxu1 %vm75_vm0, %v1946_v19  ;;  %v2031_v19 = vand.u32 127, %v669_v21 }
 0x10c   :  { %1691 = vmatprep.mubr.msk.bf16.mxu1 %vm1826_vm1, %v1825_v14 }
 0x10d   :  { %v815_v53 = vpop.permute.xlu0 %814  ;;  %vm895_vm4 = vcmp.lt.s32.totalorder %v2031_v19, %v873_v51  ;;  %vm896_vm6 = vcmp.lt.s32.totalorder %v2031_v19, %v876_v52  ;;  %vm898_vm13 = vcmp.lt.s32.totalorder %v2031_v19, %v882_v56 }
 0x10e   :  { %vm903_vm8 = vmand %vm831_vm3, %vm895_vm4  ;;  %vm833_vm10 = vcmp.lt.s32.totalorder %v1956_v25, %v815_v53 }
 0x10f   :  { %vm904_vm9 = vmand %vm832_vm5, %vm896_vm6  ;;  %vm836_vm5 = vcmp.lt.s32.totalorder %v1956_v25, %v824_v58  ;;  %vm900_vm6 = vcmp.lt.s32.totalorder %v2031_v19, %v888_v7 }
 0x110   :  { %vm906_vm15 = vmand %vm834_vm12, %vm898_vm13  ;;  %vm838_vm12 = vcmp.lt.s32.totalorder %v1956_v25, %v830_v31  ;;  %vm902_vm13 = vcmp.lt.s32.totalorder %v2031_v19, %v894_v43 }
 0x111   :  { %v879_v55 = vpop.permute.xlu0 %878 }
 0x112   :  { %vm897_vm11 = vcmp.lt.s32.totalorder %v2031_v19, %v879_v55 }
 0x113   :  { %vm905_vm14 = vmand %vm833_vm10, %vm897_vm11 }
 0x115   :  { %v821_v57 = vpop.permute.xlu0 %820 }
 0x116   :  { %vm835_vm3 = vcmp.lt.s32.totalorder %v1956_v25, %v821_v57 }
 0x119   :  { %v885_v60 = vpop.permute.xlu0 %884 }
 0x11a   :  { %vm899_vm4 = vcmp.lt.s32.totalorder %v2031_v19, %v885_v60 }
 0x11d   :  { %v827_v13 = vpop.permute.xlu0 %826 }
 0x11e   :  { %vm837_vm10 = vcmp.lt.s32.totalorder %v1956_v25, %v827_v13 }
 0x121   :  { %v891_v34 = vpop.permute.xlu0 %890 }
 0x122   :  { %vm901_vm11 = vcmp.lt.s32.totalorder %v2031_v19, %v891_v34 }
 0x1c4   :  { %v340_v59 = vpop.f32.mrb[12].mxu0 }
 0x1c5   :  { %v2037_v61 = vsel %vm903_vm8, %v340_v59, -1000000.0  ;;  %v1639_v62 = vpop.f32.mrb[13].mxu0  ;;  %vm907_vm8 = vmand %vm835_vm3, %vm899_vm4  ;;  %vm1027_vm3 = vcmask 1043456  }
 0x1c6   :  { %v343_v21 = vpop.f32.mrb[14].mxu0  ;;  %v386_v63 = vpop.f32.mrb[4].mxu1  ;;  %v920_v0 = vsel %vm919_vm7, %v2037_v61, -inf }
 0x1c7   :  { %v2041_v1 = vsel %vm904_vm9, %v386_v63, -1000000.0  ;;  %v1645_v2 = vpop.f32.mrb[5].mxu1  ;;  %921 = vmax.xlane.f32.xlu0 %v920_v0  ;;  %v1640_v3 = vpop.f32.mrb[15].mxu0  ;;  %vm908_vm9 = vmand %vm836_vm5, %vm900_vm6 }
 0x1c8   :  { %v389_v4 = vpop.f32.mrb[6].mxu1  ;;  %v923_v5 = vsel %vm919_vm7, %v2041_v1, -inf }
 0x1c9   :  { %924 = vmax.xlane.f32.xlu1 %v923_v5  ;;  %v1646_v6 = vpop.f32.mrb[7].mxu1 }
 0x1cc   :  { %v432_v10 = vpop.f32.mrb[16].mxu0 }
 0x1cd   :  { %v2049_v17 = vsel %vm905_vm14, %v432_v10, -1000000.0  ;;  %v1651_v20 = vpop.f32.mrb[17].mxu0  ;;  %vm909_vm14 = vmand %vm837_vm10, %vm901_vm11 }
 0x1ce   :  { %v435_v22 = vpop.f32.mrb[18].mxu0  ;;  %v478_v23 = vpop.f32.mrb[8].mxu1  ;;  %v926_v24 = vsel %vm919_vm7, %v2049_v17, -inf }
 0x1cf   :  { %v2053_v26 = vsel %vm906_vm15, %v478_v23, -1000000.0  ;;  %v1657_v27 = vpop.f32.mrb[9].mxu1  ;;  %927 = vmax.xlane.f32.xlu0 %v926_v24  ;;  %v1652_v28 = vpop.f32.mrb[19].mxu0  ;;  %vm910_vm15 = vmand %vm838_vm12, %vm902_vm13 }
 0x1d0   :  { %v481_v29 = vpop.f32.mrb[10].mxu1  ;;  %v929_v32 = vsel %vm919_vm7, %v2053_v26, -inf }
 0x1d1   :  { %v1658_v30 = vpop.f32.mrb[11].mxu1 }
 0x1d3   :  { %930 = vmax.xlane.f32.xlu0 %v929_v32 }
 0x1d4   :  { %v524_v33 = vpop.f32.mrb[20].mxu0 }
 0x1d5   :  { %v915_v35 = vsel %vm907_vm8, %v524_v33, -1000000.0  ;;  %v1663_v36 = vpop.f32.mrb[21].mxu0 }
 0x1d6   :  { %v570_v37 = vpop.f32.mrb[12].mxu1  ;;  %v932_v38 = vsel %vm919_vm7, %v915_v35, -inf  ;;  %v527_v39 = vpop.f32.mrb[22].mxu0 }
 0x1d7   :  { %v916_v40 = vsel %vm908_vm9, %v570_v37, -1000000.0  ;;  %v1669_v41 = vpop.f32.mrb[13].mxu1  ;;  %933 = vmax.xlane.f32.xlu1 %v932_v38  ;;  %v1664_v42 = vpop.f32.mrb[23].mxu0  ;;  %v1016_v39 = vld [vmem:[%s2210_s1] sm:$0xf] }
 0x1d8   :  { %v573_v44 = vpop.f32.mrb[14].mxu1  ;;  %v935_v8 = vsel %vm919_vm7, %v916_v40, -inf  ;;  %v1029_v41 = vsel %vm1027_vm3, %v1016_v39, 0  ;;  %v1017_v42 = vld [vmem:[%s2210_s1 + $0x4] sm:$0xf] }
 0x1d9   :  { %v1670_v45 = vpop.f32.mrb[15].mxu1  ;;  %936 = vmax.xlane.f32.xlu0 %v935_v8  ;;  %1684 = vmatpush3.bf16.msra.mxu0 %v1029_v41  ;;  %v1075_v43 = vsel %vm1027_vm3, %v1017_v42, 0 }
 0x1da   :  { %1695 = vmatprep.subr.bf16.mxu0 %v1825_v14  ;;  %1690 = vmatpush3.bf16.msra.mxu1 %v1075_v43 }
 0x1db   :  { %1701 = vmatprep.subr.bf16.mxu1 %v1825_v14 }
 0x1dc   :  { %v616_v46 = vpop.f32.mrb[24].mxu0 }
 0x1dd   :  { %v917_v9 = vsel %vm909_vm14, %v616_v46, -1000000.0  ;;  %v1675_v47 = vpop.f32.mrb[25].mxu0 }
 0x1de   :  { %v662_v11 = vpop.f32.mrb[16].mxu1  ;;  %v938_v12 = vsel %vm919_vm7, %v917_v9, -inf  ;;  %v619_v50 = vpop.f32.mrb[26].mxu0 }
 0x1df   :  { %v918_v51 = vsel %vm910_vm15, %v662_v11, -1000000.0  ;;  %v1681_v18 = vpop.f32.mrb[17].mxu1  ;;  %939 = vmax.xlane.f32.xlu1 %v938_v12  ;;  %v1676_v52 = vpop.f32.mrb[27].mxu0  ;;  %v1019_v50 = vld [vmem:[%s2210_s1 + $0xc] sm:$0xf] }
 0x1e0   :  { %v665_v53 = vpop.f32.mrb[18].mxu1  ;;  %v941_v54 = vsel %vm919_vm7, %v918_v51, -inf }
 0x1e1   :  { %v1682_v55 = vpop.f32.mrb[19].mxu1  ;;  %942 = vmax.xlane.f32.xlu0 %v941_v54 }
 0x1e2   :  { %v1167_v55 = vsel %vm1027_vm3, %v1019_v50, 0 }
 0x254   :  { %v922_v25 = vpop.xlane.xlu0 %921 }
 0x255   :  { %v944_v19 = vsub.f32 %v2037_v61, %v922_v25 }
 0x256   :  { %v925_v56 = vpop.xlane.xlu1 %924 }
 0x257   :  { %v952_v57 = vmul.f32 1.442695, %v944_v19  ;;  %v945_v58 = vsub.f32 %v2041_v1, %v925_v56  ;;  %v1020_v56 = vld [vmem:[%s2210_s1 + $0x10] sm:$0xf] }
 0x259   :  { %1777 = vpow2.f32 %v952_v57  ;;  %v954_v59 = vmul.f32 1.442695, %v945_v58 }
 0x25b   :  { %1779 = vpow2.f32 %v954_v59  ;;  %v1213_v59 = vsel %vm1027_vm3, %v1020_v56, 0 }
 0x25c   :  { %v928_v60 = vpop.xlane.xlu0 %927 }
 0x25d   :  { %v946_v62 = vsub.f32 %v2049_v17, %v928_v60 }
 0x25f   :  { %v956_v21 = vmul.f32 1.442695, %v946_v62  ;;  %v1021_v62 = vld [vmem:[%s2210_s1 + $0x14] sm:$0xf] }
 0x260   :  { %v931_v63 = vpop.xlane.xlu0 %930 }
 0x261   :  { %1781 = vpow2.f32 %v956_v21  ;;  %v947_v0 = vsub.f32 %v2053_v26, %v931_v63 }
 0x263   :  { %v1778_v2 = vpop.eup %1777  ;;  %v958_v3 = vmul.f32 1.442695, %v947_v0 }
 0x264   :  { %v934_v4 = vpop.xlane.xlu1 %933  ;;  %v968_v61 = vsel %vm919_vm7, %v1778_v2, 0.0 }
 0x265   :  { %v1780_v5 = vpop.eup %1779  ;;  %1783 = vpow2.f32 %v958_v3  ;;  %v948_v6 = vsub.f32 %v915_v35, %v934_v4  ;;  %969 = vadd.xlane.f32.xlu1 %v968_v61  ;;  %v1259_v3 = vsel %vm1027_vm3, %v1021_v62, 0  ;;  %v1022_v61 = vld [vmem:[%s2210_s1 + $0x18] sm:$0xf] }
 0x266   :  { %v937_v1 = vpop.xlane.xlu0 %936  ;;  %v971_v7 = vsel %vm919_vm7, %v1780_v5, 0.0 }
 0x267   :  { %v960_v10 = vmul.f32 1.442695, %v948_v6  ;;  %v949_v13 = vsub.f32 %v916_v40, %v937_v1  ;;  %972 = vadd.xlane.f32.xlu0 %v971_v7 }
 0x269   :  { %1785 = vpow2.f32 %v960_v10  ;;  %v962_v17 = vmul.f32 1.442695, %v949_v13  ;;  %v1305_v10 = vsel %vm1027_vm3, %v1022_v61, 0  ;;  %v1023_v13 = vld [vmem:[%s2210_s1 + $0x1c] sm:$0xf] }
 0x26b   :  { %v2075_v20 = vpop.eup %1781  ;;  %1787 = vpow2.f32 %v962_v17 }
 0x26c   :  { %v940_v22 = vpop.xlane.xlu1 %939  ;;  %v974_v23 = vsel %vm919_vm7, %v2075_v20, 0.0 }
 0x26d   :  { %v950_v24 = vsub.f32 %v917_v9, %v940_v22  ;;  %975 = vadd.xlane.f32.xlu1 %v974_v23  ;;  %v1018_v9 = vld [vmem:[%s2210_s1 + $0x8] sm:$0xf] }
 0x26e   :  { %v943_v26 = vpop.xlane.xlu0 %942  ;;  %v1121_v52 = vsel %vm1027_vm3, %v1018_v9, 0 }
 0x26f   :  { %v2079_v27 = vpop.eup %1783  ;;  %v964_v28 = vmul.f32 1.442695, %v950_v24  ;;  %v951_v29 = vsub.f32 %v918_v51, %v943_v26 }
 0x270   :  { %v977_v30 = vsel %vm919_vm7, %v2079_v27, 0.0 }
 0x271   :  { %1789 = vpow2.f32 %v964_v28  ;;  %v966_v31 = vmul.f32 1.442695, %v951_v29  ;;  %978 = vadd.xlane.f32.xlu0 %v977_v30  ;;  %v1775_v29 = vld [vmem:[%s2215_s5] sm:$0xff]   ;;  %v1776_v30 = vld [vmem:[%s2215_s5 + $0x8] sm:$0xff]  }
 0x273   :  { %v2083_v32 = vpop.eup %1785  ;;  %1791 = vpow2.f32 %v966_v31 }
 0x274   :  { %v980_v33 = vsel %vm919_vm7, %v2083_v32, 0.0 }
 0x275   :  { %v2087_v34 = vpop.eup %1787  ;;  %981 = vadd.xlane.f32.xlu1 %v980_v33 }
 0x276   :  { %v983_v35 = vsel %vm919_vm7, %v2087_v34, 0.0 }
 0x277   :  { %984 = vadd.xlane.f32.xlu0 %v983_v35 }
 0x27b   :  { %v2091_v36 = vpop.eup %1789 }
 0x27c   :  { %v986_v37 = vsel %vm919_vm7, %v2091_v36, 0.0 }
 0x27d   :  { %v2095_v38 = vpop.eup %1791  ;;  %987 = vadd.xlane.f32.xlu1 %v986_v37 }
 0x27e   :  { %v989_v40 = vsel %vm919_vm7, %v2095_v38, 0.0 }
 0x27f   :  { %990 = vadd.xlane.f32.xlu0 %v989_v40 }
 0x2f2   :  { %v970_v44 = vpop.xlane.xlu1 %969 }
 0x2f3   :  { %1793 = vrcp.f32 %v970_v44 }
 0x2f4   :  { %v973_v8 = vpop.xlane.xlu0 %972 }
 0x2f5   :  { %1795 = vrcp.f32 %v973_v8 }
 0x2fa   :  { %v976_v45 = vpop.xlane.xlu1 %975 }
 0x2fb   :  { %1797 = vrcp.f32 %v976_v45 }
 0x2fd   :  { %v1794_v46 = vpop.eup %1793 }
 0x2fe   :  { %v1000_v47 = vmul.f32 %v1794_v46, %v1778_v2  ;;  %v979_v11 = vpop.xlane.xlu0 %978 }
 0x2ff   :  { %v1796_v12 = vpop.eup %1795  ;;  %1799 = vrcp.f32 %v979_v11 }
 0x300   :  { %v1001_v51 = vmul.f32 %v1796_v12, %v1780_v5  ;;  %v1008_v18 = vpack.c.bf16 %v1000_v47, %v1000_v47 }
 0x302   :  { %1686 = vmatmul.mubr.msk.bf16.vlgmr.msra.gmra.mrb[28].mxu0 %vm919_vm7, %v1008_v18  ;;  %v982_v53 = vpop.xlane.xlu1 %981  ;;  %v1009_v54 = vpack.c.bf16 %v1001_v51, %v1001_v51 }
 0x303   :  { %1801 = vrcp.f32 %v982_v53  ;;  %1696 = vmatpush3.bf16.msra.mxu0 %v1121_v52  ;;  %1697 = vmatprep.mubr.msk.bf16.mxu0 %vm1826_vm1, %v1825_v14 }
 0x304   :  { %1692 = vmatmul.mubr.msk.bf16.vlgmr.msra.gmra.mrb[20].mxu1 %vm919_vm7, %v1009_v54  ;;  %v985_v25 = vpop.xlane.xlu0 %984  ;;  %1707 = vmatprep.subr.bf16.mxu0 %v1825_v14 }
 0x305   :  { %v1798_v19 = vpop.eup %1797  ;;  %1803 = vrcp.f32 %v985_v25  ;;  %1702 = vmatpush3.bf16.msra.mxu1 %v1167_v55  ;;  %1703 = vmatprep.mubr.msk.bf16.mxu1 %vm1826_vm1, %v1825_v14 }
 0x306   :  { %v1002_v57 = vmul.f32 %v1798_v19, %v2075_v20  ;;  %1713 = vmatprep.subr.bf16.mxu1 %v1825_v14  ;;  %v1351_v20 = vsel %vm1027_vm3, %v1023_v13, 0 }
 0x308   :  { %v1010_v58 = vpack.c.bf16 %v1002_v57, %v1002_v57 }
 0x309   :  { %v1800_v60 = vpop.eup %1799 }
 0x30a   :  { %v1003_v21 = vmul.f32 %v1800_v60, %v2079_v27  ;;  %1698 = vmatmul.mubr.msk.bf16.vlgmr.msra.gmra.mrb[32].mxu0 %vm919_vm7, %v1010_v58  ;;  %v988_v63 = vpop.xlane.xlu1 %987 }
 0x30b   :  { %1805 = vrcp.f32 %v988_v63  ;;  %1708 = vmatpush3.bf16.msra.mxu0 %v1213_v59  ;;  %1709 = vmatprep.mubr.msk.bf16.mxu0 %vm1826_vm1, %v1825_v14 }
 0x30c   :  { %v991_v0 = vpop.xlane.xlu0 %990  ;;  %v1011_v2 = vpack.c.bf16 %v1003_v21, %v1003_v21  ;;  %1719 = vmatprep.subr.bf16.mxu0 %v1825_v14 }
 0x30d   :  { %v1802_v4 = vpop.eup %1801  ;;  %1807 = vrcp.f32 %v991_v0 }
 0x30e   :  { %v1004_v5 = vmul.f32 %v1802_v4, %v2083_v32  ;;  %1704 = vmatmul.mubr.msk.bf16.vlgmr.msra.gmra.mrb[24].mxu1 %vm919_vm7, %v1011_v2 }
 0x30f   :  { %v1804_v6 = vpop.eup %1803  ;;  %1714 = vmatpush3.bf16.msra.mxu1 %v1259_v3  ;;  %1715 = vmatprep.mubr.msk.bf16.mxu1 %vm1826_vm1, %v1825_v14 }
 0x310   :  { %v1005_v1 = vmul.f32 %v1804_v6, %v2087_v34  ;;  %v1012_v7 = vpack.c.bf16 %v1004_v5, %v1004_v5  ;;  %1725 = vmatprep.subr.bf16.mxu1 %v1825_v14 }
 0x312   :  { %1710 = vmatmul.mubr.msk.bf16.vlgmr.msra.gmra.mrb[36].mxu0 %vm919_vm7, %v1012_v7  ;;  %v1013_v17 = vpack.c.bf16 %v1005_v1, %v1005_v1 }
 0x313   :  { %1720 = vmatpush3.bf16.msra.mxu0 %v1305_v10  ;;  %1721 = vmatprep.mubr.msk.bf16.mxu0 %vm1826_vm1, %v1825_v14 }
 0x315   :  { %v1806_v22 = vpop.eup %1805 }
 0x316   :  { %v1006_v23 = vmul.f32 %v1806_v22, %v2091_v36  ;;  %1716 = vmatmul.mubr.msk.bf16.vlgmr.msra.gmra.mrb[28].mxu1 %vm919_vm7, %v1013_v17 }
 0x317   :  { %v1808_v24 = vpop.eup %1807  ;;  %1726 = vmatpush3.bf16.msra.mxu1 %v1351_v20  ;;  %1727 = vmatprep.mubr.msk.bf16.mxu1 %vm1826_vm1, %v1825_v14 }
 0x318   :  { %v1014_v26 = vpack.c.bf16 %v1006_v23, %v1006_v23  ;;  %v1007_v27 = vmul.f32 %v1808_v24, %v2095_v38  ;;  %1731 = vmatprep.subr.bf16.mxu1 %v1775_v29 }
 0x31a   :  { %1722 = vmatmul.mubr.msk.bf16.vlgmr.msra.gmra.mrb[40].mxu0 %vm919_vm7, %v1014_v26  ;;  %v1015_v28 = vpack.c.bf16 %v1007_v27, %v1007_v27 }
 0x31e   :  { %1728 = vmatmul.mubr.msk.bf16.vlgmr.msra.gmra.mrb[32].mxu1 %vm919_vm7, %v1015_v28 }
 0x31f   :  { %1732 = vmatpush3.bf16.msra.mxu1 %v1775_v29 }
 0x320   :  { %1733 = vmatprep.subr.bf16.mxu1 %v1776_v30 }
 0x323   :  { %1734 = vmatpush3.bf16.msra.mxu1 %v1776_v30 }
 0x3d5   :  { %v1065_v14 = vpop.f32.mrb[28].mxu0 }
 0x3d6   :  { %v1687_v31 = vpop.f32.mrb[29].mxu0 }
 0x3d7   :  { %v1068_v32 = vpop.f32.mrb[30].mxu0  ;;  %v1111_v33 = vpop.f32.mrb[20].mxu1 }
 0x3d8   :  { %v1393_v34 = vpack.c.bf16 %v1111_v33, %v1065_v14  ;;  %v1688_v35 = vpop.f32.mrb[31].mxu0  ;;  %v1693_v36 = vpop.f32.mrb[21].mxu1 }
 0x3d9   :  { %v1114_v37 = vpop.f32.mrb[22].mxu1 }
 0x3da   :  { %v1694_v38 = vpop.f32.mrb[23].mxu1  ;;  %1735 = vmatprep.mubr.msk.bf16.mxu1 %vm75_vm0, %v1393_v34 }
 0x3dd   :  { %v1157_v39 = vpop.f32.mrb[32].mxu0 }
 0x3de   :  { %v1699_v40 = vpop.f32.mrb[33].mxu0 }
 0x3df   :  { %v1160_v41 = vpop.f32.mrb[34].mxu0 }
 0x3e0   :  { %v1700_v42 = vpop.f32.mrb[35].mxu0 }
 0x3e1   :  { %v1203_v43 = vpop.f32.mrb[24].mxu1 }
 0x3e2   :  { %v1394_v44 = vpack.c.bf16 %v1203_v43, %v1157_v39  ;;  %v1705_v8 = vpop.f32.mrb[25].mxu1 }
 0x3e3   :  { %v1206_v45 = vpop.f32.mrb[26].mxu1 }
 0x3e4   :  { %v1706_v46 = vpop.f32.mrb[27].mxu1  ;;  %1736 = vmatmul.mubr.msk.bf16.vlgmr.msra.gmra.mrb[36].mxu1 %vm75_vm0, %v1394_v44 }
 0x3e5   :  { %v1249_v9 = vpop.f32.mrb[36].mxu0 }
 0x3e6   :  { %v1711_v47 = vpop.f32.mrb[37].mxu0 }
 0x3e7   :  { %v1252_v11 = vpop.f32.mrb[38].mxu0 }
 0x3e8   :  { %v1712_v12 = vpop.f32.mrb[39].mxu0 }
 0x3e9   :  { %v1295_v50 = vpop.f32.mrb[28].mxu1 }
 0x3ea   :  { %v1395_v51 = vpack.c.bf16 %v1295_v50, %v1249_v9  ;;  %v1717_v18 = vpop.f32.mrb[29].mxu1 }
 0x3eb   :  { %v1298_v52 = vpop.f32.mrb[30].mxu1 }
 0x3ec   :  { %v1718_v53 = vpop.f32.mrb[31].mxu1  ;;  %1739 = vmatprep.mubr.msk.bf16.mxu1 %vm75_vm0, %v1395_v51 }
 0x3ed   :  { %v1341_v54 = vpop.f32.mrb[40].mxu0 }
 0x3ee   :  { %v1723_v55 = vpop.f32.mrb[41].mxu0 }
 0x3ef   :  { %v1344_v25 = vpop.f32.mrb[42].mxu0 }
 0x3f0   :  { %v1724_v19 = vpop.f32.mrb[43].mxu0 }
 0x3f1   :  { %v1387_v56 = vpop.f32.mrb[32].mxu1 }
 0x3f2   :  { %v1396_v57 = vpack.c.bf16 %v1387_v56, %v1341_v54  ;;  %v1729_v58 = vpop.f32.mrb[33].mxu1 }
 0x3f3   :  { %v1390_v59 = vpop.f32.mrb[34].mxu1 }
 0x3f4   :  { %v1730_v60 = vpop.f32.mrb[35].mxu1  ;;  %1740 = vmatmul.mubr.msk.bf16.gmra.mrb[0].mxu1 %vm75_vm0, %v1396_v57 }
 0x4b7   :  { %v1737_v62 = vpop.f32.mrb[36].mxu1 }
 0x4b8   :  { %v1468_v21 = vadd.f32 %v1737_v62, %v2022_v15  ;;  %v1459_v63 = vpop.f32.mrb[37].mxu1 }
 0x4b9   :  { %v1460_v0 = vadd.f32 %v1459_v63, %v2024_v16  ;;  %v1738_v2 = vpop.f32.mrb[38].mxu1 }
 0x4ba   :  { %1809 = vtanh.f32 %v1468_v21  ;;  %v1471_v3 = vadd.f32 %v1738_v2, %v2026_v48  ;;  %v1462_v4 = vpop.f32.mrb[39].mxu1 }
 0x4bb   :  { %1811 = vtanh.f32 %v1460_v0  ;;  %v1463_v61 = vadd.f32 %v1462_v4, %v2028_v49 }
 0x4bc   :  { %1813 = vtanh.f32 %v1471_v3 }
 0x4bd   :  { %1815 = vtanh.f32 %v1463_v61 }
 0x4c4   :  { %v1810_v5 = vpop.eup %1809 }
 0x4c5   :  { %v1812_v6 = vpop.eup %1811  ;;  %v1500_v1 = vpack.c.bf16 %v1810_v5, %v1810_v5 }
 0x4c6   :  { %v1814_v7 = vpop.eup %1813  ;;  %v1498_v10 = vpack.c.bf16 %v1812_v6, %v1812_v6 }
 0x4c7   :  { %v1816_v13 = vpop.eup %1815  ;;  %1509 = vst.msk [vmem:[%s2216_s7 + $0x8] sm:$0xf] %vm161_vm2, %v1500_v1  ;;  %v1501_v15 = vpack.c.bf16 %v1814_v7, %v1814_v7  ;;  %v1741_v16 = vpop.f32.mrb[0].mxu1 }
 0x4c8   :  { %1507 = vst.msk [vmem:[%s2216_s7] sm:$0xf] %vm161_vm2, %v1498_v10  ;;  %v1499_v48 = vpack.c.bf16 %v1816_v13, %v1816_v13  ;;  %1817 = vtanh.f32 %v1741_v16  ;;  %v1475_v49 = vpop.f32.mrb[1].mxu1 }
 0x4c9   :  { %1510 = vst.msk [vmem:[%s2216_s7 + $0xc] sm:$0xf] %vm161_vm2, %v1501_v15  ;;  %1819 = vtanh.f32 %v1475_v49  ;;  %v1742_v17 = vpop.f32.mrb[2].mxu1 }
 0x4ca   :  { %1508 = vst.msk [vmem:[%s2216_s7 + $0x4] sm:$0xf] %vm161_vm2, %v1499_v48  ;;  %1821 = vtanh.f32 %v1742_v17  ;;  %v1478_v20 = vpop.f32.mrb[3].mxu1 }
 0x4cb   :  { %1823 = vtanh.f32 %v1478_v20 }
 0x4d2   :  { %v1818_v22 = vpop.eup %1817 }
 0x4d3   :  { %v1820_v23 = vpop.eup %1819  ;;  %v1504_v24 = vpack.c.bf16 %v1818_v22, %v1818_v22 }
 0x4d4   :  { %v1822_v26 = vpop.eup %1821  ;;  %v1502_v27 = vpack.c.bf16 %v1820_v23, %v1820_v23 }
 0x4d5   :  { %v1824_v28 = vpop.eup %1823  ;;  %1513 = vst.msk [vmem:[%s2216_s7 + $0x18] sm:$0xf] %vm161_vm2, %v1504_v24  ;;  %v1505_v29 = vpack.c.bf16 %v1822_v26, %v1822_v26 }
 0x4d6   :  { %1511 = vst.msk [vmem:[%s2216_s7 + $0x10] sm:$0xf] %vm161_vm2, %v1502_v27  ;;  %v1503_v30 = vpack.c.bf16 %v1824_v28, %v1824_v28 }
 0x4d7   :  { %1514 = vst.msk [vmem:[%s2216_s7 + $0x1c] sm:$0xf] %vm161_vm2, %v1505_v29 }
 0x4d8   :  { %1512 = vst.msk [vmem:[%s2216_s7 + $0x14] sm:$0xf] %vm161_vm2, %v1503_v30 }

// kernel: attention_gru_forward.10
= control target key start
LH: loop header
LB: loop body
LE: loop exit
PB: predicated region body
PF: predicated region fallthrough
CT: control target
= control target key end

     0   :  { %v1839_v1 = vmov 0.0   ;;  %vm1840_vm0 = vmmov 0   ;;  %vm29_vm1 = vcmask 261120   ;;  %s2457_s0 = inlined_call_operand.vmem [shape: bf16[8,8,96], index: 0, kind: input, shape index: {}]   ;;  %s2458_s1 = inlined_call_operand.vmem [shape: s32[8,1], index: 1, kind: input, shape index: {}]   ;;  %s2459_s2 = inlined_call_operand.vmem [shape: f32[8,32], index: 2, kind: input, shape index: {}]   ;;  %s2460_s3 = inlined_call_operand.vmem [shape: bf16[32,96], index: 3, kind: input, shape index: {}]   ;;  %s2461_s4 = inlined_call_operand.vmem [shape: f32[1,96], index: 4, kind: input, shape index: {}]   ;;  %s2462_s5 = inlined_call_operand.vmem [shape: bf16[8,8,32], index: 5, kind: output, shape index: {0}]   ;;  %s2463_s6 = inlined_call_operand.hbm [shape: f32[8,32], index: 6, kind: output, shape index: {1}]  }
   0x1   :  { %v1885_v0 = vld [vmem:[%s2460_s3] sm:$0xff]   ;;  %1691 = vmatprep.subr.bf16.mxu0 %v1839_v1  ;;  %1699 = vmatprep.subr.bf16.mxu1 %v1839_v1  ;;  %v1893_v2 = vld [vmem:[%s2460_s3 + $0x8] sm:$0xff]  }
   0x2   :  { %1692 = vmatpush3.bf16.msra.mxu0 %v1885_v0  ;;  %1695 = vmatprep.mubr.msk.bf16.mxu0 %vm1840_vm0, %v1839_v1  ;;  %v28_v3 = vld [vmem:[%s2459_s2] sm:$0xff] }
   0x3   :  { %12 = vsyncpa [#allocation4], 0  ;;  %1693 = vmatprep.subr.bf16.mxu0 %v1839_v1  ;;  %30 = vst.msk [vmem:[#allocation2] sm:$0xff] %vm29_vm1, %v28_v3  ;;  %1700 = vmatpush3.bf16.msra.mxu1 %v1885_v0  ;;  %v1920_v6 = vld [vmem:[%s2461_s4] ss:$0 sm:$0xff]  ;;  %s1841_s27 = smov 64   ;;  %v783_v61 = vlaneseq }
   0x4   :  { %1701 = vmatprep.subr.bf16.mxu1 %v1839_v1  ;;  %1703 = vmatprep.mubr.msk.bf16.mxu1 %vm1840_vm0, %v1839_v1  ;;  %v1927_v12 = vld [vmem:[%s2457_s0] sm:$0xff]   ;;  %v1842_v24 = vmov 0   ;;  %s1843_s8 = smov 32   ;;  %v1845_v59 = vmov 1966171168   ;;  %vm1466_vm6 = vcmask 1040384  }
   0x5   :  { %v102_v13 = vunpack.c.l.bf16 %v1927_v12  ;;  %v1934_v23 = vld [vmem:[%s2458_s1] sm:$0xff]  ;;  %1763 = vset.pattern.permute.xlu0 %v1842_v24  ;;  %v199_v44 = vunpack.c.h.bf16 %v1927_v12  ;;  %s1844_s1 = smov 96   ;;  %v781_v60 = vunpack.c.l.s4 %v1845_v59  ;;  %v784_v63 = vshrl.u32 %v783_v61, 7 }
   0x6   :  { %1694 = vmatpush3.bf16.msra.mxu0 %v1893_v2  ;;  %vm1622_vm2 = vcmp.gt.s32.totalorder %v1934_v23, 0  ;;  %vm1626_vm4 = vcmp.gt.s32.totalorder %v1934_v23, 1  ;;  %vm1630_vm7 = vcmp.gt.s32.totalorder %v1934_v23, 2  ;;  %vm1475_vm9 = vcmask 1041408  }
   0x7   :  { %1702 = vmatpush3.bf16.msra.mxu1 %v1893_v2  ;;  %1707 = vmatprep.subr.bf16.mxu0 %v1839_v1  ;;  %v139_v25 = vsel %vm1622_vm2, 1, %v1842_v24  ;;  %v232_v52 = vsel %vm1626_vm4, 1, %v1842_v24  ;;  %v782_v62 = vunpack.c.0.s8 %v781_v60  ;;  %vm1634_vm10 = vcmp.gt.s32.totalorder %v1934_v23, 3 }
   0x8   :  { %1715 = vmatprep.subr.bf16.mxu1 %v1839_v1  ;;  %vm1484_vm12 = vcmask 1042432   ;;  %vm1638_vm13 = vcmp.gt.s32.totalorder %v1934_v23, 4  ;;  %vm1493_vm15 = vcmask 1043456   ;;  %vm1646_vm4 = vcmp.gt.s32.totalorder %v1934_v23, 6 }
   0x9   :  { %v1959_v3 = vsub.s32 %v782_v62, %v784_v63  ;;  %v2024_v62 = vld [vmem:[%s2457_s0 + $0x8] sm:$0xff]  }
   0xa   :  { %v37_v4 = vld [vmem:[#allocation2] sm:$0xff] }
   0xb   :  { %v38_v5 = vpack.c.bf16 %v37_v4, %v37_v4 }
   0xd   :  { %1696 = vmatmul.mubr.msk.bf16.vlgmr.msra.gmra.mrb[0].mxu0 %vm29_vm1, %v38_v5 }
   0xe   :  { %1708 = vmatpush3.bf16.msra.mxu0 %v1885_v0  ;;  %1711 = vmatprep.mubr.msk.bf16.mxu0 %vm1840_vm0, %v1839_v1 }
   0xf   :  { %1709 = vmatprep.subr.bf16.mxu0 %v1839_v1 }
  0x12   :  { %1710 = vmatpush3.bf16.msra.mxu0 %v1893_v2 }
  0x13   :  { %1723 = vmatprep.subr.bf16.mxu0 %v1839_v1 }
  0xe0   :  { %v95_v7 = vpop.f32.mrb[0].mxu0 }
  0xe1   :  { %v96_v8 = vadd.f32 %v1920_v6, %v95_v7  ;;  %v1697_v9 = vpop.f32.mrb[1].mxu0 }
  0xe2   :  { %v98_v10 = vpop.f32.mrb[2].mxu0 }
  0xe3   :  { %111 = vrot.lane.b32.xlu0 %v96_v8, %s1841_s27  ;;  %v1698_v11 = vpop.f32.mrb[3].mxu0  ;;  %v103_v14 = vadd.f32 %v102_v13, %v96_v8 }
  0xe5   :  { %v1621_v15 = vmul.f32 -1.442695, %v103_v14 }
  0xe7   :  { %1766 = vpow2.f32 %v1621_v15 }
  0xf1   :  { %v1767_v16 = vpop.eup %1766 }
  0xf2   :  { %v107_v17 = vadd.f32 1.0, %v1767_v16 }
  0xf4   :  { %1768 = vrcp.f32 %v107_v17 }
  0xfe   :  { %v1769_v18 = vpop.eup %1768 }
 0x155   :  { %v112_v19 = vpop.permute.xlu0 %111 }
 0x156   :  { %v114_v20 = vmul.f32 %v1769_v18, %v112_v19 }
 0x158   :  { %116 = vrot.lane.b32.xlu0 %v114_v20, %s1841_s27  ;;  %v1970_v20 = vsub.s32 0, %v784_v63  ;;  %v288_v63 = vunpack.c.l.bf16 %v2024_v62 }
 0x15c   :  { %141 = vperm.xlu0 %1763, %v139_v25  }
 0x1ca   :  { %v117_v21 = vpop.permute.xlu0 %116 }
 0x1cb   :  { %v119_v22 = vadd.f32 %v117_v21, %v102_v13 }
 0x1cd   :  { %1770 = vtanh.f32 %v119_v22 }
 0x1d7   :  { %v1771_v26 = vpop.eup %1770 }
 0x1d8   :  { %122 = vrot.lane.b32.xlu1 %v1771_v26, %s1841_s27 }
 0x1db   :  { %v142_v31 = vpop.permute.xlu0 %141 }
 0x1dc   :  { %vm143_vm3 = vcmp.eq.s32.totalorder %v142_v31, 1 }
 0x24a   :  { %v123_v27 = vpop.permute.xlu1 %122 }
 0x24b   :  { %v125_v28 = vsub.f32 %v37_v4, %v123_v27 }
 0x24d   :  { %127 = vrot.lane.b32.xlu1 %v125_v28, %s1843_s8 }
 0x2bf   :  { %v128_v29 = vpop.permute.xlu1 %127 }
 0x2c0   :  { %v130_v30 = vmul.f32 %v1769_v18, %v128_v29 }
 0x2c2   :  { %132 = vrot.lane.b32.xlu1 %v130_v30, %s1843_s8 }
 0x2c6   :  { %146 = vrot.lane.b32.xlu1 %v37_v4, %s1841_s27 }
 0x334   :  { %v133_v32 = vpop.permute.xlu1 %132 }
 0x335   :  { %v135_v33 = vadd.f32 %v1771_v26, %v133_v32 }
 0x337   :  { %v144_v34 = vsel %vm143_vm3, %v135_v33, 0.0 }
 0x338   :  { %v147_v35 = vpop.permute.xlu1 %146  ;;  %v779_v4 = vcombine.high %v144_v34, %v144_v34  ;;  %v786_v5 = vrot.slane %v144_v34, %v1959_v3 }
 0x339   :  { %v149_v36 = vsel %vm143_vm3, %v135_v33, %v147_v35  ;;  %vm1502_vm3 = vcmask 1044480  }
 0x33a   :  { %v150_v37 = vpack.c.bf16 %v149_v36, %v149_v36  ;;  %v793_v9 = vrot.slane %v779_v4, %v1959_v3  ;;  %v794_v11 = vcombine.high %v786_v5, %v786_v5  ;;  %v802_v18 = vrot.slane %v786_v5, %v1959_v3 }
 0x33c   :  { %152 = vrot.lane.b32.xlu0 %v150_v37, %s1841_s27  ;;  %v795_v17 = vcombine.high %v793_v9, %v793_v9  ;;  %v809_v19 = vrot.slane %v793_v9, %v1959_v3  ;;  %v816_v26 = vrot.slane %v794_v11, %v1959_v3  ;;  %v824_v32 = vcombine.high %v802_v18, %v802_v18 }
 0x33e   :  { %v823_v31 = vrot.slane %v795_v17, %v1959_v3  ;;  %v825_v33 = vcombine.high %v809_v19, %v809_v19 }
 0x3ae   :  { %v153_v38 = vpop.permute.xlu0 %152 }
 0x3af   :  { %1704 = vmatmul.mubr.msk.bf16.vlgmr.msra.gmra.mrb[0].mxu1 %vm29_vm1, %v153_v38 }
 0x3b0   :  { %1716 = vmatpush3.bf16.msra.mxu1 %v1885_v0  ;;  %1719 = vmatprep.mubr.msk.bf16.mxu1 %vm1840_vm0, %v1839_v1 }
 0x3b1   :  { %1717 = vmatprep.subr.bf16.mxu1 %v1839_v1 }
 0x3b4   :  { %1718 = vmatpush3.bf16.msra.mxu1 %v1893_v2 }
 0x3b5   :  { %1731 = vmatprep.subr.bf16.mxu1 %v1839_v1 }
 0x482   :  { %v191_v39 = vpop.f32.mrb[0].mxu1 }
 0x483   :  { %v192_v40 = vadd.f32 %v1920_v6, %v191_v39  ;;  %v1705_v41 = vpop.f32.mrb[1].mxu1  ;;  %v826_v39 = vcombine.high %v816_v26, %v816_v26 }
 0x484   :  { %v194_v42 = vpop.f32.mrb[2].mxu1 }
 0x485   :  { %208 = vrot.lane.b32.xlu1 %v192_v40, %s1841_s27  ;;  %v1706_v43 = vpop.f32.mrb[3].mxu1  ;;  %v200_v45 = vadd.f32 %v199_v44, %v192_v40 }
 0x487   :  { %v1625_v46 = vmul.f32 -1.442695, %v200_v45 }
 0x489   :  { %1772 = vpow2.f32 %v1625_v46 }
 0x493   :  { %v1773_v47 = vpop.eup %1772 }
 0x494   :  { %v204_v48 = vadd.f32 1.0, %v1773_v47  ;;  %v827_v47 = vcombine.high %v823_v31, %v823_v31 }
 0x496   :  { %1774 = vrcp.f32 %v204_v48 }
 0x4a0   :  { %v1775_v49 = vpop.eup %1774 }
 0x4f7   :  { %v209_v50 = vpop.permute.xlu1 %208 }
 0x4f8   :  { %v211_v51 = vmul.f32 %v1775_v49, %v209_v50 }
 0x4fa   :  { %213 = vrot.lane.b32.xlu0 %v211_v51, %s1841_s27 }
 0x4fe   :  { %234 = vperm.xlu0 %1763, %v232_v52  }
 0x56c   :  { %v214_v53 = vpop.permute.xlu0 %213 }
 0x56d   :  { %v216_v54 = vadd.f32 %v214_v53, %v199_v44 }
 0x56f   :  { %1776 = vtanh.f32 %v216_v54 }
 0x579   :  { %v1777_v55 = vpop.eup %1776 }
 0x57a   :  { %v218_v56 = vsub.f32 %v149_v36, %v1777_v55 }
 0x57c   :  { %220 = vrot.lane.b32.xlu1 %v218_v56, %s1844_s1 }
 0x57d   :  { %v235_v7 = vpop.permute.xlu0 %234 }
 0x57e   :  { %vm236_vm5 = vcmp.eq.s32.totalorder %v235_v7, 1 }
 0x5ee   :  { %v221_v57 = vpop.permute.xlu1 %220 }
 0x5ef   :  { %v223_v58 = vmul.f32 %v1775_v49, %v221_v57 }
 0x5f1   :  { %225 = vrot.lane.b32.xlu1 %v223_v58, %s1843_s8 }
 0x663   :  { %v226_v8 = vpop.permute.xlu1 %225 }
 0x664   :  { %v228_v10 = vadd.f32 %v1777_v55, %v226_v8 }
 0x666   :  { %v237_v12 = vsel %vm236_vm5, %v228_v10, 0.0  ;;  %v1963_v13 = vsel %vm236_vm5, %v228_v10, %v149_v36 }
 0x667   :  { %v837_v14 = vcombine.high %v237_v12, %v237_v12  ;;  %v844_v15 = vrot.slane %v237_v12, %v1959_v3  ;;  %v239_v16 = vpack.c.bf16 %v1963_v13, %v1963_v13  ;;  %v321_v12 = vsel %vm1630_vm7, 1, %v1842_v24 }
 0x668   :  { %vm1650_vm7 = vcmp.gt.s32.totalorder %v1934_v23, 7 }
 0x669   :  { %v851_v21 = vrot.slane %v837_v14, %v1959_v3  ;;  %v852_v22 = vcombine.high %v844_v15, %v844_v15  ;;  %v860_v25 = vrot.slane %v844_v15, %v1959_v3  ;;  %241 = vrot.lane.b32.xlu0 %v239_v16, %s1841_s27 }
 0x66b   :  { %v853_v27 = vcombine.high %v851_v21, %v851_v21  ;;  %v867_v28 = vrot.slane %v851_v21, %v1959_v3  ;;  %v874_v29 = vrot.slane %v852_v22, %v1959_v3  ;;  %v882_v30 = vcombine.high %v860_v25, %v860_v25 }
 0x66c   :  { %v1189_v34 = vrot.slane %v860_v25, %v1970_v20 }
 0x66d   :  { %v881_v35 = vrot.slane %v853_v27, %v1959_v3  ;;  %v883_v36 = vcombine.high %v867_v28, %v867_v28  ;;  %v884_v37 = vcombine.high %v874_v29, %v874_v29  ;;  %v1193_v38 = vrot.slane %v874_v29, %v1970_v20 }
 0x66e   :  { %v1197_v40 = vrot.slane %v882_v30, %v1970_v20  ;;  %v1205_v41 = vrot.slane %v867_v28, %v1970_v20  ;;  %v1985_v42 = vsel %vm1466_vm6, %v802_v18, %v1189_v34 }
 0x66f   :  { %v885_v43 = vcombine.high %v881_v35, %v881_v35  ;;  %v1201_v44 = vrot.slane %v884_v37, %v1970_v20  ;;  %v1209_v45 = vrot.slane %v881_v35, %v1970_v20  ;;  %v1213_v46 = vrot.slane %v883_v36, %v1970_v20 }
 0x670   :  { %v1991_v48 = vsel %vm1466_vm6, %v816_v26, %v1193_v38  ;;  %v1994_v49 = vsel %vm1466_vm6, %v824_v32, %v1197_v40  ;;  %v1997_v50 = vsel %vm1466_vm6, %v809_v19, %v1205_v41 }
 0x671   :  { %v1217_v51 = vrot.slane %v885_v43, %v1970_v20  ;;  %v2001_v52 = vsel %vm1466_vm6, %v826_v39, %v1201_v44  ;;  %v2004_v53 = vsel %vm1466_vm6, %v823_v31, %v1209_v45  ;;  %v2007_v54 = vsel %vm1466_vm6, %v825_v33, %v1213_v46 }
 0x673   :  { %v2010_v55 = vsel %vm1466_vm6, %v827_v47, %v1217_v51  ;;  %vm1511_vm6 = vcmask 1045504  }
 0x6db   :  { %v242_v56 = vpop.permute.xlu0 %241 }
 0x6dc   :  { %1712 = vmatmul.mubr.msk.bf16.vlgmr.msra.gmra.mrb[4].mxu0 %vm29_vm1, %v242_v56 }
 0x6dd   :  { %1724 = vmatpush3.bf16.msra.mxu0 %v1885_v0  ;;  %1727 = vmatprep.mubr.msk.bf16.mxu0 %vm1840_vm0, %v1839_v1 }
 0x6de   :  { %1725 = vmatprep.subr.bf16.mxu0 %v1839_v1 }
 0x6e1   :  { %1726 = vmatpush3.bf16.msra.mxu0 %v1893_v2 }
 0x6e2   :  { %1739 = vmatprep.subr.bf16.mxu0 %v1839_v1 }
 0x7af   :  { %v280_v57 = vpop.f32.mrb[4].mxu0 }
 0x7b0   :  { %v281_v58 = vadd.f32 %v1920_v6, %v280_v57  ;;  %v1713_v59 = vpop.f32.mrb[5].mxu0 }
 0x7b1   :  { %v283_v60 = vpop.f32.mrb[6].mxu0 }
 0x7b2   :  { %297 = vrot.lane.b32.xlu1 %v281_v58, %s1841_s27  ;;  %v1714_v61 = vpop.f32.mrb[7].mxu0  ;;  %v289_v4 = vadd.f32 %v288_v63, %v281_v58 }
 0x7b4   :  { %v1629_v5 = vmul.f32 -1.442695, %v289_v4  ;;  %v377_v4 = vunpack.c.h.bf16 %v2024_v62 }
 0x7b6   :  { %1778 = vpow2.f32 %v1629_v5 }
 0x7c0   :  { %v1779_v7 = vpop.eup %1778 }
 0x7c1   :  { %v293_v8 = vadd.f32 1.0, %v1779_v7 }
 0x7c3   :  { %1780 = vrcp.f32 %v293_v8 }
 0x7cd   :  { %v1781_v9 = vpop.eup %1780 }
 0x824   :  { %v298_v10 = vpop.permute.xlu1 %297 }
 0x825   :  { %v300_v11 = vmul.f32 %v1781_v9, %v298_v10 }
 0x827   :  { %302 = vrot.lane.b32.xlu0 %v300_v11, %s1841_s27 }
 0x82b   :  { %323 = vperm.xlu0 %1763, %v321_v12  }
 0x899   :  { %v303_v14 = vpop.permute.xlu0 %302 }
 0x89a   :  { %v305_v15 = vadd.f32 %v303_v14, %v288_v63  ;;  %v410_v14 = vsel %vm1634_vm10, 1, %v1842_v24  ;;  %vm1585_vm10 = vcmask 257024  }
 0x89c   :  { %1782 = vtanh.f32 %v305_v15 }
 0x8a6   :  { %v1783_v16 = vpop.eup %1782 }
 0x8a7   :  { %v307_v17 = vsub.f32 %v1963_v13, %v1783_v16 }
 0x8a9   :  { %309 = vrot.lane.b32.xlu1 %v307_v17, %s1844_s1 }
 0x8aa   :  { %v324_v21 = vpop.permute.xlu0 %323 }
 0x8ab   :  { %vm325_vm8 = vcmp.eq.s32.totalorder %v324_v21, 1 }
 0x91b   :  { %v310_v18 = vpop.permute.xlu1 %309 }
 0x91c   :  { %v312_v19 = vmul.f32 %v1781_v9, %v310_v18 }
 0x91e   :  { %314 = vrot.lane.b32.xlu1 %v312_v19, %s1843_s8 }
 0x990   :  { %v315_v22 = vpop.permute.xlu1 %314 }
 0x991   :  { %v317_v25 = vadd.f32 %v1783_v16, %v315_v22 }
 0x993   :  { %v326_v26 = vsel %vm325_vm8, %v317_v25, 0.0  ;;  %v2034_v27 = vsel %vm325_vm8, %v317_v25, %v1963_v13 }
 0x994   :  { %v887_v28 = vcombine.high %v326_v26, %v326_v26  ;;  %v894_v29 = vrot.slane %v326_v26, %v1959_v3  ;;  %v328_v30 = vpack.c.bf16 %v2034_v27, %v2034_v27 }
 0x996   :  { %v901_v31 = vrot.slane %v887_v28, %v1959_v3  ;;  %v902_v32 = vcombine.high %v894_v29, %v894_v29  ;;  %v910_v33 = vrot.slane %v894_v29, %v1959_v3  ;;  %330 = vrot.lane.b32.xlu0 %v328_v30, %s1841_s27 }
 0x998   :  { %v903_v34 = vcombine.high %v901_v31, %v901_v31  ;;  %v917_v35 = vrot.slane %v901_v31, %v1959_v3  ;;  %v924_v13 = vrot.slane %v902_v32, %v1959_v3  ;;  %v932_v36 = vcombine.high %v910_v33, %v910_v33 }
 0x999   :  { %v1229_v37 = vrot.slane %v910_v33, %v1970_v20 }
 0x99a   :  { %v931_v38 = vrot.slane %v903_v34, %v1959_v3  ;;  %v933_v39 = vcombine.high %v917_v35, %v917_v35  ;;  %v934_v40 = vcombine.high %v924_v13, %v924_v13  ;;  %v1233_v41 = vrot.slane %v924_v13, %v1970_v20 }
 0x99b   :  { %v1237_v43 = vrot.slane %v932_v36, %v1970_v20  ;;  %v1245_v44 = vrot.slane %v917_v35, %v1970_v20  ;;  %v2051_v45 = vsel %vm1475_vm9, %v1985_v42, %v1229_v37 }
 0x99c   :  { %v935_v46 = vcombine.high %v931_v38, %v931_v38  ;;  %v1241_v47 = vrot.slane %v934_v40, %v1970_v20  ;;  %v1249_v51 = vrot.slane %v931_v38, %v1970_v20  ;;  %v1253_v56 = vrot.slane %v933_v39, %v1970_v20 }
 0x99d   :  { %v2058_v57 = vsel %vm1475_vm9, %v1991_v48, %v1233_v41  ;;  %v2062_v58 = vsel %vm1475_vm9, %v1994_v49, %v1237_v43  ;;  %v2066_v59 = vsel %vm1475_vm9, %v1997_v50, %v1245_v44 }
 0x99e   :  { %v1257_v42 = vrot.slane %v935_v46, %v1970_v20  ;;  %v2071_v60 = vsel %vm1475_vm9, %v2001_v52, %v1241_v47  ;;  %v2075_v61 = vsel %vm1475_vm9, %v2004_v53, %v1249_v51  ;;  %v2079_v48 = vsel %vm1475_vm9, %v2007_v54, %v1253_v56 }
 0x9a0   :  { %v2083_v49 = vsel %vm1475_vm9, %v2010_v55, %v1257_v42  ;;  %vm1520_vm9 = vcmask 1046528  }
 0xa08   :  { %v331_v50 = vpop.permute.xlu0 %330 }
 0xa09   :  { %1720 = vmatmul.mubr.msk.bf16.vlgmr.msra.gmra.mrb[4].mxu1 %vm29_vm1, %v331_v50 }
 0xa0a   :  { %1732 = vmatpush3.bf16.msra.mxu1 %v1885_v0  ;;  %1735 = vmatprep.mubr.msk.bf16.mxu1 %vm1840_vm0, %v1839_v1 }
 0xa0b   :  { %1733 = vmatprep.subr.bf16.mxu1 %v1839_v1 }
 0xa0e   :  { %1734 = vmatpush3.bf16.msra.mxu1 %v1893_v2 }
 0xa0f   :  { %1747 = vmatprep.subr.bf16.mxu1 %v1839_v1 }
 0xadc   :  { %v369_v52 = vpop.f32.mrb[4].mxu1 }
 0xadd   :  { %v370_v53 = vadd.f32 %v1920_v6, %v369_v52  ;;  %v1721_v54 = vpop.f32.mrb[5].mxu1 }
 0xade   :  { %v372_v55 = vpop.f32.mrb[6].mxu1 }
 0xadf   :  { %386 = vrot.lane.b32.xlu1 %v370_v53, %s1841_s27  ;;  %v1722_v63 = vpop.f32.mrb[7].mxu1  ;;  %v378_v5 = vadd.f32 %v377_v4, %v370_v53 }
 0xae1   :  { %v1633_v7 = vmul.f32 -1.442695, %v378_v5 }
 0xae3   :  { %1784 = vpow2.f32 %v1633_v7 }
 0xaed   :  { %v1785_v8 = vpop.eup %1784 }
 0xaee   :  { %v382_v9 = vadd.f32 1.0, %v1785_v8 }
 0xaf0   :  { %1786 = vrcp.f32 %v382_v9 }
 0xafa   :  { %v1787_v10 = vpop.eup %1786 }
 0xb51   :  { %v387_v11 = vpop.permute.xlu1 %386 }
 0xb52   :  { %v389_v12 = vmul.f32 %v1787_v10, %v387_v11 }
 0xb54   :  { %391 = vrot.lane.b32.xlu0 %v389_v12, %s1841_s27 }
 0xb58   :  { %412 = vperm.xlu0 %1763, %v410_v14  }
 0xbc6   :  { %v392_v15 = vpop.permute.xlu0 %391 }
 0xbc7   :  { %v394_v16 = vadd.f32 %v392_v15, %v377_v4  ;;  %v2164_v4 = vld [vmem:[%s2457_s0 + $0x10] sm:$0xff]   ;;  %v499_v15 = vsel %vm1638_vm13, 1, %v1842_v24 }
 0xbc8   :  { %v466_v5 = vunpack.c.l.bf16 %v2164_v4 }
 0xbc9   :  { %1788 = vtanh.f32 %v394_v16 }
 0xbd3   :  { %v1789_v62 = vpop.eup %1788 }
 0xbd4   :  { %v396_v17 = vsub.f32 %v2034_v27, %v1789_v62 }
 0xbd6   :  { %398 = vrot.lane.b32.xlu1 %v396_v17, %s1844_s1 }
 0xbd7   :  { %v413_v21 = vpop.permute.xlu0 %412 }
 0xbd8   :  { %vm414_vm11 = vcmp.eq.s32.totalorder %v413_v21, 1 }
 0xc48   :  { %v399_v18 = vpop.permute.xlu1 %398 }
 0xc49   :  { %v401_v19 = vmul.f32 %v1787_v10, %v399_v18 }
 0xc4b   :  { %403 = vrot.lane.b32.xlu1 %v401_v19, %s1843_s8 }
 0xcbd   :  { %v404_v22 = vpop.permute.xlu1 %403 }
 0xcbe   :  { %v406_v25 = vadd.f32 %v1789_v62, %v404_v22 }
 0xcc0   :  { %v415_v26 = vsel %vm414_vm11, %v406_v25, 0.0  ;;  %v2102_v28 = vsel %vm414_vm11, %v406_v25, %v2034_v27 }
 0xcc1   :  { %v937_v29 = vcombine.high %v415_v26, %v415_v26  ;;  %v944_v30 = vrot.slane %v415_v26, %v1959_v3  ;;  %v417_v31 = vpack.c.bf16 %v2102_v28, %v2102_v28 }
 0xcc3   :  { %v951_v32 = vrot.slane %v937_v29, %v1959_v3  ;;  %v952_v33 = vcombine.high %v944_v30, %v944_v30  ;;  %v960_v34 = vrot.slane %v944_v30, %v1959_v3  ;;  %419 = vrot.lane.b32.xlu0 %v417_v31, %s1841_s27 }
 0xcc5   :  { %v953_v35 = vcombine.high %v951_v32, %v951_v32  ;;  %v967_v13 = vrot.slane %v951_v32, %v1959_v3  ;;  %v974_v27 = vrot.slane %v952_v33, %v1959_v3  ;;  %v982_v36 = vcombine.high %v960_v34, %v960_v34 }
 0xcc6   :  { %v1269_v37 = vrot.slane %v960_v34, %v1970_v20 }
 0xcc7   :  { %v981_v38 = vrot.slane %v953_v35, %v1959_v3  ;;  %v983_v39 = vcombine.high %v967_v13, %v967_v13  ;;  %v984_v40 = vcombine.high %v974_v27, %v974_v27  ;;  %v1273_v41 = vrot.slane %v974_v27, %v1970_v20 }
 0xcc8   :  { %v1277_v43 = vrot.slane %v982_v36, %v1970_v20  ;;  %v1285_v44 = vrot.slane %v967_v13, %v1970_v20  ;;  %v2119_v46 = vsel %vm1484_vm12, %v2051_v45, %v1269_v37 }
 0xcc9   :  { %v985_v47 = vcombine.high %v981_v38, %v981_v38  ;;  %v1281_v51 = vrot.slane %v984_v40, %v1970_v20  ;;  %v1289_v56 = vrot.slane %v981_v38, %v1970_v20  ;;  %v1293_v42 = vrot.slane %v983_v39, %v1970_v20 }
 0xcca   :  { %v2126_v50 = vsel %vm1484_vm12, %v2058_v57, %v1273_v41  ;;  %v2130_v52 = vsel %vm1484_vm12, %v2062_v58, %v1277_v43  ;;  %v2134_v53 = vsel %vm1484_vm12, %v2066_v59, %v1285_v44 }
 0xccb   :  { %v1297_v45 = vrot.slane %v985_v47, %v1970_v20  ;;  %v2139_v54 = vsel %vm1484_vm12, %v2071_v60, %v1281_v51  ;;  %v2143_v55 = vsel %vm1484_vm12, %v2075_v61, %v1289_v56  ;;  %v2147_v57 = vsel %vm1484_vm12, %v2079_v48, %v1293_v42 }
 0xccd   :  { %v2151_v58 = vsel %vm1484_vm12, %v2083_v49, %v1297_v45 }
 0xd35   :  { %v420_v59 = vpop.permute.xlu0 %419 }
 0xd36   :  { %1728 = vmatmul.mubr.msk.bf16.vlgmr.msra.gmra.mrb[8].mxu0 %vm29_vm1, %v420_v59 }
 0xd37   :  { %1740 = vmatpush3.bf16.msra.mxu0 %v1885_v0  ;;  %1743 = vmatprep.mubr.msk.bf16.mxu0 %vm1840_vm0, %v1839_v1 }
 0xd38   :  { %1741 = vmatprep.subr.bf16.mxu0 %v1839_v1 }
 0xd3b   :  { %1742 = vmatpush3.bf16.msra.mxu0 %v1893_v2 }
 0xe09   :  { %v458_v60 = vpop.f32.mrb[8].mxu0 }
 0xe0a   :  { %v459_v61 = vadd.f32 %v1920_v6, %v458_v60  ;;  %v1729_v48 = vpop.f32.mrb[9].mxu0 }
 0xe0b   :  { %v461_v63 = vpop.f32.mrb[10].mxu0 }
 0xe0c   :  { %475 = vrot.lane.b32.xlu1 %v459_v61, %s1841_s27  ;;  %v1730_v49 = vpop.f32.mrb[11].mxu0  ;;  %v467_v7 = vadd.f32 %v466_v5, %v459_v61 }
 0xe0e   :  { %v1637_v8 = vmul.f32 -1.442695, %v467_v7  ;;  %v555_v7 = vunpack.c.h.bf16 %v2164_v4 }
 0xe10   :  { %1790 = vpow2.f32 %v1637_v8 }
 0xe1a   :  { %v1791_v9 = vpop.eup %1790 }
 0xe1b   :  { %v471_v10 = vadd.f32 1.0, %v1791_v9 }
 0xe1d   :  { %1792 = vrcp.f32 %v471_v10 }
 0xe27   :  { %v1793_v11 = vpop.eup %1792 }
 0xe7e   :  { %v476_v12 = vpop.permute.xlu1 %475 }
 0xe7f   :  { %v478_v14 = vmul.f32 %v1793_v11, %v476_v12 }
 0xe81   :  { %480 = vrot.lane.b32.xlu0 %v478_v14, %s1841_s27 }
 0xe85   :  { %501 = vperm.xlu0 %1763, %v499_v15  }
 0xef3   :  { %v481_v16 = vpop.permute.xlu0 %480 }
 0xef4   :  { %v483_v62 = vadd.f32 %v481_v16, %v466_v5 }
 0xef6   :  { %1794 = vtanh.f32 %v483_v62 }
 0xf00   :  { %v1795_v17 = vpop.eup %1794 }
 0xf01   :  { %v485_v18 = vsub.f32 %v2102_v28, %v1795_v17 }
 0xf03   :  { %487 = vrot.lane.b32.xlu1 %v485_v18, %s1844_s1 }
 0xf04   :  { %v502_v22 = vpop.permute.xlu0 %501 }
 0xf05   :  { %vm503_vm14 = vcmp.eq.s32.totalorder %v502_v22, 1 }
 0xf75   :  { %v488_v19 = vpop.permute.xlu1 %487 }
 0xf76   :  { %v490_v21 = vmul.f32 %v1793_v11, %v488_v19 }
 0xf78   :  { %492 = vrot.lane.b32.xlu1 %v490_v21, %s1843_s8 }
 0xfea   :  { %v493_v25 = vpop.permute.xlu1 %492 }
 0xfeb   :  { %v495_v26 = vadd.f32 %v1795_v17, %v493_v25 }
 0xfed   :  { %v504_v29 = vsel %vm503_vm14, %v495_v26, 0.0  ;;  %v2174_v30 = vsel %vm503_vm14, %v495_v26, %v2102_v28 }
 0xfee   :  { %v987_v31 = vcombine.high %v504_v29, %v504_v29  ;;  %v994_v32 = vrot.slane %v504_v29, %v1959_v3  ;;  %v506_v33 = vpack.c.bf16 %v2174_v30, %v2174_v30 }
 0xff0   :  { %v1001_v34 = vrot.slane %v987_v31, %v1959_v3  ;;  %v1002_v35 = vcombine.high %v994_v32, %v994_v32  ;;  %v1010_v13 = vrot.slane %v994_v32, %v1959_v3  ;;  %508 = vrot.lane.b32.xlu0 %v506_v33, %s1841_s27 }
 0xff2   :  { %v1003_v27 = vcombine.high %v1001_v34, %v1001_v34  ;;  %v1017_v36 = vrot.slane %v1001_v34, %v1959_v3  ;;  %v1024_v28 = vrot.slane %v1002_v35, %v1959_v3  ;;  %v1032_v37 = vcombine.high %v1010_v13, %v1010_v13 }
 0xff3   :  { %v1309_v38 = vrot.slane %v1010_v13, %v1970_v20 }
 0xff4   :  { %v1031_v39 = vrot.slane %v1003_v27, %v1959_v3  ;;  %v1033_v40 = vcombine.high %v1017_v36, %v1017_v36  ;;  %v1034_v41 = vcombine.high %v1024_v28, %v1024_v28  ;;  %v1313_v43 = vrot.slane %v1024_v28, %v1970_v20 }
 0xff5   :  { %v1317_v44 = vrot.slane %v1032_v37, %v1970_v20  ;;  %v1325_v47 = vrot.slane %v1017_v36, %v1970_v20  ;;  %v2191_v51 = vsel %vm1493_vm15, %v2119_v46, %v1309_v38 }
 0xff6   :  { %v1035_v56 = vcombine.high %v1031_v39, %v1031_v39  ;;  %v1321_v42 = vrot.slane %v1034_v41, %v1970_v20  ;;  %v1329_v45 = vrot.slane %v1031_v39, %v1970_v20  ;;  %v1333_v59 = vrot.slane %v1033_v40, %v1970_v20 }
 0xff7   :  { %v2198_v60 = vsel %vm1493_vm15, %v2126_v50, %v1313_v43  ;;  %v2202_v61 = vsel %vm1493_vm15, %v2130_v52, %v1317_v44  ;;  %v2206_v48 = vsel %vm1493_vm15, %v2134_v53, %v1325_v47 }
 0xff8   :  { %v1337_v46 = vrot.slane %v1035_v56, %v1970_v20  ;;  %v2211_v63 = vsel %vm1493_vm15, %v2139_v54, %v1321_v42  ;;  %v2215_v49 = vsel %vm1493_vm15, %v2143_v55, %v1329_v45  ;;  %v2219_v50 = vsel %vm1493_vm15, %v2147_v57, %v1333_v59 }
 0xffa   :  { %v2223_v52 = vsel %vm1493_vm15, %v2151_v58, %v1337_v46 }
0x1062   :  { %v509_v53 = vpop.permute.xlu0 %508 }
0x1063   :  { %1736 = vmatmul.mubr.msk.bf16.vlgmr.msra.gmra.mrb[8].mxu1 %vm29_vm1, %v509_v53 }
0x1064   :  { %1748 = vmatpush3.bf16.msra.mxu1 %v1885_v0  ;;  %1751 = vmatprep.mubr.msk.bf16.mxu1 %vm1840_vm0, %v1839_v1  ;;  %vm1642_vm0 = vcmp.gt.s32.totalorder %v1934_v23, 5 }
0x1065   :  { %1749 = vmatprep.subr.bf16.mxu1 %v1839_v1 }
0x1068   :  { %1750 = vmatpush3.bf16.msra.mxu1 %v1893_v2  ;;  %v588_v2 = vsel %vm1642_vm0, 1, %v1842_v24 }
0x1136   :  { %v547_v54 = vpop.f32.mrb[8].mxu1 }
0x1137   :  { %v548_v55 = vadd.f32 %v1920_v6, %v547_v54  ;;  %v1737_v57 = vpop.f32.mrb[9].mxu1 }
0x1138   :  { %v550_v5 = vpop.f32.mrb[10].mxu1 }
0x1139   :  { %564 = vrot.lane.b32.xlu1 %v548_v55, %s1841_s27  ;;  %v1738_v58 = vpop.f32.mrb[11].mxu1  ;;  %v556_v8 = vadd.f32 %v555_v7, %v548_v55 }
0x113b   :  { %v1641_v9 = vmul.f32 -1.442695, %v556_v8 }
0x113d   :  { %1796 = vpow2.f32 %v1641_v9 }
0x1147   :  { %v1797_v0 = vpop.eup %1796 }
0x1148   :  { %v560_v10 = vadd.f32 1.0, %v1797_v0 }
0x114a   :  { %1798 = vrcp.f32 %v560_v10 }
0x1154   :  { %v1799_v11 = vpop.eup %1798 }
0x11ab   :  { %v565_v1 = vpop.permute.xlu1 %564 }
0x11ac   :  { %v567_v12 = vmul.f32 %v1799_v11, %v565_v1 }
0x11ae   :  { %569 = vrot.lane.b32.xlu0 %v567_v12, %s1841_s27 }
0x11b2   :  { %590 = vperm.xlu0 %1763, %v588_v2  }
0x1220   :  { %v570_v14 = vpop.permute.xlu0 %569 }
0x1221   :  { %v572_v15 = vadd.f32 %v570_v14, %v555_v7 }
0x1223   :  { %1800 = vtanh.f32 %v572_v15 }
0x122d   :  { %v1801_v4 = vpop.eup %1800 }
0x122e   :  { %v574_v16 = vsub.f32 %v2174_v30, %v1801_v4 }
0x1230   :  { %576 = vrot.lane.b32.xlu1 %v574_v16, %s1844_s1 }
0x1231   :  { %v591_v18 = vpop.permute.xlu0 %590 }
0x1232   :  { %vm592_vm2 = vcmp.eq.s32.totalorder %v591_v18, 1 }
0x12a2   :  { %v577_v62 = vpop.permute.xlu1 %576 }
0x12a3   :  { %v579_v17 = vmul.f32 %v1799_v11, %v577_v62  ;;  %v677_v11 = vsel %vm1646_vm4, 1, %v1842_v24 }
0x12a5   :  { %581 = vrot.lane.b32.xlu1 %v579_v17, %s1843_s8 }
0x1317   :  { %v582_v19 = vpop.permute.xlu1 %581 }
0x1318   :  { %v584_v21 = vadd.f32 %v1801_v4, %v582_v19 }
0x131a   :  { %v593_v22 = vsel %vm592_vm2, %v584_v21, 0.0  ;;  %v2241_v25 = vsel %vm592_vm2, %v584_v21, %v2174_v30 }
0x131b   :  { %v1037_v26 = vcombine.high %v593_v22, %v593_v22  ;;  %v1044_v29 = vrot.slane %v593_v22, %v1959_v3  ;;  %v595_v31 = vpack.c.bf16 %v2241_v25, %v2241_v25 }
0x131d   :  { %v1051_v32 = vrot.slane %v1037_v26, %v1959_v3  ;;  %v1052_v33 = vcombine.high %v1044_v29, %v1044_v29  ;;  %v1060_v34 = vrot.slane %v1044_v29, %v1959_v3  ;;  %597 = vrot.lane.b32.xlu0 %v595_v31, %s1841_s27 }
0x131f   :  { %v1053_v35 = vcombine.high %v1051_v32, %v1051_v32  ;;  %v1067_v13 = vrot.slane %v1051_v32, %v1959_v3  ;;  %v1074_v30 = vrot.slane %v1052_v33, %v1959_v3  ;;  %v1082_v27 = vcombine.high %v1060_v34, %v1060_v34 }
0x1320   :  { %v1349_v36 = vrot.slane %v1060_v34, %v1970_v20 }
0x1321   :  { %v1081_v28 = vrot.slane %v1053_v35, %v1959_v3  ;;  %v1083_v37 = vcombine.high %v1067_v13, %v1067_v13  ;;  %v1084_v38 = vcombine.high %v1074_v30, %v1074_v30  ;;  %v1353_v39 = vrot.slane %v1074_v30, %v1970_v20 }
0x1322   :  { %v1357_v40 = vrot.slane %v1082_v27, %v1970_v20  ;;  %v1365_v41 = vrot.slane %v1067_v13, %v1970_v20  ;;  %v2258_v43 = vsel %vm1502_vm3, %v2191_v51, %v1349_v36 }
0x1323   :  { %v1085_v44 = vcombine.high %v1081_v28, %v1081_v28  ;;  %v1361_v47 = vrot.slane %v1084_v38, %v1970_v20  ;;  %v1369_v56 = vrot.slane %v1081_v28, %v1970_v20  ;;  %v1373_v42 = vrot.slane %v1083_v37, %v1970_v20 }
0x1324   :  { %v2265_v45 = vsel %vm1502_vm3, %v2198_v60, %v1353_v39  ;;  %v2269_v59 = vsel %vm1502_vm3, %v2202_v61, %v1357_v40  ;;  %v2273_v46 = vsel %vm1502_vm3, %v2206_v48, %v1365_v41 }
0x1325   :  { %v2277_v51 = vsel %vm1502_vm3, %v2211_v63, %v1361_v47  ;;  %v2281_v53 = vsel %vm1502_vm3, %v2215_v49, %v1369_v56  ;;  %v2285_v60 = vsel %vm1502_vm3, %v2219_v50, %v1373_v42  ;;  %v1377_v54 = vrot.slane %v1085_v44, %v1970_v20  ;;  %v2298_v50 = vld [vmem:[%s2457_s0 + $0x18] sm:$0xff]  }
0x1326   :  { %v644_v58 = vunpack.c.l.bf16 %v2298_v50 }
0x1327   :  { %v2290_v61 = vsel %vm1502_vm3, %v2223_v52, %v1377_v54 }
0x138f   :  { %v598_v48 = vpop.permute.xlu0 %597 }
0x1390   :  { %1744 = vmatmul.mubr.msk.bf16.vlgmr.msra.gmra.mrb[12].mxu0 %vm29_vm1, %v598_v48 }
0x1463   :  { %v636_v55 = vpop.f32.mrb[12].mxu0 }
0x1464   :  { %v637_v63 = vadd.f32 %v1920_v6, %v636_v55  ;;  %v1745_v57 = vpop.f32.mrb[13].mxu0 }
0x1465   :  { %v639_v5 = vpop.f32.mrb[14].mxu0 }
0x1466   :  { %653 = vrot.lane.b32.xlu1 %v637_v63, %s1841_s27  ;;  %v1746_v49 = vpop.f32.mrb[15].mxu0  ;;  %v645_v52 = vadd.f32 %v644_v58, %v637_v63 }
0x1468   :  { %v1645_v7 = vmul.f32 -1.442695, %v645_v52 }
0x146a   :  { %1802 = vpow2.f32 %v1645_v7 }
0x1474   :  { %v1803_v8 = vpop.eup %1802 }
0x1475   :  { %v649_v9 = vadd.f32 1.0, %v1803_v8 }
0x1477   :  { %1804 = vrcp.f32 %v649_v9 }
0x1481   :  { %v1805_v0 = vpop.eup %1804 }
0x14d8   :  { %v654_v6 = vpop.permute.xlu1 %653 }
0x14d9   :  { %v656_v10 = vmul.f32 %v1805_v0, %v654_v6  ;;  %v766_v6 = vsel %vm1650_vm7, 1, %v1842_v24 }
0x14db   :  { %658 = vrot.lane.b32.xlu0 %v656_v10, %s1841_s27 }
0x14df   :  { %679 = vperm.xlu0 %1763, %v677_v11  }
0x154d   :  { %v659_v1 = vpop.permute.xlu0 %658 }
0x154e   :  { %v661_v12 = vadd.f32 %v659_v1, %v644_v58 }
0x1550   :  { %1806 = vtanh.f32 %v661_v12 }
0x155a   :  { %v1807_v2 = vpop.eup %1806 }
0x155b   :  { %v663_v14 = vsub.f32 %v2241_v25, %v1807_v2 }
0x155d   :  { %665 = vrot.lane.b32.xlu1 %v663_v14, %s1844_s1 }
0x155e   :  { %v680_v16 = vpop.permute.xlu0 %679 }
0x155f   :  { %vm681_vm5 = vcmp.eq.s32.totalorder %v680_v16, 1 }
0x15cf   :  { %v666_v15 = vpop.permute.xlu1 %665 }
0x15d0   :  { %v668_v4 = vmul.f32 %v1805_v0, %v666_v15 }
0x15d2   :  { %670 = vrot.lane.b32.xlu1 %v668_v4, %s1843_s8 }
0x1644   :  { %v671_v62 = vpop.permute.xlu1 %670 }
0x1645   :  { %v673_v17 = vadd.f32 %v1807_v2, %v671_v62 }
0x1647   :  { %v682_v18 = vsel %vm681_vm5, %v673_v17, 0.0  ;;  %v2308_v19 = vsel %vm681_vm5, %v673_v17, %v2241_v25 }
0x1648   :  { %v1087_v21 = vcombine.high %v682_v18, %v682_v18  ;;  %v1094_v22 = vrot.slane %v682_v18, %v1959_v3  ;;  %v684_v26 = vpack.c.bf16 %v2308_v19, %v2308_v19 }
0x164a   :  { %v1101_v29 = vrot.slane %v1087_v21, %v1959_v3  ;;  %v1102_v31 = vcombine.high %v1094_v22, %v1094_v22  ;;  %v1110_v32 = vrot.slane %v1094_v22, %v1959_v3  ;;  %686 = vrot.lane.b32.xlu0 %v684_v26, %s1841_s27 }
0x164c   :  { %v1103_v33 = vcombine.high %v1101_v29, %v1101_v29  ;;  %v1117_v34 = vrot.slane %v1101_v29, %v1959_v3  ;;  %v1124_v25 = vrot.slane %v1102_v31, %v1959_v3  ;;  %v1132_v35 = vcombine.high %v1110_v32, %v1110_v32 }
0x164d   :  { %v1389_v13 = vrot.slane %v1110_v32, %v1970_v20 }
0x164e   :  { %v1131_v30 = vrot.slane %v1103_v33, %v1959_v3  ;;  %v1133_v27 = vcombine.high %v1117_v34, %v1117_v34  ;;  %v1134_v36 = vcombine.high %v1124_v25, %v1124_v25  ;;  %v1393_v28 = vrot.slane %v1124_v25, %v1970_v20 }
0x164f   :  { %v1397_v37 = vrot.slane %v1132_v35, %v1970_v20  ;;  %v1405_v38 = vrot.slane %v1117_v34, %v1970_v20  ;;  %v2325_v39 = vsel %vm1511_vm6, %v2258_v43, %v1389_v13 }
0x1650   :  { %v1135_v40 = vcombine.high %v1131_v30, %v1131_v30  ;;  %v2329_v41 = vsel %vm1511_vm6, %v2265_v45, %v1393_v28  ;;  %v1401_v44 = vrot.slane %v1134_v36, %v1970_v20  ;;  %v1409_v47 = vrot.slane %v1131_v30, %v1970_v20 }
0x1651   :  { %v2335_v56 = vsel %vm1511_vm6, %v2269_v59, %v1397_v37  ;;  %v2339_v42 = vsel %vm1511_vm6, %v2273_v46, %v1405_v38  ;;  %v1413_v43 = vrot.slane %v1133_v27, %v1970_v20 }
0x1652   :  { %v2344_v54 = vsel %vm1511_vm6, %v2277_v51, %v1401_v44  ;;  %v2348_v45 = vsel %vm1511_vm6, %v2281_v53, %v1409_v47  ;;  %v1417_v48 = vrot.slane %v1135_v40, %v1970_v20  ;;  %v1814_v51 = vld [vmem:[%s2461_s4] ss:$0 sm:$0xff]  ;;  %s1846_s4 = smov [#allocation3]  }
0x1653   :  { %v2353_v59 = vsel %vm1511_vm6, %v2285_v60, %v1413_v43  ;;  %v733_v60 = vunpack.c.h.bf16 %v2298_v50  ;;  %s1607_s16 = sshll.u32 %s1846_s4, 4  ;;  %s1608_s16 = int_to_ptr.vmem [resolvable:$true] %s1607_s16 }
0x1654   :  { %v2357_v46 = vsel %vm1511_vm6, %v2290_v61, %v1417_v48  ;;  %s1815_s17 = scalar_lea.vmem %s1608_s16, 128  ;;  %p1820_p1 = scmp.lt.s32.totalorder %s1608_s16, %s1608_s16 }
0x1655   :  { %p1816_p0 = scmp.ne.s32.totalorder %s1608_s16, %s1815_s17  ;;  %p1821_p2 = scmp.lt.s32.totalorder %s1815_s17, %s1815_s17 }
0x1657   :  { %p1822_p3 = por %p1821_p2, %p1820_p1 }
0x1659   :  { %p1823_p4 = pnand %p1822_p3, %p1816_p0 }
0x16bc   :  { %v687_v55 = vpop.permute.xlu0 %686 }
0x16bd   :  { %1752 = vmatmul.mubr.msk.bf16.vlgmr.msra.gmra.mrb[12].mxu1 %vm29_vm1, %v687_v55 }
0x1790   :  { %v725_v63 = vpop.f32.mrb[12].mxu1 }
0x1791   :  { %v726_v53 = vadd.f32 %v1814_v51, %v725_v63  ;;  %v1753_v57 = vpop.f32.mrb[13].mxu1 }
0x1792   :  { %v728_v5 = vpop.f32.mrb[14].mxu1 }
0x1793   :  { %742 = vrot.lane.b32.xlu1 %v726_v53, %s1841_s27  ;;  %v1754_v49 = vpop.f32.mrb[15].mxu1  ;;  %v734_v58 = vadd.f32 %v733_v60, %v726_v53 }
0x1795   :  { %v1649_v52 = vmul.f32 -1.442695, %v734_v58 }
0x1797   :  { %1808 = vpow2.f32 %v1649_v52 }
0x17a1   :  { %v1809_v61 = vpop.eup %1808 }
0x17a2   :  { %v738_v7 = vadd.f32 1.0, %v1809_v61 }
0x17a4   :  { %1810 = vrcp.f32 %v738_v7 }
0x17ae   :  { %v1811_v8 = vpop.eup %1810 }
0x1805   :  { %v743_v9 = vpop.permute.xlu1 %742 }
0x1806   :  { %v745_v0 = vmul.f32 %v1811_v8, %v743_v9 }
0x1808   :  { %747 = vrot.lane.b32.xlu0 %v745_v0, %s1841_s27 }
0x180c   :  { %768 = vperm.xlu0 %1763, %v766_v6  }
0x187a   :  { %v748_v10 = vpop.permute.xlu0 %747 }
0x187b   :  { %v750_v11 = vadd.f32 %v748_v10, %v733_v60 }
0x187d   :  { %1812 = vtanh.f32 %v750_v11 }
0x1887   :  { %v1813_v50 = vpop.eup %1812 }
0x1888   :  { %v752_v1 = vsub.f32 %v2308_v19, %v1813_v50 }
0x188a   :  { %754 = vrot.lane.b32.xlu1 %v752_v1, %s1844_s1 }
0x188b   :  { %v769_v14 = vpop.permute.xlu0 %768 }
0x188c   :  { %vm770_vm8 = vcmp.eq.s32.totalorder %v769_v14, 1 }
0x18fc   :  { %v755_v12 = vpop.permute.xlu1 %754 }
0x18fd   :  { %v757_v2 = vmul.f32 %v1811_v8, %v755_v12 }
0x18ff   :  { %759 = vrot.lane.b32.xlu1 %v757_v2, %s1843_s8 }
0x1971   :  { %v760_v15 = vpop.permute.xlu1 %759 }
0x1972   :  { %v762_v23 = vadd.f32 %v1813_v50, %v760_v15 }
0x1974   :  { %v771_v4 = vsel %vm770_vm8, %v762_v23, 0.0  ;;  %v772_v24 = vsel %vm770_vm8, %v762_v23, %v2308_v19 }
0x1975   :  { %v1137_v16 = vcombine.high %v771_v4, %v771_v4  ;;  %v1144_v62 = vrot.slane %v771_v4, %v1959_v3  ;;  %774 = vrot.lane.b32.xlu0 %v772_v24, %s1841_s27 }
0x1977   :  { %v1151_v17 = vrot.slane %v1137_v16, %v1959_v3  ;;  %v1152_v18 = vcombine.high %v1144_v62, %v1144_v62  ;;  %v1160_v21 = vrot.slane %v1144_v62, %v1959_v3 }
0x1979   :  { %v1153_v22 = vcombine.high %v1151_v17, %v1151_v17  ;;  %v1174_v26 = vrot.slane %v1152_v18, %v1959_v3  ;;  %v1182_v29 = vcombine.high %v1160_v21, %v1160_v21  ;;  %v1167_v31 = vrot.slane %v1151_v17, %v1959_v3 }
0x197a   :  { %v1429_v32 = vrot.slane %v1160_v21, %v1970_v20 }
0x197b   :  { %v1181_v19 = vrot.slane %v1153_v22, %v1959_v3  ;;  %v1184_v33 = vcombine.high %v1174_v26, %v1174_v26  ;;  %v1433_v34 = vrot.slane %v1174_v26, %v1970_v20  ;;  %v1437_v35 = vrot.slane %v1182_v29, %v1970_v20 }
0x197c   :  { %v1521_v25 = vsel %vm1520_vm9, %v2325_v39, %v1429_v32  ;;  %v1183_v36 = vcombine.high %v1167_v31, %v1167_v31  ;;  %v1445_v3 = vrot.slane %v1167_v31, %v1970_v20 }
0x197d   :  { %v1659_v13 = vpack.c.bf16 %v1521_v25, %v1521_v25  ;;  %v1522_v30 = vsel %vm1520_vm9, %v2329_v41, %v1433_v34  ;;  %v1441_v27 = vrot.slane %v1184_v33, %v1970_v20  ;;  %v1523_v37 = vsel %vm1520_vm9, %v2335_v56, %v1437_v35 }
0x197e   :  { %v1660_v28 = vpack.c.bf16 %v1522_v30, %v1522_v30  ;;  %v1449_v39 = vrot.slane %v1181_v19, %v1970_v20  ;;  %v1185_v40 = vcombine.high %v1181_v19, %v1181_v19  ;;  %v1661_v41 = vpack.c.bf16 %v1523_v37, %v1523_v37 }
0x197f   :  { %1561 = vrot.lane.b32.xlu1 %v1659_v13, %s1841_s27  ;;  %v1524_v38 = vsel %vm1520_vm9, %v2344_v54, %v1441_v27  ;;  %v1525_v47 = vsel %vm1520_vm9, %v2339_v42, %v1445_v3  ;;  %v1453_v43 = vrot.slane %v1183_v36, %v1970_v20 }
0x1980   :  { %1563 = vrot.lane.b32.xlu0 %v1660_v28, %s1841_s27  ;;  %v1662_v44 = vpack.c.bf16 %v1524_v38, %v1524_v38  ;;  %v1526_v56 = vsel %vm1520_vm9, %v2348_v45, %v1449_v39  ;;  %v1457_v48 = vrot.slane %v1185_v40, %v1970_v20  ;;  %v1663_v54 = vpack.c.bf16 %v1525_v47, %v1525_v47 }
0x1981   :  { %v1664_v55 = vpack.c.bf16 %v1526_v56, %v1526_v56  ;;  %v1527_v63 = vsel %vm1520_vm9, %v2353_v59, %v1453_v43 }
0x1982   :  { %v1528_v42 = vsel %vm1520_vm9, %v2357_v46, %v1457_v48  ;;  %v1665_v51 = vpack.c.bf16 %v1527_v63, %v1527_v63 }
0x1983   :  { %1565 = vrot.lane.b32.xlu1 %v1661_v41, %s1841_s27  ;;  %v1666_v53 = vpack.c.bf16 %v1528_v42, %v1528_v42 }
0x1984   :  { %1567 = vrot.lane.b32.xlu0 %v1662_v44, %s1841_s27 }
0x1987   :  { %1569 = vrot.lane.b32.xlu1 %v1663_v54, %s1841_s27 }
0x1988   :  { %1571 = vrot.lane.b32.xlu0 %v1664_v55, %s1841_s27 }
0x198b   :  { %1573 = vrot.lane.b32.xlu1 %v1665_v51, %s1841_s27 }
0x198c   :  { %1575 = vrot.lane.b32.xlu0 %v1666_v53, %s1841_s27 }
0x19e7   :  { %v775_v20 = vpop.permute.xlu0 %774 }
0x19e8   :  { %777 = vst.msk [vmem:[#allocation2] sm:$0xff] %vm29_vm1, %v775_v20 }
0x19ef   :  { %v1597_v45 = vld [vmem:[#allocation2] sm:$0xff] }
0x19f0   :  { %1598 = vst.msk [vmem:[#allocation3] sm:$0xff] %vm29_vm1, %v1597_v45 }
0x19f1   :  { %v1562_v59 = vpop.permute.xlu1 %1561 }
0x19f2   :  { %1826 = shalt.err (!%p1823_p4)
}
0x19f3   :  { %s1827_s20 = scalar_lea.hbm %s2463_s6, 128 }
0x19f4   :  { %p1828_p5 = scmp.ne.s32.totalorder %s2463_s6, %s1827_s20  ;;  %p1831_p6 = scmp.lt.u32.totalorder %s1827_s20, %s2463_s6 }
0x19f6   :  { %p1833_p7 = pnand %p1831_p6, %p1828_p5 }
0x19f8   :  { %1836 = shalt.err (!%p1833_p7)
}
0x19f9   :  { %1610 = dma.vmem_to_hbm [thread:$0]  %s1608_s16, 128, %s2463_s6, [#allocation4]   ;;  %1586 = vst.msk [vmem:[%s2462_s5] sm:$0xf] %vm1585_vm10, %v1562_v59  ;;  %v1564_v46 = vpop.permute.xlu0 %1563  ;;  %v1566_v57 = vpop.permute.xlu1 %1565 }
0x19fa   :  { %1587 = vst.msk [vmem:[%s2462_s5 + $0x4] sm:$0xf] %vm1585_vm10, %v1564_v46  ;;  %1588 = vst.msk [vmem:[%s2462_s5 + $0x8] sm:$0xf] %vm1585_vm10, %v1566_v57 }
0x19fd   :  { %v1568_v5 = vpop.permute.xlu0 %1567  ;;  %v1570_v49 = vpop.permute.xlu1 %1569 }
0x19fe   :  { %1589 = vst.msk [vmem:[%s2462_s5 + $0xc] sm:$0xf] %vm1585_vm10, %v1568_v5  ;;  %1590 = vst.msk [vmem:[%s2462_s5 + $0x10] sm:$0xf] %vm1585_vm10, %v1570_v49 }
0x1a01   :  { %v1572_v60 = vpop.permute.xlu0 %1571  ;;  %v1574_v58 = vpop.permute.xlu1 %1573 }
0x1a02   :  { %1591 = vst.msk [vmem:[%s2462_s5 + $0x14] sm:$0xf] %vm1585_vm10, %v1572_v60  ;;  %1592 = vst.msk [vmem:[%s2462_s5 + $0x18] sm:$0xf] %vm1585_vm10, %v1574_v58 }
0x1a05   :  { %v1576_v52 = vpop.permute.xlu0 %1575 }
0x1a06   :  { %1593 = vst.msk [vmem:[%s2462_s5 + $0x1c] sm:$0xf] %vm1585_vm10, %v1576_v52 }
0x1a07   :  { %1837 = dma.done.wait [#allocation4], 128  }
0x1a08   :  { %1838 = vsyncadd [#allocation4], 4294967168 }
0x1a09   :  { %1616 = vsyncpa [#allocation4], 1 }

// kernel: attention_gru_forward.12
= control target key start
LH: loop header
LB: loop body
LE: loop exit
PB: predicated region body
PF: predicated region fallthrough
CT: control target
= control target key end

     0   :  { %v200_v0 = vmov 0.0   ;;  %vm201_vm0 = vmmov 0   ;;  %vm54_vm1 = vcmask 261120   ;;  %vm19_vm2 = vcmask 7168   ;;  %s252_s1 = inlined_call_operand.vmem [shape: bf16[32,128], index: 1, kind: input, shape index: {}]   ;;  %s253_s0 = inlined_call_operand.vmem [shape: bf16[16,32], index: 0, kind: input, shape index: {}]   ;;  %s254_s2 = inlined_call_operand.vmem [shape: f32[1,128], index: 2, kind: input, shape index: {}]   ;;  %s255_s3 = inlined_call_operand.vmem [shape: f32[16,1], index: 3, kind: output, shape index: {}]  }
   0x1   :  { %171 = vmatprep.subr.bf16.mxu0 %v200_v0  ;;  %v185_v1 = vld [vmem:[%s252_s1] sm:$0xff]   ;;  %175 = vmatprep.mubr.msk.bf16.mxu0 %vm201_vm0, %v200_v0  ;;  %v186_v2 = vld [vmem:[%s252_s1 + $0x8] sm:$0xff]   ;;  %v202_v4 = vmov -inf   ;;  %22 = vst.msk [vmem:[#allocation3] sm:$0xff] %vm19_vm2, %v200_v0  ;;  %23 = vst.msk [vmem:[#allocation3 + $0x8] sm:$0xff] %vm19_vm2, %v200_v0  ;;  %v203_v12 = vmov 0  }
   0x2   :  { %172 = vmatpush3.bf16.msra.mxu0 %v185_v1  ;;  %v187_v3 = vld [vmem:[%s253_s0] sm:$0xff]   ;;  %20 = vst.msk [vmem:[#allocation2] sm:$0xff] %vm19_vm2, %v202_v4  ;;  %21 = vst.msk [vmem:[#allocation2 + $0x8] sm:$0xff] %vm19_vm2, %v202_v4  ;;  %183 = vset.pattern.permute.xlu1 %v203_v12 }
   0x3   :  { %173 = vmatprep.subr.bf16.mxu0 %v200_v0  ;;  %v163_v5 = vld [vmem:[%s254_s2] ss:$0 sm:$0xff]  ;;  %184 = vset.pattern.permute.xlu0 %v203_v12 }
   0x6   :  { %174 = vmatpush3.bf16.msra.mxu0 %v186_v2 }
   0x8   :  { %v107_v32 = vld [vmem:[#allocation3] sm:$0xff]  ;;  %v108_v36 = vld [vmem:[#allocation3 + $0x8] sm:$0xff] }
   0x9   :  { %176 = vmatmul.mubr.msk.bf16.vlgmr.msra.gmra.mrb[0].mxu0 %vm54_vm1, %v187_v3  ;;  %v99_v13 = vld [vmem:[#allocation2] sm:$0xff]  ;;  %v100_v16 = vld [vmem:[#allocation2 + $0x8] sm:$0xff] }
  0xdc   :  { %v92_v6 = vpop.f32.mrb[0].mxu0 }
  0xdd   :  { %v93_v7 = vadd.f32 %v163_v5, %v92_v6  ;;  %v177_v8 = vpop.f32.mrb[1].mxu0 }
  0xde   :  { %v95_v9 = vpop.f32.mrb[2].mxu0 }
  0xdf   :  { %101 = vmax.xlane.f32.xlu0 %v93_v7  ;;  %v178_v10 = vpop.f32.mrb[3].mxu0  ;;  %v96_v11 = vadd.f32 %v163_v5, %v95_v9 }
  0xe3   :  { %103 = vmax.xlane.f32.xlu0 %v96_v11 }
 0x16c   :  { %v102_v14 = vpop.xlane.xlu0 %101 }
 0x16d   :  { %v105_v15 = vmax.f32 %v99_v13, %v102_v14 }
 0x16f   :  { %v109_v17 = vsub.f32 %v99_v13, %v105_v15  ;;  %142 = vst.msk [vmem:[#allocation2] sm:$0xff] %vm19_vm2, %v105_v15  ;;  %119 = vperm.xlu1 %183, %v105_v15  }
 0x170   :  { %v104_v18 = vpop.xlane.xlu0 %103 }
 0x171   :  { %v106_v19 = vmax.f32 %v100_v16, %v104_v18  ;;  %v111_v29 = vmul.f32 1.442695, %v109_v17 }
 0x173   :  { %v110_v20 = vsub.f32 %v100_v16, %v106_v19  ;;  %143 = vst.msk [vmem:[#allocation2 + $0x8] sm:$0xff] %vm19_vm2, %v106_v19  ;;  %124 = vperm.xlu1 %183, %v106_v19  }
 0x175   :  { %v113_v30 = vmul.f32 1.442695, %v110_v20 }
 0x176   :  { %v147_v45 = vld [vmem:[#allocation2] sm:$0xff] }
 0x17a   :  { %v148_v49 = vld [vmem:[#allocation2 + $0x8] sm:$0xff] }
 0x1ee   :  { %v120_v21 = vpop.permute.xlu1 %119 }
 0x1ef   :  { %v127_v22 = vsub.f32 %v93_v7, %v120_v21 }
 0x1f1   :  { %v129_v23 = vmul.f32 1.442695, %v127_v22 }
 0x1f2   :  { %v125_v24 = vpop.permute.xlu1 %124 }
 0x1f3   :  { %188 = vpow2.f32 %v129_v23  ;;  %v128_v25 = vsub.f32 %v96_v11, %v125_v24 }
 0x1f5   :  { %v131_v26 = vmul.f32 1.442695, %v128_v25 }
 0x1f7   :  { %190 = vpow2.f32 %v131_v26 }
 0x1f8   :  { %192 = vpow2.f32 %v111_v29 }
 0x1f9   :  { %194 = vpow2.f32 %v113_v30 }
 0x1fd   :  { %v189_v27 = vpop.eup %188 }
 0x1fe   :  { %133 = vadd.xlane.f32.xlu0 %v189_v27 }
 0x201   :  { %v191_v28 = vpop.eup %190 }
 0x202   :  { %135 = vadd.xlane.f32.xlu1 %v191_v28  ;;  %v193_v31 = vpop.eup %192 }
 0x203   :  { %v115_v33 = vmul.f32 %v193_v31, %v107_v32  ;;  %v195_v34 = vpop.eup %194 }
 0x204   :  { %v116_v38 = vmul.f32 %v195_v34, %v108_v36 }
 0x28b   :  { %v134_v35 = vpop.xlane.xlu0 %133 }
 0x28c   :  { %v137_v37 = vadd.f32 %v134_v35, %v115_v33 }
 0x28e   :  { %140 = vst.msk [vmem:[#allocation3] sm:$0xff] %vm19_vm2, %v137_v37 }
 0x28f   :  { %v136_v39 = vpop.xlane.xlu1 %135 }
 0x290   :  { %v138_v40 = vadd.f32 %v136_v39, %v116_v38 }
 0x292   :  { %141 = vst.msk [vmem:[#allocation3 + $0x8] sm:$0xff] %vm19_vm2, %v138_v40 }
 0x295   :  { %v149_v41 = vld [vmem:[#allocation3] sm:$0xff] }
 0x296   :  { %196 = vlog2.f32 %v149_v41 }
 0x299   :  { %v150_v42 = vld [vmem:[#allocation3 + $0x8] sm:$0xff] }
 0x29a   :  { %198 = vlog2.f32 %v150_v42 }
 0x2a0   :  { %v197_v43 = vpop.eup %196 }
 0x2a1   :  { %v152_v44 = vmul.f32 0.6931472, %v197_v43 }
 0x2a3   :  { %v155_v46 = vadd.f32 %v152_v44, %v147_v45 }
 0x2a4   :  { %v199_v47 = vpop.eup %198 }
 0x2a5   :  { %157 = vst.msk [vmem:[%s255_s3] sm:$0xff] %vm19_vm2, %v155_v46  ;;  %v154_v48 = vmul.f32 0.6931472, %v199_v47 }
 0x2a7   :  { %v156_v50 = vadd.f32 %v154_v48, %v148_v49 }
 0x2a9   :  { %158 = vst.msk [vmem:[%s255_s3 + $0x8] sm:$0xff] %vm19_vm2, %v156_v50 }

// kernel: attention_gru_forward.13
= control target key start
LH: loop header
LB: loop body
LE: loop exit
PB: predicated region body
PF: predicated region fallthrough
CT: control target
= control target key end

     0   :  { %v136_v0 = vmov 0.0   ;;  %vm137_vm0 = vmmov 0   ;;  %v138_v2 = vmov 0   ;;  %vm48_vm1 = vcmask 261120   ;;  %s188_s1 = inlined_call_operand.vmem [shape: bf16[32,128], index: 1, kind: input, shape index: {}]   ;;  %s189_s3 = inlined_call_operand.vmem [shape: f32[16,1], index: 3, kind: input, shape index: {}]   ;;  %s190_s0 = inlined_call_operand.vmem [shape: bf16[16,32], index: 0, kind: input, shape index: {}]   ;;  %s191_s2 = inlined_call_operand.vmem [shape: f32[1,128], index: 2, kind: input, shape index: {}]   ;;  %s192_s4 = inlined_call_operand.vmem [shape: f32[16,128], index: 4, kind: output, shape index: {}]  }
   0x1   :  { %121 = vmatprep.subr.bf16.mxu0 %v136_v0  ;;  %v133_v1 = vld [vmem:[%s188_s1] sm:$0xff]   ;;  %125 = vmatprep.mubr.msk.bf16.mxu0 %vm137_vm0, %v136_v0  ;;  %v134_v3 = vld [vmem:[%s188_s1 + $0x8] sm:$0xff]  }
   0x2   :  { %132 = vset.pattern.permute.xlu0 %v138_v2  ;;  %122 = vmatpush3.bf16.msra.mxu0 %v133_v1  ;;  %v93_v4 = vld [vmem:[%s189_s3] sm:$0xff]  ;;  %v94_v6 = vld [vmem:[%s189_s3 + $0x8] sm:$0xff] }
   0x3   :  { %123 = vmatprep.subr.bf16.mxu0 %v136_v0  ;;  %97 = vperm.xlu0 %132, %v93_v4   ;;  %v135_v5 = vld [vmem:[%s190_s0] sm:$0xff]  }
   0x4   :  { %v113_v8 = vld [vmem:[%s191_s2] ss:$0 sm:$0xff] }
   0x6   :  { %124 = vmatpush3.bf16.msra.mxu0 %v134_v3 }
   0x7   :  { %102 = vperm.xlu0 %132, %v94_v6  }
   0x9   :  { %126 = vmatmul.mubr.msk.bf16.vlgmr.msra.gmra.mrb[0].mxu0 %vm48_vm1, %v135_v5 }
  0x82   :  { %v98_v7 = vpop.permute.xlu0 %97 }
  0x86   :  { %v103_v16 = vpop.permute.xlu0 %102 }
  0xdc   :  { %v86_v9 = vpop.f32.mrb[0].mxu0 }
  0xdd   :  { %v87_v10 = vadd.f32 %v113_v8, %v86_v9  ;;  %v127_v11 = vpop.f32.mrb[1].mxu0 }
  0xde   :  { %v89_v12 = vpop.f32.mrb[2].mxu0 }
  0xdf   :  { %v105_v13 = vsub.f32 %v87_v10, %v98_v7  ;;  %v90_v14 = vadd.f32 %v113_v8, %v89_v12  ;;  %v128_v15 = vpop.f32.mrb[3].mxu0 }
  0xe1   :  { %107 = vst [vmem:[%s192_s4] sm:$0xff] %v105_v13  ;;  %v106_v17 = vsub.f32 %v90_v14, %v103_v16 }
  0xe3   :  { %108 = vst [vmem:[%s192_s4 + $0x8] sm:$0xff] %v106_v17 }

</bundles_post_ra>
